<compile_context>
chip_gen: v5e
topology: v5e:2x2
jax: 0.10.0
libtpu: 0.0.40
codegen_flags: <defaults>
</compile_context>

<pallas_src>
import jax
import jax.numpy as jnp
import numpy as np
from jax.experimental import pallas as pl
from jax.experimental.pallas import tpu as pltpu

# ----------------------------- config -----------------------------
INPUT_SIZE = 6
HIDDEN = 32
NUM_HEADS = 4
HEAD_DIM = HIDDEN // NUM_HEADS
DIM_FF = HIDDEN * 4
NUM_LAYERS = 4
NUM_CLASSES = 12
K1, K2 = 5, 3
PAD = 1
LN_EPS = 1e-5
BN_EPS = 1e-5
ROPE_BASE = 10000.0
FC_PAD = 128          # lane-dense padded width for the classifier output


# ----------------------------- fused Pallas kernel -----------------------------
def har_fused_kernel(
        x_ref,                                            # (1, T, C_in)
        cw1_ref, cb1_ref, bn1s_ref, bn1t_ref,             # conv1 + BN1(eval)
        cw2_ref, cb2_ref, bn2s_ref, bn2t_ref,             # conv2 + BN2(eval)
        cls_ref,                                          # (1, HIDDEN)
        cos2_ref, sin2_ref, p2_ref,                       # RoPE tables (S,64),(S,64),(64,64)
        wqkv_ref, bqkv_ref, wout_ref, bout_ref,           # attention
        g1_ref, be1_ref,                                  # LN1
        wff1_ref, bff1_ref, wff2_ref, bff2_ref,           # FFN
        g2_ref, be2_ref,                                  # LN2
        wfc_ref, bfc_ref,                                 # classifier (padded to FC_PAD)
        out_ref,                                          # (1, 1, FC_PAD)
        xpad_ref, hp_ref, emb_ref):                       # VMEM scratch
    T = x_ref.shape[1]
    t_out = T + 2 * PAD - K1 + 1
    S = emb_ref.shape[0]

    f32 = jnp.float32

    # ---------------- conv tokenizer ----------------
    # zero-pad input in VMEM (replaces wrapper-side jnp.pad)
    xpad_ref[0:PAD, :] = jnp.zeros((PAD, INPUT_SIZE), f32)
    xpad_ref[PAD + T:, :] = jnp.zeros((PAD, INPUT_SIZE), f32)
    xpad_ref[PAD:PAD + T, :] = x_ref[0]

    # Conv1 (k=5) as K1 shifted matmuls on the MXU (row-sliced reads of scratch).
    acc = jnp.zeros((t_out, HIDDEN), f32) + cb1_ref[...]
    for k in range(K1):
        acc = acc + jnp.dot(xpad_ref[k:k + t_out, :], cw1_ref[k],
                            preferred_element_type=f32)
    h = jnp.maximum(acc, 0.0) * bn1s_ref[...] + bn1t_ref[...]        # ReLU -> BN(eval)

    # Conv2 (k=3) padding via zero-initialized scratch rows (no concatenate).
    hp_ref[0:PAD, :] = jnp.zeros((PAD, HIDDEN), f32)
    hp_ref[PAD + t_out:, :] = jnp.zeros((PAD, HIDDEN), f32)
    hp_ref[PAD:PAD + t_out, :] = h
    acc2 = jnp.zeros((t_out, HIDDEN), f32) + cb2_ref[...]
    for k in range(K2):
        acc2 = acc2 + jnp.dot(hp_ref[k:k + t_out, :], cw2_ref[k],
                              preferred_element_type=f32)
    h2 = jnp.maximum(acc2, 0.0) * bn2s_ref[...] + bn2t_ref[...]      # ReLU -> BN(eval)

    # prepend CLS directly in VMEM
    emb_ref[0:1, :] = cls_ref[...]
    emb_ref[1:1 + t_out, :] = h2
    x = emb_ref[...]                                                 # (S, HIDDEN)

    # ---------------- transformer encoder ----------------
    cos2 = cos2_ref[...]          # (S, 2*HIDDEN); q half pre-scaled by 1/sqrt(head_dim)
    sin2 = sin2_ref[...]
    P2 = p2_ref[...]              # (2*HIDDEN, 2*HIDDEN) block-diag pair-swap

    def layer_norm(y, g, b):
        mu = jnp.mean(y, axis=-1, keepdims=True)
        var = jnp.mean((y - mu) ** 2, axis=-1, keepdims=True)
        return (y - mu) * jax.lax.rsqrt(var + LN_EPS) * g + b

    for l in range(NUM_LAYERS):
        # Only the CLS row of the last layer feeds the classifier -> compute it alone.
        nq = 1 if l == NUM_LAYERS - 1 else S
        wout_l = wout_ref[l]                                         # (HIDDEN, HIDDEN)

        # --- RoPE multi-head self attention ---
        qkv = jnp.dot(x, wqkv_ref[l], preferred_element_type=f32) + bqkv_ref[l]
        # rotate q and k together in one (S,64) pass; attention scale is folded
        # into the q half of cos2/sin2.
        qk = qkv[:, :2 * HIDDEN]
        qk = qk * cos2 + jnp.dot(qk, P2, preferred_element_type=f32) * sin2
        q = qk[:nq, :HIDDEN]                                         # (nq, HIDDEN)
        k = qk[:, HIDDEN:]                                           # (S, HIDDEN)
        v = qkv[:, 2 * HIDDEN:]                                      # (S, HIDDEN)

        # output projection folded into the head loop (no lane concat)
        attn_out = jnp.zeros((nq, HIDDEN), f32) + bout_ref[l]
        for hh in range(NUM_HEADS):
            sl = slice(hh * HEAD_DIM, (hh + 1) * HEAD_DIM)
            qh, kh, vh = q[:, sl], k[:, sl], v[:, sl]
            s = jax.lax.dot_general(qh, kh, (((1,), (1,)), ((), ())),
                                    preferred_element_type=f32)      # (nq, S), pre-scaled
            s = s - jnp.max(s, axis=-1, keepdims=True)
            e = jnp.exp(s)
            attn = e * (1.0 / jnp.sum(e, axis=-1, keepdims=True))
            ctx = jnp.dot(attn, vh, preferred_element_type=f32)      # (nq, HEAD_DIM)
            attn_out = attn_out + jnp.dot(ctx, wout_l[sl, :],
                                          preferred_element_type=f32)
        x = layer_norm(x[:nq] + attn_out, g1_ref[l], be1_ref[l])     # (nq, HIDDEN)

        # --- feed-forward ---
        h1 = jnp.maximum(
            jnp.dot(x, wff1_ref[l], preferred_element_type=f32) + bff1_ref[l], 0.0)
        ff = jnp.dot(h1, wff2_ref[l], preferred_element_type=f32) + bff2_ref[l]
        x = layer_norm(x + ff, g2_ref[l], be2_ref[l])

    # ---------------- classification head (lane-dense 128-wide store) ----------------
    cls_out = x[0:1, :]                                              # (1, HIDDEN)
    out_ref[0] = jnp.dot(cls_out, wfc_ref[...], preferred_element_type=f32) + bfc_ref[...]


# ----------------------------- wrapper -----------------------------
def _bcast_spec(arr):
    # full-array block, constant block index -> fetched once, not re-DMA'd per step
    n = arr.ndim
    return pl.BlockSpec(arr.shape, lambda b, n=n: (0,) * n)


def har_transformer_forward(x, p, rope):
    """x: (B, T, INPUT_SIZE) -> logits (B, NUM_CLASSES)."""
    B, T, _ = x.shape
    t_out = T + 2 * PAD - K1 + 1
    S = t_out + 1

    cls2d = p['cls'].reshape(1, HIDDEN)
    wfc_pad = jnp.pad(p['wfc'], ((0, 0), (0, FC_PAD - NUM_CLASSES)))
    bfc_pad = jnp.pad(p['bfc'], ((0, 0), (0, FC_PAD - NUM_CLASSES)))

    args = (x,
            p['cw1'], p['cb1'], p['bn1_s'], p['bn1_t'],
            p['cw2'], p['cb2'], p['bn2_s'], p['bn2_t'],
            cls2d,
            rope['cos2'], rope['sin2'], rope['P2'],
            p['wqkv'], p['bqkv'], p['wout'], p['bout'],
            p['g1'], p['be1'],
            p['wff1'], p['bff1'], p['wff2'], p['bff2'],
            p['g2'], p['be2'],
            wfc_pad, bfc_pad)

    in_specs = [pl.BlockSpec((1, T, INPUT_SIZE), lambda b: (b, 0, 0))] + \
               [_bcast_spec(a) for a in args[1:]]

    out = pl.pallas_call(
        har_fused_kernel,
        out_shape=jax.ShapeDtypeStruct((B, 1, FC_PAD), jnp.float32),
        grid=(B,),
        in_specs=in_specs,
        out_specs=pl.BlockSpec((1, 1, FC_PAD), lambda b: (b, 0, 0)),
        scratch_shapes=[pltpu.VMEM((T + 2 * PAD, INPUT_SIZE), jnp.float32),
                        pltpu.VMEM((t_out + 2 * PAD, HIDDEN), jnp.float32),
                        pltpu.VMEM((S, HIDDEN), jnp.float32)],
        compiler_params=pltpu.CompilerParams(dimension_semantics=("parallel",)),
    )(*args)
    return out[:, 0, :NUM_CLASSES]


# ----------------------------- RoPE tables & params -----------------------------
def build_rope(seq_len):
    half = HEAD_DIM // 2
    theta = 1.0 / (ROPE_BASE ** (np.arange(0, HEAD_DIM, 2, dtype=np.float32) / HEAD_DIM))
    pos = np.arange(seq_len, dtype=np.float32)
    ang = np.outer(pos, theta)                                       # (S, half)
    cos, sin = np.cos(ang), np.sin(ang)
    # interleave to head_dim ([c0,c0,c1,c1,...]), tile across heads -> width HIDDEN,
    # then concat q|k halves -> width 2*HIDDEN. The attention scale 1/sqrt(head_dim)
    # is folded into the q half only, so the kernel never multiplies scores by it.
    cos_flat = np.tile(np.repeat(cos, 2, axis=1), (1, NUM_HEADS)).astype(np.float32)
    sin_flat = np.tile(np.repeat(sin, 2, axis=1), (1, NUM_HEADS)).astype(np.float32)
    scale = np.float32(1.0 / (HEAD_DIM ** 0.5))
    cos2 = np.concatenate([cos_flat * scale, cos_flat], axis=1)
    sin2 = np.concatenate([sin_flat * scale, sin_flat], axis=1)
    # block-diagonal pair-swap matrix over 2*NUM_HEADS head blocks:
    # (x @ P2)[2i] = -x[2i+1], (x @ P2)[2i+1] = x[2i]
    P2 = np.zeros((2 * HIDDEN, 2 * HIDDEN), np.float32)
    for g in range(2 * NUM_HEADS):
        off = g * HEAD_DIM
        for i in range(half):
            P2[off + 2 * i + 1, off + 2 * i] = -1.0
            P2[off + 2 * i, off + 2 * i + 1] = 1.0
    return {'cos_half': jnp.asarray(cos), 'sin_half': jnp.asarray(sin),
            'cos2': jnp.asarray(cos2), 'sin2': jnp.asarray(sin2),
            'P2': jnp.asarray(P2)}


def init_params(key):
    ks = list(jax.random.split(key, 24))
    nrm = lambda k, shape, s=0.1: (jax.random.normal(k, shape, jnp.float32) * s)
    uni = lambda k, shape, lo, hi: jax.random.uniform(k, shape, jnp.float32, lo, hi)

    p = {}
    # conv tokenizer
    p['cw1'] = nrm(ks[0], (K1, INPUT_SIZE, HIDDEN))
    p['cb1'] = nrm(ks[1], (1, HIDDEN), 0.05)
    p['cw2'] = nrm(ks[2], (K2, HIDDEN, HIDDEN))
    p['cb2'] = nrm(ks[3], (1, HIDDEN), 0.05)
    # BatchNorm (eval mode) folded into scale/shift
    for idx, name in ((4, 'bn1'), (5, 'bn2')):
        kk = jax.random.split(ks[idx], 4)
        gamma = uni(kk[0], (1, HIDDEN), 0.8, 1.2)
        beta = nrm(kk[1], (1, HIDDEN), 0.05)
        rmean = nrm(kk[2], (1, HIDDEN), 0.05)
        rvar = uni(kk[3], (1, HIDDEN), 0.5, 1.5)
        s = gamma / jnp.sqrt(rvar + BN_EPS)
        p[name + '_s'] = s
        p[name + '_t'] = beta - rmean * s
    # CLS token (torch initializes to zeros)
    p['cls'] = jnp.zeros((1, 1, HIDDEN), jnp.float32)
    # transformer layers (stacked along leading L axis; biases stored (L, 1, dim))
    L = NUM_LAYERS
    p['wqkv'] = nrm(ks[6], (L, HIDDEN, 3 * HIDDEN))
    p['bqkv'] = nrm(ks[7], (L, 1, 3 * HIDDEN), 0.05)
    p['wout'] = nrm(ks[8], (L, HIDDEN, HIDDEN))
    p['bout'] = nrm(ks[9], (L, 1, HIDDEN), 0.05)
    p['g1'] = jnp.ones((L, 1, HIDDEN), jnp.float32)
    p['be1'] = jnp.zeros((L, 1, HIDDEN), jnp.float32)
    p['wff1'] = nrm(ks[10], (L, HIDDEN, DIM_FF))
    p['bff1'] = nrm(ks[11], (L, 1, DIM_FF), 0.05)
    p['wff2'] = nrm(ks[12], (L, DIM_FF, HIDDEN))
    p['bff2'] = nrm(ks[13], (L, 1, HIDDEN), 0.05)
    p['g2'] = jnp.ones((L, 1, HIDDEN), jnp.float32)
    p['be2'] = jnp.zeros((L, 1, HIDDEN), jnp.float32)
    # classification head
    p['wfc'] = nrm(ks[14], (HIDDEN, NUM_CLASSES))
    p['bfc'] = nrm(ks[15], (1, NUM_CLASSES), 0.05)
    return p


# ----------------------------- pure-JAX reference (for validation) -----------------------------
def reference_forward(x, p, cos_half, sin_half):
    B, T, _ = x.shape
    t_out = T + 2 * PAD - K1 + 1
    xp = jnp.pad(x, ((0, 0), (PAD, PAD), (0, 0)))
    h = jnp.zeros((B, t_out, HIDDEN)) + p['cb1']
    for k in range(K1):
        h = h + jnp.einsum('btc,cd->btd', xp[:, k:k + t_out, :], p['cw1'][k])
    h = jnp.maximum(h, 0) * p['bn1_s'] + p['bn1_t']
    hp = jnp.pad(h, ((0, 0), (PAD, PAD), (0, 0)))
    h2 = jnp.zeros((B, t_out, HIDDEN)) + p['cb2']
    for k in range(K2):
        h2 = h2 + jnp.einsum('btc,cd->btd', hp[:, k:k + t_out, :], p['cw2'][k])
    h2 = jnp.maximum(h2, 0) * p['bn2_s'] + p['bn2_t']

    emb = jnp.concatenate([jnp.broadcast_to(p['cls'], (B, 1, HIDDEN)), h2], axis=1)
    S = emb.shape[1]
    half = HEAD_DIM // 2
    cos = cos_half[:S][None, :, None, :]
    sin = sin_half[:S][None, :, None, :]

    def ln(y, g, b):
        mu = jnp.mean(y, -1, keepdims=True)
        var = jnp.mean((y - mu) ** 2, -1, keepdims=True)
        return (y - mu) / jnp.sqrt(var + LN_EPS) * g + b

    def rope(t):  # (B, S, H, hd), torchtune-style interleaved pairs
        ts = t.reshape(B, S, NUM_HEADS, half, 2)
        out = jnp.stack([ts[..., 0] * cos - ts[..., 1] * sin,
                         ts[..., 1] * cos + ts[..., 0] * sin], axis=-1)
        return out.reshape(B, S, NUM_HEADS, HEAD_DIM)

    xx = emb
    for l in range(NUM_LAYERS):
        qkv = xx @ p['wqkv'][l] + p['bqkv'][l]
        qkv = qkv.reshape(B, S, 3, NUM_HEADS, HEAD_DIM)
        q, k, v = qkv[:, :, 0], qkv[:, :, 1], qkv[:, :, 2]
        q, k = rope(q), rope(k)
        q, k, v = (t.transpose(0, 2, 1, 3) for t in (q, k, v))
        att = jnp.einsum('bhsd,bhtd->bhst', q, k) / (HEAD_DIM ** 0.5)
        att = jax.nn.softmax(att, axis=-1)
        ctx = jnp.einsum('bhst,bhtd->bhsd', att, v).transpose(0, 2, 1, 3).reshape(B, S, HIDDEN)
        xx = ln(xx + ctx @ p['wout'][l] + p['bout'][l], p['g1'][l], p['be1'][l])
        ff = jnp.maximum(xx @ p['wff1'][l] + p['bff1'][l], 0) @ p['wff2'][l] + p['bff2'][l]
        xx = ln(xx + ff, p['g2'][l], p['be2'][l])
    return xx[:, 0, :] @ p['wfc'] + p['bfc'][0]


# ----------------------------- main -----------------------------
if __name__ == "__main__":
    B, T = 2, 16                                   # input_seq: (batch, seq_len, input_size)
    S = (T + 2 * PAD - K1 + 1) + 1                 # tokens after conv tokenizer + CLS

    key = jax.random.PRNGKey(0)
    kx, kp = jax.random.split(key)
    x = jax.random.normal(kx, (B, T, INPUT_SIZE), jnp.float32)
    params = init_params(kp)
    rope = build_rope(S)

    fwd = jax.jit(har_transformer_forward)
    logits = fwd(x, params, rope)
    logits = jax.block_until_ready(logits)

    ref = reference_forward(x, params, rope['cos_half'], rope['sin_half'])
    ref = jax.block_until_ready(ref)

    assert logits.shape == (B, NUM_CLASSES)
    assert np.allclose(np.asarray(logits), np.asarray(ref), atol=2e-4, rtol=2e-4), (
        "mismatch:\n%s\nvs\n%s" % (np.asarray(logits), np.asarray(ref)))
    print("KERNEL_OK")
</pallas_src>

<mosaic_0001>
module attributes {stable_mosaic.version = 11 : i64} {
  func.func @har_fused_kernel(%arg0: i32, %arg1: memref<1x16x6xf32, #tpu.memory_space<vmem>>, %arg2: memref<5x6x32xf32, #tpu.memory_space<vmem>>, %arg3: memref<1x32xf32, #tpu.memory_space<vmem>>, %arg4: memref<1x32xf32, #tpu.memory_space<vmem>>, %arg5: memref<1x32xf32, #tpu.memory_space<vmem>>, %arg6: memref<3x32x32xf32, #tpu.memory_space<vmem>>, %arg7: memref<1x32xf32, #tpu.memory_space<vmem>>, %arg8: memref<1x32xf32, #tpu.memory_space<vmem>>, %arg9: memref<1x32xf32, #tpu.memory_space<vmem>>, %arg10: memref<1x32xf32, #tpu.memory_space<vmem>>, %arg11: memref<15x64xf32, #tpu.memory_space<vmem>>, %arg12: memref<15x64xf32, #tpu.memory_space<vmem>>, %arg13: memref<64x64xf32, #tpu.memory_space<vmem>>, %arg14: memref<4x32x96xf32, #tpu.memory_space<vmem>>, %arg15: memref<4x1x96xf32, #tpu.memory_space<vmem>>, %arg16: memref<4x32x32xf32, #tpu.memory_space<vmem>>, %arg17: memref<4x1x32xf32, #tpu.memory_space<vmem>>, %arg18: memref<4x1x32xf32, #tpu.memory_space<vmem>>, %arg19: memref<4x1x32xf32, #tpu.memory_space<vmem>>, %arg20: memref<4x32x128xf32, #tpu.memory_space<vmem>>, %arg21: memref<4x1x128xf32, #tpu.memory_space<vmem>>, %arg22: memref<4x128x32xf32, #tpu.memory_space<vmem>>, %arg23: memref<4x1x32xf32, #tpu.memory_space<vmem>>, %arg24: memref<4x1x32xf32, #tpu.memory_space<vmem>>, %arg25: memref<4x1x32xf32, #tpu.memory_space<vmem>>, %arg26: memref<32x128xf32, #tpu.memory_space<vmem>>, %arg27: memref<1x128xf32, #tpu.memory_space<vmem>>, %arg28: memref<1x1x128xf32, #tpu.memory_space<vmem>>, %arg29: memref<18x6xf32, #tpu.memory_space<vmem>>, %arg30: memref<16x32xf32, #tpu.memory_space<vmem>>, %arg31: memref<15x32xf32, #tpu.memory_space<vmem>>) attributes {dimension_semantics = [#tpu.dimension_semantics<parallel>], iteration_bounds = array<i64: 2>, scalar_prefetch = 0 : i64, scratch_operands = 3 : i64, tpu.core_type = #tpu.core_type<tc>, window_params = [{transform_indices = @transform_0, window_bounds = array<i64: 1, 16, 6>}, {pipeline_mode = #tpu.pipeline_mode<synchronous>, transform_indices = @transform_1, window_bounds = array<i64: 5, 6, 32>}, {pipeline_mode = #tpu.pipeline_mode<synchronous>, transform_indices = @transform_2, window_bounds = array<i64: 1, 32>}, {pipeline_mode = #tpu.pipeline_mode<synchronous>, transform_indices = @transform_3, window_bounds = array<i64: 1, 32>}, {pipeline_mode = #tpu.pipeline_mode<synchronous>, transform_indices = @transform_4, window_bounds = array<i64: 1, 32>}, {pipeline_mode = #tpu.pipeline_mode<synchronous>, transform_indices = @transform_5, window_bounds = array<i64: 3, 32, 32>}, {pipeline_mode = #tpu.pipeline_mode<synchronous>, transform_indices = @transform_6, window_bounds = array<i64: 1, 32>}, {pipeline_mode = #tpu.pipeline_mode<synchronous>, transform_indices = @transform_7, window_bounds = array<i64: 1, 32>}, {pipeline_mode = #tpu.pipeline_mode<synchronous>, transform_indices = @transform_8, window_bounds = array<i64: 1, 32>}, {pipeline_mode = #tpu.pipeline_mode<synchronous>, transform_indices = @transform_9, window_bounds = array<i64: 1, 32>}, {pipeline_mode = #tpu.pipeline_mode<synchronous>, transform_indices = @transform_10, window_bounds = array<i64: 15, 64>}, {pipeline_mode = #tpu.pipeline_mode<synchronous>, transform_indices = @transform_11, window_bounds = array<i64: 15, 64>}, {pipeline_mode = #tpu.pipeline_mode<synchronous>, transform_indices = @transform_12, window_bounds = array<i64: 64, 64>}, {pipeline_mode = #tpu.pipeline_mode<synchronous>, transform_indices = @transform_13, window_bounds = array<i64: 4, 32, 96>}, {pipeline_mode = #tpu.pipeline_mode<synchronous>, transform_indices = @transform_14, window_bounds = array<i64: 4, 1, 96>}, {pipeline_mode = #tpu.pipeline_mode<synchronous>, transform_indices = @transform_15, window_bounds = array<i64: 4, 32, 32>}, {pipeline_mode = #tpu.pipeline_mode<synchronous>, transform_indices = @transform_16, window_bounds = array<i64: 4, 1, 32>}, {pipeline_mode = #tpu.pipeline_mode<synchronous>, transform_indices = @transform_17, window_bounds = array<i64: 4, 1, 32>}, {pipeline_mode = #tpu.pipeline_mode<synchronous>, transform_indices = @transform_18, window_bounds = array<i64: 4, 1, 32>}, {pipeline_mode = #tpu.pipeline_mode<synchronous>, transform_indices = @transform_19, window_bounds = array<i64: 4, 32, 128>}, {pipeline_mode = #tpu.pipeline_mode<synchronous>, transform_indices = @transform_20, window_bounds = array<i64: 4, 1, 128>}, {pipeline_mode = #tpu.pipeline_mode<synchronous>, transform_indices = @transform_21, window_bounds = array<i64: 4, 128, 32>}, {pipeline_mode = #tpu.pipeline_mode<synchronous>, transform_indices = @transform_22, window_bounds = array<i64: 4, 1, 32>}, {pipeline_mode = #tpu.pipeline_mode<synchronous>, transform_indices = @transform_23, window_bounds = array<i64: 4, 1, 32>}, {pipeline_mode = #tpu.pipeline_mode<synchronous>, transform_indices = @transform_24, window_bounds = array<i64: 4, 1, 32>}, {pipeline_mode = #tpu.pipeline_mode<synchronous>, transform_indices = @transform_25, window_bounds = array<i64: 32, 128>}, {pipeline_mode = #tpu.pipeline_mode<synchronous>, transform_indices = @transform_26, window_bounds = array<i64: 1, 128>}, {transform_indices = @transform_27, window_bounds = array<i64: 1, 1, 128>}]} {
    %cst = arith.constant 0.000000e+00 : f32
    %0 = vector.broadcast %cst : f32 to vector<1x6xf32>
    %c0 = arith.constant 0 : index
    %c0_0 = arith.constant 0 : index
    %1 = vector.load %arg29[%c0, %c0_0] : memref<18x6xf32, #tpu.memory_space<vmem>>, vector<1x6xf32>
    tpu.vector_store %arg29[%c0, %c0_0], %0 {strides = array<i32>} : memref<18x6xf32, #tpu.memory_space<vmem>>, vector<1x6xf32>,
    %cst_1 = arith.constant 0.000000e+00 : f32
    %2 = vector.broadcast %cst_1 : f32 to vector<1x6xf32>
    %c17 = arith.constant 17 : index
    %c0_2 = arith.constant 0 : index
    %3 = vector.load %arg29[%c17, %c0_2] : memref<18x6xf32, #tpu.memory_space<vmem>>, vector<1x6xf32>
    tpu.vector_store %arg29[%c17, %c0_2], %2 {strides = array<i32>} : memref<18x6xf32, #tpu.memory_space<vmem>>, vector<1x6xf32>,
    %c0_3 = arith.constant 0 : index
    %c0_4 = arith.constant 0 : index
    %c0_5 = arith.constant 0 : index
    %4 = vector.load %arg1[%c0_3, %c0_4, %c0_5] : memref<1x16x6xf32, #tpu.memory_space<vmem>>, vector<1x16x6xf32>
    %5 = vector.shape_cast %4 : vector<1x16x6xf32> to vector<16x6xf32>
    %c1 = arith.constant 1 : index
    %c0_6 = arith.constant 0 : index
    %6 = vector.load %arg29[%c1, %c0_6] : memref<18x6xf32, #tpu.memory_space<vmem>>, vector<16x6xf32>
    tpu.vector_store %arg29[%c1, %c0_6], %5 {strides = array<i32>} : memref<18x6xf32, #tpu.memory_space<vmem>>, vector<16x6xf32>,
    %cst_7 = arith.constant 0.000000e+00 : f32
    %7 = vector.broadcast %cst_7 : f32 to vector<14x32xf32>
    %c0_8 = arith.constant 0 : index
    %c0_9 = arith.constant 0 : index
    %8 = vector.load %arg3[%c0_8, %c0_9] : memref<1x32xf32, #tpu.memory_space<vmem>>, vector<1x32xf32>
    %9 = vector.broadcast %8 : vector<1x32xf32> to vector<14x32xf32>
    %10 = arith.addf %7, %9 : vector<14x32xf32>
    %c0_10 = arith.constant 0 : index
    %c0_11 = arith.constant 0 : index
    %11 = vector.load %arg29[%c0_10, %c0_11] : memref<18x6xf32, #tpu.memory_space<vmem>>, vector<14x6xf32>
    %c0_12 = arith.constant 0 : index
    %c0_13 = arith.constant 0 : index
    %c0_14 = arith.constant 0 : index
    %12 = vector.load %arg2[%c0_12, %c0_13, %c0_14] : memref<5x6x32xf32, #tpu.memory_space<vmem>>, vector<1x6x32xf32>
    %13 = vector.shape_cast %12 : vector<1x6x32xf32> to vector<6x32xf32>
    %cst_15 = arith.constant dense<0.000000e+00> : vector<14x32xf32>
    %14 = tpu.matmul %11, %13, %cst_15 {dimension_numbers = #tpu.dot_dimension_numbers<[1], [0], [0], [1], [0, 0, 1, 1], [], []>} : vector<14x6xf32>, vector<6x32xf32>, vector<14x32xf32> -> vector<14x32xf32>
    %15 = arith.addf %10, %14 : vector<14x32xf32>
    %c1_16 = arith.constant 1 : index
    %c0_17 = arith.constant 0 : index
    %16 = vector.load %arg29[%c1_16, %c0_17] : memref<18x6xf32, #tpu.memory_space<vmem>>, vector<14x6xf32>
    %c1_18 = arith.constant 1 : index
    %c0_19 = arith.constant 0 : index
    %c0_20 = arith.constant 0 : index
    %17 = vector.load %arg2[%c1_18, %c0_19, %c0_20] : memref<5x6x32xf32, #tpu.memory_space<vmem>>, vector<1x6x32xf32>
    %18 = vector.shape_cast %17 : vector<1x6x32xf32> to vector<6x32xf32>
    %cst_21 = arith.constant dense<0.000000e+00> : vector<14x32xf32>
    %19 = tpu.matmul %16, %18, %cst_21 {dimension_numbers = #tpu.dot_dimension_numbers<[1], [0], [0], [1], [0, 0, 1, 1], [], []>} : vector<14x6xf32>, vector<6x32xf32>, vector<14x32xf32> -> vector<14x32xf32>
    %20 = arith.addf %15, %19 : vector<14x32xf32>
    %c2 = arith.constant 2 : index
    %c0_22 = arith.constant 0 : index
    %21 = vector.load %arg29[%c2, %c0_22] : memref<18x6xf32, #tpu.memory_space<vmem>>, vector<14x6xf32>
    %c2_23 = arith.constant 2 : index
    %c0_24 = arith.constant 0 : index
    %c0_25 = arith.constant 0 : index
    %22 = vector.load %arg2[%c2_23, %c0_24, %c0_25] : memref<5x6x32xf32, #tpu.memory_space<vmem>>, vector<1x6x32xf32>
    %23 = vector.shape_cast %22 : vector<1x6x32xf32> to vector<6x32xf32>
    %cst_26 = arith.constant dense<0.000000e+00> : vector<14x32xf32>
    %24 = tpu.matmul %21, %23, %cst_26 {dimension_numbers = #tpu.dot_dimension_numbers<[1], [0], [0], [1], [0, 0, 1, 1], [], []>} : vector<14x6xf32>, vector<6x32xf32>, vector<14x32xf32> -> vector<14x32xf32>
    %25 = arith.addf %20, %24 : vector<14x32xf32>
    %c3 = arith.constant 3 : index
    %c0_27 = arith.constant 0 : index
    %26 = vector.load %arg29[%c3, %c0_27] : memref<18x6xf32, #tpu.memory_space<vmem>>, vector<14x6xf32>
    %c3_28 = arith.constant 3 : index
    %c0_29 = arith.constant 0 : index
    %c0_30 = arith.constant 0 : index
    %27 = vector.load %arg2[%c3_28, %c0_29, %c0_30] : memref<5x6x32xf32, #tpu.memory_space<vmem>>, vector<1x6x32xf32>
    %28 = vector.shape_cast %27 : vector<1x6x32xf32> to vector<6x32xf32>
    %cst_31 = arith.constant dense<0.000000e+00> : vector<14x32xf32>
    %29 = tpu.matmul %26, %28, %cst_31 {dimension_numbers = #tpu.dot_dimension_numbers<[1], [0], [0], [1], [0, 0, 1, 1], [], []>} : vector<14x6xf32>, vector<6x32xf32>, vector<14x32xf32> -> vector<14x32xf32>
    %30 = arith.addf %25, %29 : vector<14x32xf32>
    %c4 = arith.constant 4 : index
    %c0_32 = arith.constant 0 : index
    %31 = vector.load %arg29[%c4, %c0_32] : memref<18x6xf32, #tpu.memory_space<vmem>>, vector<14x6xf32>
    %c4_33 = arith.constant 4 : index
    %c0_34 = arith.constant 0 : index
    %c0_35 = arith.constant 0 : index
    %32 = vector.load %arg2[%c4_33, %c0_34, %c0_35] : memref<5x6x32xf32, #tpu.memory_space<vmem>>, vector<1x6x32xf32>
    %33 = vector.shape_cast %32 : vector<1x6x32xf32> to vector<6x32xf32>
    %cst_36 = arith.constant dense<0.000000e+00> : vector<14x32xf32>
    %34 = tpu.matmul %31, %33, %cst_36 {dimension_numbers = #tpu.dot_dimension_numbers<[1], [0], [0], [1], [0, 0, 1, 1], [], []>} : vector<14x6xf32>, vector<6x32xf32>, vector<14x32xf32> -> vector<14x32xf32>
    %35 = arith.addf %30, %34 : vector<14x32xf32>
    %cst_37 = arith.constant 0.000000e+00 : f32
    %36 = vector.broadcast %cst_37 : f32 to vector<14x32xf32>
    %37 = arith.maximumf %35, %36 : vector<14x32xf32>
    %c0_38 = arith.constant 0 : index
    %c0_39 = arith.constant 0 : index
    %38 = vector.load %arg4[%c0_38, %c0_39] : memref<1x32xf32, #tpu.memory_space<vmem>>, vector<1x32xf32>
    %39 = vector.broadcast %38 : vector<1x32xf32> to vector<14x32xf32>
    %40 = arith.mulf %37, %39 : vector<14x32xf32>
    %c0_40 = arith.constant 0 : index
    %c0_41 = arith.constant 0 : index
    %41 = vector.load %arg5[%c0_40, %c0_41] : memref<1x32xf32, #tpu.memory_space<vmem>>, vector<1x32xf32>
    %42 = vector.broadcast %41 : vector<1x32xf32> to vector<14x32xf32>
    %43 = arith.addf %40, %42 : vector<14x32xf32>
    %cst_42 = arith.constant 0.000000e+00 : f32
    %44 = vector.broadcast %cst_42 : f32 to vector<1x32xf32>
    %c0_43 = arith.constant 0 : index
    %c0_44 = arith.constant 0 : index
    %45 = vector.load %arg30[%c0_43, %c0_44] : memref<16x32xf32, #tpu.memory_space<vmem>>, vector<1x32xf32>
    tpu.vector_store %arg30[%c0_43, %c0_44], %44 {strides = array<i32>} : memref<16x32xf32, #tpu.memory_space<vmem>>, vector<1x32xf32>,
    %cst_45 = arith.constant 0.000000e+00 : f32
    %46 = vector.broadcast %cst_45 : f32 to vector<1x32xf32>
    %c15 = arith.constant 15 : index
    %c0_46 = arith.constant 0 : index
    %47 = vector.load %arg30[%c15, %c0_46] : memref<16x32xf32, #tpu.memory_space<vmem>>, vector<1x32xf32>
    tpu.vector_store %arg30[%c15, %c0_46], %46 {strides = array<i32>} : memref<16x32xf32, #tpu.memory_space<vmem>>, vector<1x32xf32>,
    %c1_47 = arith.constant 1 : index
    %c0_48 = arith.constant 0 : index
    %48 = vector.load %arg30[%c1_47, %c0_48] : memref<16x32xf32, #tpu.memory_space<vmem>>, vector<14x32xf32>
    tpu.vector_store %arg30[%c1_47, %c0_48], %43 {strides = array<i32>} : memref<16x32xf32, #tpu.memory_space<vmem>>, vector<14x32xf32>,
    %cst_49 = arith.constant 0.000000e+00 : f32
    %49 = vector.broadcast %cst_49 : f32 to vector<14x32xf32>
    %c0_50 = arith.constant 0 : index
    %c0_51 = arith.constant 0 : index
    %50 = vector.load %arg7[%c0_50, %c0_51] : memref<1x32xf32, #tpu.memory_space<vmem>>, vector<1x32xf32>
    %51 = vector.broadcast %50 : vector<1x32xf32> to vector<14x32xf32>
    %52 = arith.addf %49, %51 : vector<14x32xf32>
    %c0_52 = arith.constant 0 : index
    %c0_53 = arith.constant 0 : index
    %53 = vector.load %arg30[%c0_52, %c0_53] : memref<16x32xf32, #tpu.memory_space<vmem>>, vector<14x32xf32>
    %c0_54 = arith.constant 0 : index
    %c0_55 = arith.constant 0 : index
    %c0_56 = arith.constant 0 : index
    %54 = vector.load %arg6[%c0_54, %c0_55, %c0_56] : memref<3x32x32xf32, #tpu.memory_space<vmem>>, vector<1x32x32xf32>
    %55 = vector.shape_cast %54 : vector<1x32x32xf32> to vector<32x32xf32>
    %cst_57 = arith.constant dense<0.000000e+00> : vector<14x32xf32>
    %56 = tpu.matmul %53, %55, %cst_57 {dimension_numbers = #tpu.dot_dimension_numbers<[1], [0], [0], [1], [0, 0, 1, 1], [], []>} : vector<14x32xf32>, vector<32x32xf32>, vector<14x32xf32> -> vector<14x32xf32>
    %57 = arith.addf %52, %56 : vector<14x32xf32>
    %c1_58 = arith.constant 1 : index
    %c0_59 = arith.constant 0 : index
    %58 = vector.load %arg30[%c1_58, %c0_59] : memref<16x32xf32, #tpu.memory_space<vmem>>, vector<14x32xf32>
    %c1_60 = arith.constant 1 : index
    %c0_61 = arith.constant 0 : index
    %c0_62 = arith.constant 0 : index
    %59 = vector.load %arg6[%c1_60, %c0_61, %c0_62] : memref<3x32x32xf32, #tpu.memory_space<vmem>>, vector<1x32x32xf32>
    %60 = vector.shape_cast %59 : vector<1x32x32xf32> to vector<32x32xf32>
    %cst_63 = arith.constant dense<0.000000e+00> : vector<14x32xf32>
    %61 = tpu.matmul %58, %60, %cst_63 {dimension_numbers = #tpu.dot_dimension_numbers<[1], [0], [0], [1], [0, 0, 1, 1], [], []>} : vector<14x32xf32>, vector<32x32xf32>, vector<14x32xf32> -> vector<14x32xf32>
    %62 = arith.addf %57, %61 : vector<14x32xf32>
    %c2_64 = arith.constant 2 : index
    %c0_65 = arith.constant 0 : index
    %63 = vector.load %arg30[%c2_64, %c0_65] : memref<16x32xf32, #tpu.memory_space<vmem>>, vector<14x32xf32>
    %c2_66 = arith.constant 2 : index
    %c0_67 = arith.constant 0 : index
    %c0_68 = arith.constant 0 : index
    %64 = vector.load %arg6[%c2_66, %c0_67, %c0_68] : memref<3x32x32xf32, #tpu.memory_space<vmem>>, vector<1x32x32xf32>
    %65 = vector.shape_cast %64 : vector<1x32x32xf32> to vector<32x32xf32>
    %cst_69 = arith.constant dense<0.000000e+00> : vector<14x32xf32>
    %66 = tpu.matmul %63, %65, %cst_69 {dimension_numbers = #tpu.dot_dimension_numbers<[1], [0], [0], [1], [0, 0, 1, 1], [], []>} : vector<14x32xf32>, vector<32x32xf32>, vector<14x32xf32> -> vector<14x32xf32>
    %67 = arith.addf %62, %66 : vector<14x32xf32>
    %cst_70 = arith.constant 0.000000e+00 : f32
    %68 = vector.broadcast %cst_70 : f32 to vector<14x32xf32>
    %69 = arith.maximumf %67, %68 : vector<14x32xf32>
    %c0_71 = arith.constant 0 : index
    %c0_72 = arith.constant 0 : index
    %70 = vector.load %arg8[%c0_71, %c0_72] : memref<1x32xf32, #tpu.memory_space<vmem>>, vector<1x32xf32>
    %71 = vector.broadcast %70 : vector<1x32xf32> to vector<14x32xf32>
    %72 = arith.mulf %69, %71 : vector<14x32xf32>
    %c0_73 = arith.constant 0 : index
    %c0_74 = arith.constant 0 : index
    %73 = vector.load %arg9[%c0_73, %c0_74] : memref<1x32xf32, #tpu.memory_space<vmem>>, vector<1x32xf32>
    %74 = vector.broadcast %73 : vector<1x32xf32> to vector<14x32xf32>
    %75 = arith.addf %72, %74 : vector<14x32xf32>
    %c0_75 = arith.constant 0 : index
    %c0_76 = arith.constant 0 : index
    %76 = vector.load %arg10[%c0_75, %c0_76] : memref<1x32xf32, #tpu.memory_space<vmem>>, vector<1x32xf32>
    %c0_77 = arith.constant 0 : index
    %c0_78 = arith.constant 0 : index
    %77 = vector.load %arg31[%c0_77, %c0_78] : memref<15x32xf32, #tpu.memory_space<vmem>>, vector<1x32xf32>
    tpu.vector_store %arg31[%c0_77, %c0_78], %76 {strides = array<i32>} : memref<15x32xf32, #tpu.memory_space<vmem>>, vector<1x32xf32>,
    %c1_79 = arith.constant 1 : index
    %c0_80 = arith.constant 0 : index
    %78 = vector.load %arg31[%c1_79, %c0_80] : memref<15x32xf32, #tpu.memory_space<vmem>>, vector<14x32xf32>
    tpu.vector_store %arg31[%c1_79, %c0_80], %75 {strides = array<i32>} : memref<15x32xf32, #tpu.memory_space<vmem>>, vector<14x32xf32>,
    %c0_81 = arith.constant 0 : index
    %c0_82 = arith.constant 0 : index
    %79 = vector.load %arg31[%c0_81, %c0_82] : memref<15x32xf32, #tpu.memory_space<vmem>>, vector<15x32xf32>
    %c0_83 = arith.constant 0 : index
    %c0_84 = arith.constant 0 : index
    %80 = vector.load %arg11[%c0_83, %c0_84] : memref<15x64xf32, #tpu.memory_space<vmem>>, vector<15x64xf32>
    %c0_85 = arith.constant 0 : index
    %c0_86 = arith.constant 0 : index
    %81 = vector.load %arg12[%c0_85, %c0_86] : memref<15x64xf32, #tpu.memory_space<vmem>>, vector<15x64xf32>
    %c0_87 = arith.constant 0 : index
    %c0_88 = arith.constant 0 : index
    %82 = vector.load %arg13[%c0_87, %c0_88] : memref<64x64xf32, #tpu.memory_space<vmem>>, vector<64x64xf32>
    %c0_89 = arith.constant 0 : index
    %c0_90 = arith.constant 0 : index
    %c0_91 = arith.constant 0 : index
    %83 = vector.load %arg16[%c0_89, %c0_90, %c0_91] : memref<4x32x32xf32, #tpu.memory_space<vmem>>, vector<1x32x32xf32>
    %84 = vector.shape_cast %83 : vector<1x32x32xf32> to vector<32x32xf32>
    %c0_92 = arith.constant 0 : index
    %c0_93 = arith.constant 0 : index
    %c0_94 = arith.constant 0 : index
    %85 = vector.load %arg14[%c0_92, %c0_93, %c0_94] : memref<4x32x96xf32, #tpu.memory_space<vmem>>, vector<1x32x96xf32>
    %86 = vector.shape_cast %85 : vector<1x32x96xf32> to vector<32x96xf32>
    %cst_95 = arith.constant dense<0.000000e+00> : vector<15x96xf32>
    %87 = tpu.matmul %79, %86, %cst_95 {dimension_numbers = #tpu.dot_dimension_numbers<[1], [0], [0], [1], [0, 0, 1, 1], [], []>} : vector<15x32xf32>, vector<32x96xf32>, vector<15x96xf32> -> vector<15x96xf32>
    %c0_96 = arith.constant 0 : index
    %c0_97 = arith.constant 0 : index
    %c0_98 = arith.constant 0 : index
    %88 = vector.load %arg15[%c0_96, %c0_97, %c0_98] : memref<4x1x96xf32, #tpu.memory_space<vmem>>, vector<1x1x96xf32>
    %89 = vector.shape_cast %88 : vector<1x1x96xf32> to vector<1x96xf32>
    %90 = vector.broadcast %89 : vector<1x96xf32> to vector<15x96xf32>
    %91 = arith.addf %87, %90 : vector<15x96xf32>
    %92 = vector.extract_strided_slice %91 {offsets = [0, 0], sizes = [15, 64], strides = [1, 1]} : vector<15x96xf32> to vector<15x64xf32>
    %93 = arith.mulf %92, %80 : vector<15x64xf32>
    %cst_99 = arith.constant dense<0.000000e+00> : vector<15x64xf32>
    %94 = tpu.matmul %92, %82, %cst_99 {dimension_numbers = #tpu.dot_dimension_numbers<[1], [0], [0], [1], [0, 0, 1, 1], [], []>} : vector<15x64xf32>, vector<64x64xf32>, vector<15x64xf32> -> vector<15x64xf32>
    %95 = arith.mulf %94, %81 : vector<15x64xf32>
    %96 = arith.addf %93, %95 : vector<15x64xf32>
    %97 = vector.extract_strided_slice %96 {offsets = [0, 0], sizes = [15, 32], strides = [1, 1]} : vector<15x64xf32> to vector<15x32xf32>
    %98 = vector.extract_strided_slice %96 {offsets = [0, 32], sizes = [15, 32], strides = [1, 1]} : vector<15x64xf32> to vector<15x32xf32>
    %99 = vector.extract_strided_slice %91 {offsets = [0, 64], sizes = [15, 32], strides = [1, 1]} : vector<15x96xf32> to vector<15x32xf32>
    %cst_100 = arith.constant 0.000000e+00 : f32
    %100 = vector.broadcast %cst_100 : f32 to vector<15x32xf32>
    %c0_101 = arith.constant 0 : index
    %c0_102 = arith.constant 0 : index
    %c0_103 = arith.constant 0 : index
    %101 = vector.load %arg17[%c0_101, %c0_102, %c0_103] : memref<4x1x32xf32, #tpu.memory_space<vmem>>, vector<1x1x32xf32>
    %102 = vector.shape_cast %101 : vector<1x1x32xf32> to vector<1x32xf32>
    %103 = vector.broadcast %102 : vector<1x32xf32> to vector<15x32xf32>
    %104 = arith.addf %100, %103 : vector<15x32xf32>
    %105 = vector.extract_strided_slice %97 {offsets = [0, 0], sizes = [15, 8], strides = [1, 1]} : vector<15x32xf32> to vector<15x8xf32>
    %106 = vector.extract_strided_slice %98 {offsets = [0, 0], sizes = [15, 8], strides = [1, 1]} : vector<15x32xf32> to vector<15x8xf32>
    %107 = vector.extract_strided_slice %99 {offsets = [0, 0], sizes = [15, 8], strides = [1, 1]} : vector<15x32xf32> to vector<15x8xf32>
    %cst_104 = arith.constant dense<0.000000e+00> : vector<15x15xf32>
    %108 = tpu.matmul %105, %106, %cst_104 {dimension_numbers = #tpu.dot_dimension_numbers<[1], [1], [0], [0], [0, 0, 1, 0], [], []>} : vector<15x8xf32>, vector<15x8xf32>, vector<15x15xf32> -> vector<15x15xf32>
    %cst_105 = arith.constant dense<0xFF800000> : vector<15xf32>
    %109 = vector.multi_reduction <maximumf>, %108, %cst_105 [1] : vector<15x15xf32> to vector<15xf32>
    %110 = vector.shape_cast %109 : vector<15xf32> to vector<15x1xf32>
    %111 = vector.broadcast %110 : vector<15x1xf32> to vector<15x15xf32>
    %112 = arith.subf %108, %111 : vector<15x15xf32>
    %113 = math.exp %112 : vector<15x15xf32>
    %cst_106 = arith.constant dense<0.000000e+00> : vector<15xf32>
    %114 = vector.multi_reduction <add>, %113, %cst_106 [1] : vector<15x15xf32> to vector<15xf32>
    %115 = vector.shape_cast %114 : vector<15xf32> to vector<15x1xf32>
    %cst_107 = arith.constant 1.000000e+00 : f32
    %116 = vector.broadcast %cst_107 : f32 to vector<15x1xf32>
    %117 = arith.divf %116, %115 : vector<15x1xf32>
    %118 = vector.broadcast %117 : vector<15x1xf32> to vector<15x15xf32>
    %119 = arith.mulf %113, %118 : vector<15x15xf32>
    %cst_108 = arith.constant dense<0.000000e+00> : vector<15x8xf32>
    %120 = tpu.matmul %119, %107, %cst_108 {dimension_numbers = #tpu.dot_dimension_numbers<[1], [0], [0], [1], [0, 0, 1, 1], [], []>} : vector<15x15xf32>, vector<15x8xf32>, vector<15x8xf32> -> vector<15x8xf32>
    %121 = vector.extract_strided_slice %84 {offsets = [0, 0], sizes = [8, 32], strides = [1, 1]} : vector<32x32xf32> to vector<8x32xf32>
    %cst_109 = arith.constant dense<0.000000e+00> : vector<15x32xf32>
    %122 = tpu.matmul %120, %121, %cst_109 {dimension_numbers = #tpu.dot_dimension_numbers<[1], [0], [0], [1], [0, 0, 1, 1], [], []>} : vector<15x8xf32>, vector<8x32xf32>, vector<15x32xf32> -> vector<15x32xf32>
    %123 = arith.addf %104, %122 : vector<15x32xf32>
    %124 = vector.extract_strided_slice %97 {offsets = [0, 8], sizes = [15, 8], strides = [1, 1]} : vector<15x32xf32> to vector<15x8xf32>
    %125 = vector.extract_strided_slice %98 {offsets = [0, 8], sizes = [15, 8], strides = [1, 1]} : vector<15x32xf32> to vector<15x8xf32>
    %126 = vector.extract_strided_slice %99 {offsets = [0, 8], sizes = [15, 8], strides = [1, 1]} : vector<15x32xf32> to vector<15x8xf32>
    %cst_110 = arith.constant dense<0.000000e+00> : vector<15x15xf32>
    %127 = tpu.matmul %124, %125, %cst_110 {dimension_numbers = #tpu.dot_dimension_numbers<[1], [1], [0], [0], [0, 0, 1, 0], [], []>} : vector<15x8xf32>, vector<15x8xf32>, vector<15x15xf32> -> vector<15x15xf32>
    %cst_111 = arith.constant dense<0xFF800000> : vector<15xf32>
    %128 = vector.multi_reduction <maximumf>, %127, %cst_111 [1] : vector<15x15xf32> to vector<15xf32>
    %129 = vector.shape_cast %128 : vector<15xf32> to vector<15x1xf32>
    %130 = vector.broadcast %129 : vector<15x1xf32> to vector<15x15xf32>
    %131 = arith.subf %127, %130 : vector<15x15xf32>
    %132 = math.exp %131 : vector<15x15xf32>
    %cst_112 = arith.constant dense<0.000000e+00> : vector<15xf32>
    %133 = vector.multi_reduction <add>, %132, %cst_112 [1] : vector<15x15xf32> to vector<15xf32>
    %134 = vector.shape_cast %133 : vector<15xf32> to vector<15x1xf32>
    %cst_113 = arith.constant 1.000000e+00 : f32
    %135 = vector.broadcast %cst_113 : f32 to vector<15x1xf32>
    %136 = arith.divf %135, %134 : vector<15x1xf32>
    %137 = vector.broadcast %136 : vector<15x1xf32> to vector<15x15xf32>
    %138 = arith.mulf %132, %137 : vector<15x15xf32>
    %cst_114 = arith.constant dense<0.000000e+00> : vector<15x8xf32>
    %139 = tpu.matmul %138, %126, %cst_114 {dimension_numbers = #tpu.dot_dimension_numbers<[1], [0], [0], [1], [0, 0, 1, 1], [], []>} : vector<15x15xf32>, vector<15x8xf32>, vector<15x8xf32> -> vector<15x8xf32>
    %140 = vector.extract_strided_slice %84 {offsets = [8, 0], sizes = [8, 32], strides = [1, 1]} : vector<32x32xf32> to vector<8x32xf32>
    %cst_115 = arith.constant dense<0.000000e+00> : vector<15x32xf32>
    %141 = tpu.matmul %139, %140, %cst_115 {dimension_numbers = #tpu.dot_dimension_numbers<[1], [0], [0], [1], [0, 0, 1, 1], [], []>} : vector<15x8xf32>, vector<8x32xf32>, vector<15x32xf32> -> vector<15x32xf32>
    %142 = arith.addf %123, %141 : vector<15x32xf32>
    %143 = vector.extract_strided_slice %97 {offsets = [0, 16], sizes = [15, 8], strides = [1, 1]} : vector<15x32xf32> to vector<15x8xf32>
    %144 = vector.extract_strided_slice %98 {offsets = [0, 16], sizes = [15, 8], strides = [1, 1]} : vector<15x32xf32> to vector<15x8xf32>
    %145 = vector.extract_strided_slice %99 {offsets = [0, 16], sizes = [15, 8], strides = [1, 1]} : vector<15x32xf32> to vector<15x8xf32>
    %cst_116 = arith.constant dense<0.000000e+00> : vector<15x15xf32>
    %146 = tpu.matmul %143, %144, %cst_116 {dimension_numbers = #tpu.dot_dimension_numbers<[1], [1], [0], [0], [0, 0, 1, 0], [], []>} : vector<15x8xf32>, vector<15x8xf32>, vector<15x15xf32> -> vector<15x15xf32>
    %cst_117 = arith.constant dense<0xFF800000> : vector<15xf32>
    %147 = vector.multi_reduction <maximumf>, %146, %cst_117 [1] : vector<15x15xf32> to vector<15xf32>
    %148 = vector.shape_cast %147 : vector<15xf32> to vector<15x1xf32>
    %149 = vector.broadcast %148 : vector<15x1xf32> to vector<15x15xf32>
    %150 = arith.subf %146, %149 : vector<15x15xf32>
    %151 = math.exp %150 : vector<15x15xf32>
    %cst_118 = arith.constant dense<0.000000e+00> : vector<15xf32>
    %152 = vector.multi_reduction <add>, %151, %cst_118 [1] : vector<15x15xf32> to vector<15xf32>
    %153 = vector.shape_cast %152 : vector<15xf32> to vector<15x1xf32>
    %cst_119 = arith.constant 1.000000e+00 : f32
    %154 = vector.broadcast %cst_119 : f32 to vector<15x1xf32>
    %155 = arith.divf %154, %153 : vector<15x1xf32>
    %156 = vector.broadcast %155 : vector<15x1xf32> to vector<15x15xf32>
    %157 = arith.mulf %151, %156 : vector<15x15xf32>
    %cst_120 = arith.constant dense<0.000000e+00> : vector<15x8xf32>
    %158 = tpu.matmul %157, %145, %cst_120 {dimension_numbers = #tpu.dot_dimension_numbers<[1], [0], [0], [1], [0, 0, 1, 1], [], []>} : vector<15x15xf32>, vector<15x8xf32>, vector<15x8xf32> -> vector<15x8xf32>
    %159 = vector.extract_strided_slice %84 {offsets = [16, 0], sizes = [8, 32], strides = [1, 1]} : vector<32x32xf32> to vector<8x32xf32>
    %cst_121 = arith.constant dense<0.000000e+00> : vector<15x32xf32>
    %160 = tpu.matmul %158, %159, %cst_121 {dimension_numbers = #tpu.dot_dimension_numbers<[1], [0], [0], [1], [0, 0, 1, 1], [], []>} : vector<15x8xf32>, vector<8x32xf32>, vector<15x32xf32> -> vector<15x32xf32>
    %161 = arith.addf %142, %160 : vector<15x32xf32>
    %162 = vector.extract_strided_slice %97 {offsets = [0, 24], sizes = [15, 8], strides = [1, 1]} : vector<15x32xf32> to vector<15x8xf32>
    %163 = vector.extract_strided_slice %98 {offsets = [0, 24], sizes = [15, 8], strides = [1, 1]} : vector<15x32xf32> to vector<15x8xf32>
    %164 = vector.extract_strided_slice %99 {offsets = [0, 24], sizes = [15, 8], strides = [1, 1]} : vector<15x32xf32> to vector<15x8xf32>
    %cst_122 = arith.constant dense<0.000000e+00> : vector<15x15xf32>
    %165 = tpu.matmul %162, %163, %cst_122 {dimension_numbers = #tpu.dot_dimension_numbers<[1], [1], [0], [0], [0, 0, 1, 0], [], []>} : vector<15x8xf32>, vector<15x8xf32>, vector<15x15xf32> -> vector<15x15xf32>
    %cst_123 = arith.constant dense<0xFF800000> : vector<15xf32>
    %166 = vector.multi_reduction <maximumf>, %165, %cst_123 [1] : vector<15x15xf32> to vector<15xf32>
    %167 = vector.shape_cast %166 : vector<15xf32> to vector<15x1xf32>
    %168 = vector.broadcast %167 : vector<15x1xf32> to vector<15x15xf32>
    %169 = arith.subf %165, %168 : vector<15x15xf32>
    %170 = math.exp %169 : vector<15x15xf32>
    %cst_124 = arith.constant dense<0.000000e+00> : vector<15xf32>
    %171 = vector.multi_reduction <add>, %170, %cst_124 [1] : vector<15x15xf32> to vector<15xf32>
    %172 = vector.shape_cast %171 : vector<15xf32> to vector<15x1xf32>
    %cst_125 = arith.constant 1.000000e+00 : f32
    %173 = vector.broadcast %cst_125 : f32 to vector<15x1xf32>
    %174 = arith.divf %173, %172 : vector<15x1xf32>
    %175 = vector.broadcast %174 : vector<15x1xf32> to vector<15x15xf32>
    %176 = arith.mulf %170, %175 : vector<15x15xf32>
    %cst_126 = arith.constant dense<0.000000e+00> : vector<15x8xf32>
    %177 = tpu.matmul %176, %164, %cst_126 {dimension_numbers = #tpu.dot_dimension_numbers<[1], [0], [0], [1], [0, 0, 1, 1], [], []>} : vector<15x15xf32>, vector<15x8xf32>, vector<15x8xf32> -> vector<15x8xf32>
    %178 = vector.extract_strided_slice %84 {offsets = [24, 0], sizes = [8, 32], strides = [1, 1]} : vector<32x32xf32> to vector<8x32xf32>
    %cst_127 = arith.constant dense<0.000000e+00> : vector<15x32xf32>
    %179 = tpu.matmul %177, %178, %cst_127 {dimension_numbers = #tpu.dot_dimension_numbers<[1], [0], [0], [1], [0, 0, 1, 1], [], []>} : vector<15x8xf32>, vector<8x32xf32>, vector<15x32xf32> -> vector<15x32xf32>
    %180 = arith.addf %161, %179 : vector<15x32xf32>
    %181 = arith.addf %79, %180 : vector<15x32xf32>
    %c0_128 = arith.constant 0 : index
    %c0_129 = arith.constant 0 : index
    %c0_130 = arith.constant 0 : index
    %182 = vector.load %arg18[%c0_128, %c0_129, %c0_130] : memref<4x1x32xf32, #tpu.memory_space<vmem>>, vector<1x1x32xf32>
    %183 = vector.shape_cast %182 : vector<1x1x32xf32> to vector<1x32xf32>
    %c0_131 = arith.constant 0 : index
    %c0_132 = arith.constant 0 : index
    %c0_133 = arith.constant 0 : index
    %184 = vector.load %arg19[%c0_131, %c0_132, %c0_133] : memref<4x1x32xf32, #tpu.memory_space<vmem>>, vector<1x1x32xf32>
    %185 = vector.shape_cast %184 : vector<1x1x32xf32> to vector<1x32xf32>
    %cst_134 = arith.constant dense<0.000000e+00> : vector<15xf32>
    %186 = vector.multi_reduction <add>, %181, %cst_134 [1] : vector<15x32xf32> to vector<15xf32>
    %187 = vector.shape_cast %186 : vector<15xf32> to vector<15x1xf32>
    %cst_135 = arith.constant 3.200000e+01 : f32
    %188 = vector.broadcast %cst_135 : f32 to vector<15x1xf32>
    %189 = arith.divf %187, %188 : vector<15x1xf32>
    %190 = vector.broadcast %189 : vector<15x1xf32> to vector<15x32xf32>
    %191 = arith.subf %181, %190 : vector<15x32xf32>
    %192 = arith.mulf %191, %191 : vector<15x32xf32>
    %cst_136 = arith.constant dense<0.000000e+00> : vector<15xf32>
    %193 = vector.multi_reduction <add>, %192, %cst_136 [1] : vector<15x32xf32> to vector<15xf32>
    %194 = vector.shape_cast %193 : vector<15xf32> to vector<15x1xf32>
    %cst_137 = arith.constant 3.200000e+01 : f32
    %195 = vector.broadcast %cst_137 : f32 to vector<15x1xf32>
    %196 = arith.divf %194, %195 : vector<15x1xf32>
    %197 = vector.broadcast %189 : vector<15x1xf32> to vector<15x32xf32>
    %198 = arith.subf %181, %197 : vector<15x32xf32>
    %cst_138 = arith.constant 9.99999974E-6 : f32
    %199 = vector.broadcast %cst_138 : f32 to vector<15x1xf32>
    %200 = arith.addf %196, %199 : vector<15x1xf32>
    %201 = math.rsqrt %200 : vector<15x1xf32>
    %202 = vector.broadcast %201 : vector<15x1xf32> to vector<15x32xf32>
    %203 = arith.mulf %198, %202 : vector<15x32xf32>
    %204 = vector.broadcast %183 : vector<1x32xf32> to vector<15x32xf32>
    %205 = arith.mulf %203, %204 : vector<15x32xf32>
    %206 = vector.broadcast %185 : vector<1x32xf32> to vector<15x32xf32>
    %207 = arith.addf %205, %206 : vector<15x32xf32>
    %c0_139 = arith.constant 0 : index
    %c0_140 = arith.constant 0 : index
    %c0_141 = arith.constant 0 : index
    %208 = vector.load %arg20[%c0_139, %c0_140, %c0_141] : memref<4x32x128xf32, #tpu.memory_space<vmem>>, vector<1x32x128xf32>
    %209 = vector.shape_cast %208 : vector<1x32x128xf32> to vector<32x128xf32>
    %cst_142 = arith.constant dense<0.000000e+00> : vector<15x128xf32>
    %210 = tpu.matmul %207, %209, %cst_142 {dimension_numbers = #tpu.dot_dimension_numbers<[1], [0], [0], [1], [0, 0, 1, 1], [], []>} : vector<15x32xf32>, vector<32x128xf32>, vector<15x128xf32> -> vector<15x128xf32>
    %c0_143 = arith.constant 0 : index
    %c0_144 = arith.constant 0 : index
    %c0_145 = arith.constant 0 : index
    %211 = vector.load %arg21[%c0_143, %c0_144, %c0_145] : memref<4x1x128xf32, #tpu.memory_space<vmem>>, vector<1x1x128xf32>
    %212 = vector.shape_cast %211 : vector<1x1x128xf32> to vector<1x128xf32>
    %213 = vector.broadcast %212 : vector<1x128xf32> to vector<15x128xf32>
    %214 = arith.addf %210, %213 : vector<15x128xf32>
    %cst_146 = arith.constant 0.000000e+00 : f32
    %215 = vector.broadcast %cst_146 : f32 to vector<15x128xf32>
    %216 = arith.maximumf %214, %215 : vector<15x128xf32>
    %c0_147 = arith.constant 0 : index
    %c0_148 = arith.constant 0 : index
    %c0_149 = arith.constant 0 : index
    %217 = vector.load %arg22[%c0_147, %c0_148, %c0_149] : memref<4x128x32xf32, #tpu.memory_space<vmem>>, vector<1x128x32xf32>
    %218 = vector.shape_cast %217 : vector<1x128x32xf32> to vector<128x32xf32>
    %cst_150 = arith.constant dense<0.000000e+00> : vector<15x32xf32>
    %219 = tpu.matmul %216, %218, %cst_150 {dimension_numbers = #tpu.dot_dimension_numbers<[1], [0], [0], [1], [0, 0, 1, 1], [], []>} : vector<15x128xf32>, vector<128x32xf32>, vector<15x32xf32> -> vector<15x32xf32>
    %c0_151 = arith.constant 0 : index
    %c0_152 = arith.constant 0 : index
    %c0_153 = arith.constant 0 : index
    %220 = vector.load %arg23[%c0_151, %c0_152, %c0_153] : memref<4x1x32xf32, #tpu.memory_space<vmem>>, vector<1x1x32xf32>
    %221 = vector.shape_cast %220 : vector<1x1x32xf32> to vector<1x32xf32>
    %222 = vector.broadcast %221 : vector<1x32xf32> to vector<15x32xf32>
    %223 = arith.addf %219, %222 : vector<15x32xf32>
    %224 = arith.addf %207, %223 : vector<15x32xf32>
    %c0_154 = arith.constant 0 : index
    %c0_155 = arith.constant 0 : index
    %c0_156 = arith.constant 0 : index
    %225 = vector.load %arg24[%c0_154, %c0_155, %c0_156] : memref<4x1x32xf32, #tpu.memory_space<vmem>>, vector<1x1x32xf32>
    %226 = vector.shape_cast %225 : vector<1x1x32xf32> to vector<1x32xf32>
    %c0_157 = arith.constant 0 : index
    %c0_158 = arith.constant 0 : index
    %c0_159 = arith.constant 0 : index
    %227 = vector.load %arg25[%c0_157, %c0_158, %c0_159] : memref<4x1x32xf32, #tpu.memory_space<vmem>>, vector<1x1x32xf32>
    %228 = vector.shape_cast %227 : vector<1x1x32xf32> to vector<1x32xf32>
    %cst_160 = arith.constant dense<0.000000e+00> : vector<15xf32>
    %229 = vector.multi_reduction <add>, %224, %cst_160 [1] : vector<15x32xf32> to vector<15xf32>
    %230 = vector.shape_cast %229 : vector<15xf32> to vector<15x1xf32>
    %cst_161 = arith.constant 3.200000e+01 : f32
    %231 = vector.broadcast %cst_161 : f32 to vector<15x1xf32>
    %232 = arith.divf %230, %231 : vector<15x1xf32>
    %233 = vector.broadcast %232 : vector<15x1xf32> to vector<15x32xf32>
    %234 = arith.subf %224, %233 : vector<15x32xf32>
    %235 = arith.mulf %234, %234 : vector<15x32xf32>
    %cst_162 = arith.constant dense<0.000000e+00> : vector<15xf32>
    %236 = vector.multi_reduction <add>, %235, %cst_162 [1] : vector<15x32xf32> to vector<15xf32>
    %237 = vector.shape_cast %236 : vector<15xf32> to vector<15x1xf32>
    %cst_163 = arith.constant 3.200000e+01 : f32
    %238 = vector.broadcast %cst_163 : f32 to vector<15x1xf32>
    %239 = arith.divf %237, %238 : vector<15x1xf32>
    %240 = vector.broadcast %232 : vector<15x1xf32> to vector<15x32xf32>
    %241 = arith.subf %224, %240 : vector<15x32xf32>
    %cst_164 = arith.constant 9.99999974E-6 : f32
    %242 = vector.broadcast %cst_164 : f32 to vector<15x1xf32>
    %243 = arith.addf %239, %242 : vector<15x1xf32>
    %244 = math.rsqrt %243 : vector<15x1xf32>
    %245 = vector.broadcast %244 : vector<15x1xf32> to vector<15x32xf32>
    %246 = arith.mulf %241, %245 : vector<15x32xf32>
    %247 = vector.broadcast %226 : vector<1x32xf32> to vector<15x32xf32>
    %248 = arith.mulf %246, %247 : vector<15x32xf32>
    %249 = vector.broadcast %228 : vector<1x32xf32> to vector<15x32xf32>
    %250 = arith.addf %248, %249 : vector<15x32xf32>
    %c1_165 = arith.constant 1 : index
    %c0_166 = arith.constant 0 : index
    %c0_167 = arith.constant 0 : index
    %251 = vector.load %arg16[%c1_165, %c0_166, %c0_167] : memref<4x32x32xf32, #tpu.memory_space<vmem>>, vector<1x32x32xf32>
    %252 = vector.shape_cast %251 : vector<1x32x32xf32> to vector<32x32xf32>
    %c1_168 = arith.constant 1 : index
    %c0_169 = arith.constant 0 : index
    %c0_170 = arith.constant 0 : index
    %253 = vector.load %arg14[%c1_168, %c0_169, %c0_170] : memref<4x32x96xf32, #tpu.memory_space<vmem>>, vector<1x32x96xf32>
    %254 = vector.shape_cast %253 : vector<1x32x96xf32> to vector<32x96xf32>
    %cst_171 = arith.constant dense<0.000000e+00> : vector<15x96xf32>
    %255 = tpu.matmul %250, %254, %cst_171 {dimension_numbers = #tpu.dot_dimension_numbers<[1], [0], [0], [1], [0, 0, 1, 1], [], []>} : vector<15x32xf32>, vector<32x96xf32>, vector<15x96xf32> -> vector<15x96xf32>
    %c1_172 = arith.constant 1 : index
    %c0_173 = arith.constant 0 : index
    %c0_174 = arith.constant 0 : index
    %256 = vector.load %arg15[%c1_172, %c0_173, %c0_174] : memref<4x1x96xf32, #tpu.memory_space<vmem>>, vector<1x1x96xf32>
    %257 = vector.shape_cast %256 : vector<1x1x96xf32> to vector<1x96xf32>
    %258 = vector.broadcast %257 : vector<1x96xf32> to vector<15x96xf32>
    %259 = arith.addf %255, %258 : vector<15x96xf32>
    %260 = vector.extract_strided_slice %259 {offsets = [0, 0], sizes = [15, 64], strides = [1, 1]} : vector<15x96xf32> to vector<15x64xf32>
    %261 = arith.mulf %260, %80 : vector<15x64xf32>
    %cst_175 = arith.constant dense<0.000000e+00> : vector<15x64xf32>
    %262 = tpu.matmul %260, %82, %cst_175 {dimension_numbers = #tpu.dot_dimension_numbers<[1], [0], [0], [1], [0, 0, 1, 1], [], []>} : vector<15x64xf32>, vector<64x64xf32>, vector<15x64xf32> -> vector<15x64xf32>
    %263 = arith.mulf %262, %81 : vector<15x64xf32>
    %264 = arith.addf %261, %263 : vector<15x64xf32>
    %265 = vector.extract_strided_slice %264 {offsets = [0, 0], sizes = [15, 32], strides = [1, 1]} : vector<15x64xf32> to vector<15x32xf32>
    %266 = vector.extract_strided_slice %264 {offsets = [0, 32], sizes = [15, 32], strides = [1, 1]} : vector<15x64xf32> to vector<15x32xf32>
    %267 = vector.extract_strided_slice %259 {offsets = [0, 64], sizes = [15, 32], strides = [1, 1]} : vector<15x96xf32> to vector<15x32xf32>
    %cst_176 = arith.constant 0.000000e+00 : f32
    %268 = vector.broadcast %cst_176 : f32 to vector<15x32xf32>
    %c1_177 = arith.constant 1 : index
    %c0_178 = arith.constant 0 : index
    %c0_179 = arith.constant 0 : index
    %269 = vector.load %arg17[%c1_177, %c0_178, %c0_179] : memref<4x1x32xf32, #tpu.memory_space<vmem>>, vector<1x1x32xf32>
    %270 = vector.shape_cast %269 : vector<1x1x32xf32> to vector<1x32xf32>
    %271 = vector.broadcast %270 : vector<1x32xf32> to vector<15x32xf32>
    %272 = arith.addf %268, %271 : vector<15x32xf32>
    %273 = vector.extract_strided_slice %265 {offsets = [0, 0], sizes = [15, 8], strides = [1, 1]} : vector<15x32xf32> to vector<15x8xf32>
    %274 = vector.extract_strided_slice %266 {offsets = [0, 0], sizes = [15, 8], strides = [1, 1]} : vector<15x32xf32> to vector<15x8xf32>
    %275 = vector.extract_strided_slice %267 {offsets = [0, 0], sizes = [15, 8], strides = [1, 1]} : vector<15x32xf32> to vector<15x8xf32>
    %cst_180 = arith.constant dense<0.000000e+00> : vector<15x15xf32>
    %276 = tpu.matmul %273, %274, %cst_180 {dimension_numbers = #tpu.dot_dimension_numbers<[1], [1], [0], [0], [0, 0, 1, 0], [], []>} : vector<15x8xf32>, vector<15x8xf32>, vector<15x15xf32> -> vector<15x15xf32>
    %cst_181 = arith.constant dense<0xFF800000> : vector<15xf32>
    %277 = vector.multi_reduction <maximumf>, %276, %cst_181 [1] : vector<15x15xf32> to vector<15xf32>
    %278 = vector.shape_cast %277 : vector<15xf32> to vector<15x1xf32>
    %279 = vector.broadcast %278 : vector<15x1xf32> to vector<15x15xf32>
    %280 = arith.subf %276, %279 : vector<15x15xf32>
    %281 = math.exp %280 : vector<15x15xf32>
    %cst_182 = arith.constant dense<0.000000e+00> : vector<15xf32>
    %282 = vector.multi_reduction <add>, %281, %cst_182 [1] : vector<15x15xf32> to vector<15xf32>
    %283 = vector.shape_cast %282 : vector<15xf32> to vector<15x1xf32>
    %cst_183 = arith.constant 1.000000e+00 : f32
    %284 = vector.broadcast %cst_183 : f32 to vector<15x1xf32>
    %285 = arith.divf %284, %283 : vector<15x1xf32>
    %286 = vector.broadcast %285 : vector<15x1xf32> to vector<15x15xf32>
    %287 = arith.mulf %281, %286 : vector<15x15xf32>
    %cst_184 = arith.constant dense<0.000000e+00> : vector<15x8xf32>
    %288 = tpu.matmul %287, %275, %cst_184 {dimension_numbers = #tpu.dot_dimension_numbers<[1], [0], [0], [1], [0, 0, 1, 1], [], []>} : vector<15x15xf32>, vector<15x8xf32>, vector<15x8xf32> -> vector<15x8xf32>
    %289 = vector.extract_strided_slice %252 {offsets = [0, 0], sizes = [8, 32], strides = [1, 1]} : vector<32x32xf32> to vector<8x32xf32>
    %cst_185 = arith.constant dense<0.000000e+00> : vector<15x32xf32>
    %290 = tpu.matmul %288, %289, %cst_185 {dimension_numbers = #tpu.dot_dimension_numbers<[1], [0], [0], [1], [0, 0, 1, 1], [], []>} : vector<15x8xf32>, vector<8x32xf32>, vector<15x32xf32> -> vector<15x32xf32>
    %291 = arith.addf %272, %290 : vector<15x32xf32>
    %292 = vector.extract_strided_slice %265 {offsets = [0, 8], sizes = [15, 8], strides = [1, 1]} : vector<15x32xf32> to vector<15x8xf32>
    %293 = vector.extract_strided_slice %266 {offsets = [0, 8], sizes = [15, 8], strides = [1, 1]} : vector<15x32xf32> to vector<15x8xf32>
    %294 = vector.extract_strided_slice %267 {offsets = [0, 8], sizes = [15, 8], strides = [1, 1]} : vector<15x32xf32> to vector<15x8xf32>
    %cst_186 = arith.constant dense<0.000000e+00> : vector<15x15xf32>
    %295 = tpu.matmul %292, %293, %cst_186 {dimension_numbers = #tpu.dot_dimension_numbers<[1], [1], [0], [0], [0, 0, 1, 0], [], []>} : vector<15x8xf32>, vector<15x8xf32>, vector<15x15xf32> -> vector<15x15xf32>
    %cst_187 = arith.constant dense<0xFF800000> : vector<15xf32>
    %296 = vector.multi_reduction <maximumf>, %295, %cst_187 [1] : vector<15x15xf32> to vector<15xf32>
    %297 = vector.shape_cast %296 : vector<15xf32> to vector<15x1xf32>
    %298 = vector.broadcast %297 : vector<15x1xf32> to vector<15x15xf32>
    %299 = arith.subf %295, %298 : vector<15x15xf32>
    %300 = math.exp %299 : vector<15x15xf32>
    %cst_188 = arith.constant dense<0.000000e+00> : vector<15xf32>
    %301 = vector.multi_reduction <add>, %300, %cst_188 [1] : vector<15x15xf32> to vector<15xf32>
    %302 = vector.shape_cast %301 : vector<15xf32> to vector<15x1xf32>
    %cst_189 = arith.constant 1.000000e+00 : f32
    %303 = vector.broadcast %cst_189 : f32 to vector<15x1xf32>
    %304 = arith.divf %303, %302 : vector<15x1xf32>
    %305 = vector.broadcast %304 : vector<15x1xf32> to vector<15x15xf32>
    %306 = arith.mulf %300, %305 : vector<15x15xf32>
    %cst_190 = arith.constant dense<0.000000e+00> : vector<15x8xf32>
    %307 = tpu.matmul %306, %294, %cst_190 {dimension_numbers = #tpu.dot_dimension_numbers<[1], [0], [0], [1], [0, 0, 1, 1], [], []>} : vector<15x15xf32>, vector<15x8xf32>, vector<15x8xf32> -> vector<15x8xf32>
    %308 = vector.extract_strided_slice %252 {offsets = [8, 0], sizes = [8, 32], strides = [1, 1]} : vector<32x32xf32> to vector<8x32xf32>
    %cst_191 = arith.constant dense<0.000000e+00> : vector<15x32xf32>
    %309 = tpu.matmul %307, %308, %cst_191 {dimension_numbers = #tpu.dot_dimension_numbers<[1], [0], [0], [1], [0, 0, 1, 1], [], []>} : vector<15x8xf32>, vector<8x32xf32>, vector<15x32xf32> -> vector<15x32xf32>
    %310 = arith.addf %291, %309 : vector<15x32xf32>
    %311 = vector.extract_strided_slice %265 {offsets = [0, 16], sizes = [15, 8], strides = [1, 1]} : vector<15x32xf32> to vector<15x8xf32>
    %312 = vector.extract_strided_slice %266 {offsets = [0, 16], sizes = [15, 8], strides = [1, 1]} : vector<15x32xf32> to vector<15x8xf32>
    %313 = vector.extract_strided_slice %267 {offsets = [0, 16], sizes = [15, 8], strides = [1, 1]} : vector<15x32xf32> to vector<15x8xf32>
    %cst_192 = arith.constant dense<0.000000e+00> : vector<15x15xf32>
    %314 = tpu.matmul %311, %312, %cst_192 {dimension_numbers = #tpu.dot_dimension_numbers<[1], [1], [0], [0], [0, 0, 1, 0], [], []>} : vector<15x8xf32>, vector<15x8xf32>, vector<15x15xf32> -> vector<15x15xf32>
    %cst_193 = arith.constant dense<0xFF800000> : vector<15xf32>
    %315 = vector.multi_reduction <maximumf>, %314, %cst_193 [1] : vector<15x15xf32> to vector<15xf32>
    %316 = vector.shape_cast %315 : vector<15xf32> to vector<15x1xf32>
    %317 = vector.broadcast %316 : vector<15x1xf32> to vector<15x15xf32>
    %318 = arith.subf %314, %317 : vector<15x15xf32>
    %319 = math.exp %318 : vector<15x15xf32>
    %cst_194 = arith.constant dense<0.000000e+00> : vector<15xf32>
    %320 = vector.multi_reduction <add>, %319, %cst_194 [1] : vector<15x15xf32> to vector<15xf32>
    %321 = vector.shape_cast %320 : vector<15xf32> to vector<15x1xf32>
    %cst_195 = arith.constant 1.000000e+00 : f32
    %322 = vector.broadcast %cst_195 : f32 to vector<15x1xf32>
    %323 = arith.divf %322, %321 : vector<15x1xf32>
    %324 = vector.broadcast %323 : vector<15x1xf32> to vector<15x15xf32>
    %325 = arith.mulf %319, %324 : vector<15x15xf32>
    %cst_196 = arith.constant dense<0.000000e+00> : vector<15x8xf32>
    %326 = tpu.matmul %325, %313, %cst_196 {dimension_numbers = #tpu.dot_dimension_numbers<[1], [0], [0], [1], [0, 0, 1, 1], [], []>} : vector<15x15xf32>, vector<15x8xf32>, vector<15x8xf32> -> vector<15x8xf32>
    %327 = vector.extract_strided_slice %252 {offsets = [16, 0], sizes = [8, 32], strides = [1, 1]} : vector<32x32xf32> to vector<8x32xf32>
    %cst_197 = arith.constant dense<0.000000e+00> : vector<15x32xf32>
    %328 = tpu.matmul %326, %327, %cst_197 {dimension_numbers = #tpu.dot_dimension_numbers<[1], [0], [0], [1], [0, 0, 1, 1], [], []>} : vector<15x8xf32>, vector<8x32xf32>, vector<15x32xf32> -> vector<15x32xf32>
    %329 = arith.addf %310, %328 : vector<15x32xf32>
    %330 = vector.extract_strided_slice %265 {offsets = [0, 24], sizes = [15, 8], strides = [1, 1]} : vector<15x32xf32> to vector<15x8xf32>
    %331 = vector.extract_strided_slice %266 {offsets = [0, 24], sizes = [15, 8], strides = [1, 1]} : vector<15x32xf32> to vector<15x8xf32>
    %332 = vector.extract_strided_slice %267 {offsets = [0, 24], sizes = [15, 8], strides = [1, 1]} : vector<15x32xf32> to vector<15x8xf32>
    %cst_198 = arith.constant dense<0.000000e+00> : vector<15x15xf32>
    %333 = tpu.matmul %330, %331, %cst_198 {dimension_numbers = #tpu.dot_dimension_numbers<[1], [1], [0], [0], [0, 0, 1, 0], [], []>} : vector<15x8xf32>, vector<15x8xf32>, vector<15x15xf32> -> vector<15x15xf32>
    %cst_199 = arith.constant dense<0xFF800000> : vector<15xf32>
    %334 = vector.multi_reduction <maximumf>, %333, %cst_199 [1] : vector<15x15xf32> to vector<15xf32>
    %335 = vector.shape_cast %334 : vector<15xf32> to vector<15x1xf32>
    %336 = vector.broadcast %335 : vector<15x1xf32> to vector<15x15xf32>
    %337 = arith.subf %333, %336 : vector<15x15xf32>
    %338 = math.exp %337 : vector<15x15xf32>
    %cst_200 = arith.constant dense<0.000000e+00> : vector<15xf32>
    %339 = vector.multi_reduction <add>, %338, %cst_200 [1] : vector<15x15xf32> to vector<15xf32>
    %340 = vector.shape_cast %339 : vector<15xf32> to vector<15x1xf32>
    %cst_201 = arith.constant 1.000000e+00 : f32
    %341 = vector.broadcast %cst_201 : f32 to vector<15x1xf32>
    %342 = arith.divf %341, %340 : vector<15x1xf32>
    %343 = vector.broadcast %342 : vector<15x1xf32> to vector<15x15xf32>
    %344 = arith.mulf %338, %343 : vector<15x15xf32>
    %cst_202 = arith.constant dense<0.000000e+00> : vector<15x8xf32>
    %345 = tpu.matmul %344, %332, %cst_202 {dimension_numbers = #tpu.dot_dimension_numbers<[1], [0], [0], [1], [0, 0, 1, 1], [], []>} : vector<15x15xf32>, vector<15x8xf32>, vector<15x8xf32> -> vector<15x8xf32>
    %346 = vector.extract_strided_slice %252 {offsets = [24, 0], sizes = [8, 32], strides = [1, 1]} : vector<32x32xf32> to vector<8x32xf32>
    %cst_203 = arith.constant dense<0.000000e+00> : vector<15x32xf32>
    %347 = tpu.matmul %345, %346, %cst_203 {dimension_numbers = #tpu.dot_dimension_numbers<[1], [0], [0], [1], [0, 0, 1, 1], [], []>} : vector<15x8xf32>, vector<8x32xf32>, vector<15x32xf32> -> vector<15x32xf32>
    %348 = arith.addf %329, %347 : vector<15x32xf32>
    %349 = arith.addf %250, %348 : vector<15x32xf32>
    %c1_204 = arith.constant 1 : index
    %c0_205 = arith.constant 0 : index
    %c0_206 = arith.constant 0 : index
    %350 = vector.load %arg18[%c1_204, %c0_205, %c0_206] : memref<4x1x32xf32, #tpu.memory_space<vmem>>, vector<1x1x32xf32>
    %351 = vector.shape_cast %350 : vector<1x1x32xf32> to vector<1x32xf32>
    %c1_207 = arith.constant 1 : index
    %c0_208 = arith.constant 0 : index
    %c0_209 = arith.constant 0 : index
    %352 = vector.load %arg19[%c1_207, %c0_208, %c0_209] : memref<4x1x32xf32, #tpu.memory_space<vmem>>, vector<1x1x32xf32>
    %353 = vector.shape_cast %352 : vector<1x1x32xf32> to vector<1x32xf32>
    %cst_210 = arith.constant dense<0.000000e+00> : vector<15xf32>
    %354 = vector.multi_reduction <add>, %349, %cst_210 [1] : vector<15x32xf32> to vector<15xf32>
    %355 = vector.shape_cast %354 : vector<15xf32> to vector<15x1xf32>
    %cst_211 = arith.constant 3.200000e+01 : f32
    %356 = vector.broadcast %cst_211 : f32 to vector<15x1xf32>
    %357 = arith.divf %355, %356 : vector<15x1xf32>
    %358 = vector.broadcast %357 : vector<15x1xf32> to vector<15x32xf32>
    %359 = arith.subf %349, %358 : vector<15x32xf32>
    %360 = arith.mulf %359, %359 : vector<15x32xf32>
    %cst_212 = arith.constant dense<0.000000e+00> : vector<15xf32>
    %361 = vector.multi_reduction <add>, %360, %cst_212 [1] : vector<15x32xf32> to vector<15xf32>
    %362 = vector.shape_cast %361 : vector<15xf32> to vector<15x1xf32>
    %cst_213 = arith.constant 3.200000e+01 : f32
    %363 = vector.broadcast %cst_213 : f32 to vector<15x1xf32>
    %364 = arith.divf %362, %363 : vector<15x1xf32>
    %365 = vector.broadcast %357 : vector<15x1xf32> to vector<15x32xf32>
    %366 = arith.subf %349, %365 : vector<15x32xf32>
    %cst_214 = arith.constant 9.99999974E-6 : f32
    %367 = vector.broadcast %cst_214 : f32 to vector<15x1xf32>
    %368 = arith.addf %364, %367 : vector<15x1xf32>
    %369 = math.rsqrt %368 : vector<15x1xf32>
    %370 = vector.broadcast %369 : vector<15x1xf32> to vector<15x32xf32>
    %371 = arith.mulf %366, %370 : vector<15x32xf32>
    %372 = vector.broadcast %351 : vector<1x32xf32> to vector<15x32xf32>
    %373 = arith.mulf %371, %372 : vector<15x32xf32>
    %374 = vector.broadcast %353 : vector<1x32xf32> to vector<15x32xf32>
    %375 = arith.addf %373, %374 : vector<15x32xf32>
    %c1_215 = arith.constant 1 : index
    %c0_216 = arith.constant 0 : index
    %c0_217 = arith.constant 0 : index
    %376 = vector.load %arg20[%c1_215, %c0_216, %c0_217] : memref<4x32x128xf32, #tpu.memory_space<vmem>>, vector<1x32x128xf32>
    %377 = vector.shape_cast %376 : vector<1x32x128xf32> to vector<32x128xf32>
    %cst_218 = arith.constant dense<0.000000e+00> : vector<15x128xf32>
    %378 = tpu.matmul %375, %377, %cst_218 {dimension_numbers = #tpu.dot_dimension_numbers<[1], [0], [0], [1], [0, 0, 1, 1], [], []>} : vector<15x32xf32>, vector<32x128xf32>, vector<15x128xf32> -> vector<15x128xf32>
    %c1_219 = arith.constant 1 : index
    %c0_220 = arith.constant 0 : index
    %c0_221 = arith.constant 0 : index
    %379 = vector.load %arg21[%c1_219, %c0_220, %c0_221] : memref<4x1x128xf32, #tpu.memory_space<vmem>>, vector<1x1x128xf32>
    %380 = vector.shape_cast %379 : vector<1x1x128xf32> to vector<1x128xf32>
    %381 = vector.broadcast %380 : vector<1x128xf32> to vector<15x128xf32>
    %382 = arith.addf %378, %381 : vector<15x128xf32>
    %cst_222 = arith.constant 0.000000e+00 : f32
    %383 = vector.broadcast %cst_222 : f32 to vector<15x128xf32>
    %384 = arith.maximumf %382, %383 : vector<15x128xf32>
    %c1_223 = arith.constant 1 : index
    %c0_224 = arith.constant 0 : index
    %c0_225 = arith.constant 0 : index
    %385 = vector.load %arg22[%c1_223, %c0_224, %c0_225] : memref<4x128x32xf32, #tpu.memory_space<vmem>>, vector<1x128x32xf32>
    %386 = vector.shape_cast %385 : vector<1x128x32xf32> to vector<128x32xf32>
    %cst_226 = arith.constant dense<0.000000e+00> : vector<15x32xf32>
    %387 = tpu.matmul %384, %386, %cst_226 {dimension_numbers = #tpu.dot_dimension_numbers<[1], [0], [0], [1], [0, 0, 1, 1], [], []>} : vector<15x128xf32>, vector<128x32xf32>, vector<15x32xf32> -> vector<15x32xf32>
    %c1_227 = arith.constant 1 : index
    %c0_228 = arith.constant 0 : index
    %c0_229 = arith.constant 0 : index
    %388 = vector.load %arg23[%c1_227, %c0_228, %c0_229] : memref<4x1x32xf32, #tpu.memory_space<vmem>>, vector<1x1x32xf32>
    %389 = vector.shape_cast %388 : vector<1x1x32xf32> to vector<1x32xf32>
    %390 = vector.broadcast %389 : vector<1x32xf32> to vector<15x32xf32>
    %391 = arith.addf %387, %390 : vector<15x32xf32>
    %392 = arith.addf %375, %391 : vector<15x32xf32>
    %c1_230 = arith.constant 1 : index
    %c0_231 = arith.constant 0 : index
    %c0_232 = arith.constant 0 : index
    %393 = vector.load %arg24[%c1_230, %c0_231, %c0_232] : memref<4x1x32xf32, #tpu.memory_space<vmem>>, vector<1x1x32xf32>
    %394 = vector.shape_cast %393 : vector<1x1x32xf32> to vector<1x32xf32>
    %c1_233 = arith.constant 1 : index
    %c0_234 = arith.constant 0 : index
    %c0_235 = arith.constant 0 : index
    %395 = vector.load %arg25[%c1_233, %c0_234, %c0_235] : memref<4x1x32xf32, #tpu.memory_space<vmem>>, vector<1x1x32xf32>
    %396 = vector.shape_cast %395 : vector<1x1x32xf32> to vector<1x32xf32>
    %cst_236 = arith.constant dense<0.000000e+00> : vector<15xf32>
    %397 = vector.multi_reduction <add>, %392, %cst_236 [1] : vector<15x32xf32> to vector<15xf32>
    %398 = vector.shape_cast %397 : vector<15xf32> to vector<15x1xf32>
    %cst_237 = arith.constant 3.200000e+01 : f32
    %399 = vector.broadcast %cst_237 : f32 to vector<15x1xf32>
    %400 = arith.divf %398, %399 : vector<15x1xf32>
    %401 = vector.broadcast %400 : vector<15x1xf32> to vector<15x32xf32>
    %402 = arith.subf %392, %401 : vector<15x32xf32>
    %403 = arith.mulf %402, %402 : vector<15x32xf32>
    %cst_238 = arith.constant dense<0.000000e+00> : vector<15xf32>
    %404 = vector.multi_reduction <add>, %403, %cst_238 [1] : vector<15x32xf32> to vector<15xf32>
    %405 = vector.shape_cast %404 : vector<15xf32> to vector<15x1xf32>
    %cst_239 = arith.constant 3.200000e+01 : f32
    %406 = vector.broadcast %cst_239 : f32 to vector<15x1xf32>
    %407 = arith.divf %405, %406 : vector<15x1xf32>
    %408 = vector.broadcast %400 : vector<15x1xf32> to vector<15x32xf32>
    %409 = arith.subf %392, %408 : vector<15x32xf32>
    %cst_240 = arith.constant 9.99999974E-6 : f32
    %410 = vector.broadcast %cst_240 : f32 to vector<15x1xf32>
    %411 = arith.addf %407, %410 : vector<15x1xf32>
    %412 = math.rsqrt %411 : vector<15x1xf32>
    %413 = vector.broadcast %412 : vector<15x1xf32> to vector<15x32xf32>
    %414 = arith.mulf %409, %413 : vector<15x32xf32>
    %415 = vector.broadcast %394 : vector<1x32xf32> to vector<15x32xf32>
    %416 = arith.mulf %414, %415 : vector<15x32xf32>
    %417 = vector.broadcast %396 : vector<1x32xf32> to vector<15x32xf32>
    %418 = arith.addf %416, %417 : vector<15x32xf32>
    %c2_241 = arith.constant 2 : index
    %c0_242 = arith.constant 0 : index
    %c0_243 = arith.constant 0 : index
    %419 = vector.load %arg16[%c2_241, %c0_242, %c0_243] : memref<4x32x32xf32, #tpu.memory_space<vmem>>, vector<1x32x32xf32>
    %420 = vector.shape_cast %419 : vector<1x32x32xf32> to vector<32x32xf32>
    %c2_244 = arith.constant 2 : index
    %c0_245 = arith.constant 0 : index
    %c0_246 = arith.constant 0 : index
    %421 = vector.load %arg14[%c2_244, %c0_245, %c0_246] : memref<4x32x96xf32, #tpu.memory_space<vmem>>, vector<1x32x96xf32>
    %422 = vector.shape_cast %421 : vector<1x32x96xf32> to vector<32x96xf32>
    %cst_247 = arith.constant dense<0.000000e+00> : vector<15x96xf32>
    %423 = tpu.matmul %418, %422, %cst_247 {dimension_numbers = #tpu.dot_dimension_numbers<[1], [0], [0], [1], [0, 0, 1, 1], [], []>} : vector<15x32xf32>, vector<32x96xf32>, vector<15x96xf32> -> vector<15x96xf32>
    %c2_248 = arith.constant 2 : index
    %c0_249 = arith.constant 0 : index
    %c0_250 = arith.constant 0 : index
    %424 = vector.load %arg15[%c2_248, %c0_249, %c0_250] : memref<4x1x96xf32, #tpu.memory_space<vmem>>, vector<1x1x96xf32>
    %425 = vector.shape_cast %424 : vector<1x1x96xf32> to vector<1x96xf32>
    %426 = vector.broadcast %425 : vector<1x96xf32> to vector<15x96xf32>
    %427 = arith.addf %423, %426 : vector<15x96xf32>
    %428 = vector.extract_strided_slice %427 {offsets = [0, 0], sizes = [15, 64], strides = [1, 1]} : vector<15x96xf32> to vector<15x64xf32>
    %429 = arith.mulf %428, %80 : vector<15x64xf32>
    %cst_251 = arith.constant dense<0.000000e+00> : vector<15x64xf32>
    %430 = tpu.matmul %428, %82, %cst_251 {dimension_numbers = #tpu.dot_dimension_numbers<[1], [0], [0], [1], [0, 0, 1, 1], [], []>} : vector<15x64xf32>, vector<64x64xf32>, vector<15x64xf32> -> vector<15x64xf32>
    %431 = arith.mulf %430, %81 : vector<15x64xf32>
    %432 = arith.addf %429, %431 : vector<15x64xf32>
    %433 = vector.extract_strided_slice %432 {offsets = [0, 0], sizes = [15, 32], strides = [1, 1]} : vector<15x64xf32> to vector<15x32xf32>
    %434 = vector.extract_strided_slice %432 {offsets = [0, 32], sizes = [15, 32], strides = [1, 1]} : vector<15x64xf32> to vector<15x32xf32>
    %435 = vector.extract_strided_slice %427 {offsets = [0, 64], sizes = [15, 32], strides = [1, 1]} : vector<15x96xf32> to vector<15x32xf32>
    %cst_252 = arith.constant 0.000000e+00 : f32
    %436 = vector.broadcast %cst_252 : f32 to vector<15x32xf32>
    %c2_253 = arith.constant 2 : index
    %c0_254 = arith.constant 0 : index
    %c0_255 = arith.constant 0 : index
    %437 = vector.load %arg17[%c2_253, %c0_254, %c0_255] : memref<4x1x32xf32, #tpu.memory_space<vmem>>, vector<1x1x32xf32>
    %438 = vector.shape_cast %437 : vector<1x1x32xf32> to vector<1x32xf32>
    %439 = vector.broadcast %438 : vector<1x32xf32> to vector<15x32xf32>
    %440 = arith.addf %436, %439 : vector<15x32xf32>
    %441 = vector.extract_strided_slice %433 {offsets = [0, 0], sizes = [15, 8], strides = [1, 1]} : vector<15x32xf32> to vector<15x8xf32>
    %442 = vector.extract_strided_slice %434 {offsets = [0, 0], sizes = [15, 8], strides = [1, 1]} : vector<15x32xf32> to vector<15x8xf32>
    %443 = vector.extract_strided_slice %435 {offsets = [0, 0], sizes = [15, 8], strides = [1, 1]} : vector<15x32xf32> to vector<15x8xf32>
    %cst_256 = arith.constant dense<0.000000e+00> : vector<15x15xf32>
    %444 = tpu.matmul %441, %442, %cst_256 {dimension_numbers = #tpu.dot_dimension_numbers<[1], [1], [0], [0], [0, 0, 1, 0], [], []>} : vector<15x8xf32>, vector<15x8xf32>, vector<15x15xf32> -> vector<15x15xf32>
    %cst_257 = arith.constant dense<0xFF800000> : vector<15xf32>
    %445 = vector.multi_reduction <maximumf>, %444, %cst_257 [1] : vector<15x15xf32> to vector<15xf32>
    %446 = vector.shape_cast %445 : vector<15xf32> to vector<15x1xf32>
    %447 = vector.broadcast %446 : vector<15x1xf32> to vector<15x15xf32>
    %448 = arith.subf %444, %447 : vector<15x15xf32>
    %449 = math.exp %448 : vector<15x15xf32>
    %cst_258 = arith.constant dense<0.000000e+00> : vector<15xf32>
    %450 = vector.multi_reduction <add>, %449, %cst_258 [1] : vector<15x15xf32> to vector<15xf32>
    %451 = vector.shape_cast %450 : vector<15xf32> to vector<15x1xf32>
    %cst_259 = arith.constant 1.000000e+00 : f32
    %452 = vector.broadcast %cst_259 : f32 to vector<15x1xf32>
    %453 = arith.divf %452, %451 : vector<15x1xf32>
    %454 = vector.broadcast %453 : vector<15x1xf32> to vector<15x15xf32>
    %455 = arith.mulf %449, %454 : vector<15x15xf32>
    %cst_260 = arith.constant dense<0.000000e+00> : vector<15x8xf32>
    %456 = tpu.matmul %455, %443, %cst_260 {dimension_numbers = #tpu.dot_dimension_numbers<[1], [0], [0], [1], [0, 0, 1, 1], [], []>} : vector<15x15xf32>, vector<15x8xf32>, vector<15x8xf32> -> vector<15x8xf32>
    %457 = vector.extract_strided_slice %420 {offsets = [0, 0], sizes = [8, 32], strides = [1, 1]} : vector<32x32xf32> to vector<8x32xf32>
    %cst_261 = arith.constant dense<0.000000e+00> : vector<15x32xf32>
    %458 = tpu.matmul %456, %457, %cst_261 {dimension_numbers = #tpu.dot_dimension_numbers<[1], [0], [0], [1], [0, 0, 1, 1], [], []>} : vector<15x8xf32>, vector<8x32xf32>, vector<15x32xf32> -> vector<15x32xf32>
    %459 = arith.addf %440, %458 : vector<15x32xf32>
    %460 = vector.extract_strided_slice %433 {offsets = [0, 8], sizes = [15, 8], strides = [1, 1]} : vector<15x32xf32> to vector<15x8xf32>
    %461 = vector.extract_strided_slice %434 {offsets = [0, 8], sizes = [15, 8], strides = [1, 1]} : vector<15x32xf32> to vector<15x8xf32>
    %462 = vector.extract_strided_slice %435 {offsets = [0, 8], sizes = [15, 8], strides = [1, 1]} : vector<15x32xf32> to vector<15x8xf32>
    %cst_262 = arith.constant dense<0.000000e+00> : vector<15x15xf32>
    %463 = tpu.matmul %460, %461, %cst_262 {dimension_numbers = #tpu.dot_dimension_numbers<[1], [1], [0], [0], [0, 0, 1, 0], [], []>} : vector<15x8xf32>, vector<15x8xf32>, vector<15x15xf32> -> vector<15x15xf32>
    %cst_263 = arith.constant dense<0xFF800000> : vector<15xf32>
    %464 = vector.multi_reduction <maximumf>, %463, %cst_263 [1] : vector<15x15xf32> to vector<15xf32>
    %465 = vector.shape_cast %464 : vector<15xf32> to vector<15x1xf32>
    %466 = vector.broadcast %465 : vector<15x1xf32> to vector<15x15xf32>
    %467 = arith.subf %463, %466 : vector<15x15xf32>
    %468 = math.exp %467 : vector<15x15xf32>
    %cst_264 = arith.constant dense<0.000000e+00> : vector<15xf32>
    %469 = vector.multi_reduction <add>, %468, %cst_264 [1] : vector<15x15xf32> to vector<15xf32>
    %470 = vector.shape_cast %469 : vector<15xf32> to vector<15x1xf32>
    %cst_265 = arith.constant 1.000000e+00 : f32
    %471 = vector.broadcast %cst_265 : f32 to vector<15x1xf32>
    %472 = arith.divf %471, %470 : vector<15x1xf32>
    %473 = vector.broadcast %472 : vector<15x1xf32> to vector<15x15xf32>
    %474 = arith.mulf %468, %473 : vector<15x15xf32>
    %cst_266 = arith.constant dense<0.000000e+00> : vector<15x8xf32>
    %475 = tpu.matmul %474, %462, %cst_266 {dimension_numbers = #tpu.dot_dimension_numbers<[1], [0], [0], [1], [0, 0, 1, 1], [], []>} : vector<15x15xf32>, vector<15x8xf32>, vector<15x8xf32> -> vector<15x8xf32>
    %476 = vector.extract_strided_slice %420 {offsets = [8, 0], sizes = [8, 32], strides = [1, 1]} : vector<32x32xf32> to vector<8x32xf32>
    %cst_267 = arith.constant dense<0.000000e+00> : vector<15x32xf32>
    %477 = tpu.matmul %475, %476, %cst_267 {dimension_numbers = #tpu.dot_dimension_numbers<[1], [0], [0], [1], [0, 0, 1, 1], [], []>} : vector<15x8xf32>, vector<8x32xf32>, vector<15x32xf32> -> vector<15x32xf32>
    %478 = arith.addf %459, %477 : vector<15x32xf32>
    %479 = vector.extract_strided_slice %433 {offsets = [0, 16], sizes = [15, 8], strides = [1, 1]} : vector<15x32xf32> to vector<15x8xf32>
    %480 = vector.extract_strided_slice %434 {offsets = [0, 16], sizes = [15, 8], strides = [1, 1]} : vector<15x32xf32> to vector<15x8xf32>
    %481 = vector.extract_strided_slice %435 {offsets = [0, 16], sizes = [15, 8], strides = [1, 1]} : vector<15x32xf32> to vector<15x8xf32>
    %cst_268 = arith.constant dense<0.000000e+00> : vector<15x15xf32>
    %482 = tpu.matmul %479, %480, %cst_268 {dimension_numbers = #tpu.dot_dimension_numbers<[1], [1], [0], [0], [0, 0, 1, 0], [], []>} : vector<15x8xf32>, vector<15x8xf32>, vector<15x15xf32> -> vector<15x15xf32>
    %cst_269 = arith.constant dense<0xFF800000> : vector<15xf32>
    %483 = vector.multi_reduction <maximumf>, %482, %cst_269 [1] : vector<15x15xf32> to vector<15xf32>
    %484 = vector.shape_cast %483 : vector<15xf32> to vector<15x1xf32>
    %485 = vector.broadcast %484 : vector<15x1xf32> to vector<15x15xf32>
    %486 = arith.subf %482, %485 : vector<15x15xf32>
    %487 = math.exp %486 : vector<15x15xf32>
    %cst_270 = arith.constant dense<0.000000e+00> : vector<15xf32>
    %488 = vector.multi_reduction <add>, %487, %cst_270 [1] : vector<15x15xf32> to vector<15xf32>
    %489 = vector.shape_cast %488 : vector<15xf32> to vector<15x1xf32>
    %cst_271 = arith.constant 1.000000e+00 : f32
    %490 = vector.broadcast %cst_271 : f32 to vector<15x1xf32>
    %491 = arith.divf %490, %489 : vector<15x1xf32>
    %492 = vector.broadcast %491 : vector<15x1xf32> to vector<15x15xf32>
    %493 = arith.mulf %487, %492 : vector<15x15xf32>
    %cst_272 = arith.constant dense<0.000000e+00> : vector<15x8xf32>
    %494 = tpu.matmul %493, %481, %cst_272 {dimension_numbers = #tpu.dot_dimension_numbers<[1], [0], [0], [1], [0, 0, 1, 1], [], []>} : vector<15x15xf32>, vector<15x8xf32>, vector<15x8xf32> -> vector<15x8xf32>
    %495 = vector.extract_strided_slice %420 {offsets = [16, 0], sizes = [8, 32], strides = [1, 1]} : vector<32x32xf32> to vector<8x32xf32>
    %cst_273 = arith.constant dense<0.000000e+00> : vector<15x32xf32>
    %496 = tpu.matmul %494, %495, %cst_273 {dimension_numbers = #tpu.dot_dimension_numbers<[1], [0], [0], [1], [0, 0, 1, 1], [], []>} : vector<15x8xf32>, vector<8x32xf32>, vector<15x32xf32> -> vector<15x32xf32>
    %497 = arith.addf %478, %496 : vector<15x32xf32>
    %498 = vector.extract_strided_slice %433 {offsets = [0, 24], sizes = [15, 8], strides = [1, 1]} : vector<15x32xf32> to vector<15x8xf32>
    %499 = vector.extract_strided_slice %434 {offsets = [0, 24], sizes = [15, 8], strides = [1, 1]} : vector<15x32xf32> to vector<15x8xf32>
    %500 = vector.extract_strided_slice %435 {offsets = [0, 24], sizes = [15, 8], strides = [1, 1]} : vector<15x32xf32> to vector<15x8xf32>
    %cst_274 = arith.constant dense<0.000000e+00> : vector<15x15xf32>
    %501 = tpu.matmul %498, %499, %cst_274 {dimension_numbers = #tpu.dot_dimension_numbers<[1], [1], [0], [0], [0, 0, 1, 0], [], []>} : vector<15x8xf32>, vector<15x8xf32>, vector<15x15xf32> -> vector<15x15xf32>
    %cst_275 = arith.constant dense<0xFF800000> : vector<15xf32>
    %502 = vector.multi_reduction <maximumf>, %501, %cst_275 [1] : vector<15x15xf32> to vector<15xf32>
    %503 = vector.shape_cast %502 : vector<15xf32> to vector<15x1xf32>
    %504 = vector.broadcast %503 : vector<15x1xf32> to vector<15x15xf32>
    %505 = arith.subf %501, %504 : vector<15x15xf32>
    %506 = math.exp %505 : vector<15x15xf32>
    %cst_276 = arith.constant dense<0.000000e+00> : vector<15xf32>
    %507 = vector.multi_reduction <add>, %506, %cst_276 [1] : vector<15x15xf32> to vector<15xf32>
    %508 = vector.shape_cast %507 : vector<15xf32> to vector<15x1xf32>
    %cst_277 = arith.constant 1.000000e+00 : f32
    %509 = vector.broadcast %cst_277 : f32 to vector<15x1xf32>
    %510 = arith.divf %509, %508 : vector<15x1xf32>
    %511 = vector.broadcast %510 : vector<15x1xf32> to vector<15x15xf32>
    %512 = arith.mulf %506, %511 : vector<15x15xf32>
    %cst_278 = arith.constant dense<0.000000e+00> : vector<15x8xf32>
    %513 = tpu.matmul %512, %500, %cst_278 {dimension_numbers = #tpu.dot_dimension_numbers<[1], [0], [0], [1], [0, 0, 1, 1], [], []>} : vector<15x15xf32>, vector<15x8xf32>, vector<15x8xf32> -> vector<15x8xf32>
    %514 = vector.extract_strided_slice %420 {offsets = [24, 0], sizes = [8, 32], strides = [1, 1]} : vector<32x32xf32> to vector<8x32xf32>
    %cst_279 = arith.constant dense<0.000000e+00> : vector<15x32xf32>
    %515 = tpu.matmul %513, %514, %cst_279 {dimension_numbers = #tpu.dot_dimension_numbers<[1], [0], [0], [1], [0, 0, 1, 1], [], []>} : vector<15x8xf32>, vector<8x32xf32>, vector<15x32xf32> -> vector<15x32xf32>
    %516 = arith.addf %497, %515 : vector<15x32xf32>
    %517 = arith.addf %418, %516 : vector<15x32xf32>
    %c2_280 = arith.constant 2 : index
    %c0_281 = arith.constant 0 : index
    %c0_282 = arith.constant 0 : index
    %518 = vector.load %arg18[%c2_280, %c0_281, %c0_282] : memref<4x1x32xf32, #tpu.memory_space<vmem>>, vector<1x1x32xf32>
    %519 = vector.shape_cast %518 : vector<1x1x32xf32> to vector<1x32xf32>
    %c2_283 = arith.constant 2 : index
    %c0_284 = arith.constant 0 : index
    %c0_285 = arith.constant 0 : index
    %520 = vector.load %arg19[%c2_283, %c0_284, %c0_285] : memref<4x1x32xf32, #tpu.memory_space<vmem>>, vector<1x1x32xf32>
    %521 = vector.shape_cast %520 : vector<1x1x32xf32> to vector<1x32xf32>
    %cst_286 = arith.constant dense<0.000000e+00> : vector<15xf32>
    %522 = vector.multi_reduction <add>, %517, %cst_286 [1] : vector<15x32xf32> to vector<15xf32>
    %523 = vector.shape_cast %522 : vector<15xf32> to vector<15x1xf32>
    %cst_287 = arith.constant 3.200000e+01 : f32
    %524 = vector.broadcast %cst_287 : f32 to vector<15x1xf32>
    %525 = arith.divf %523, %524 : vector<15x1xf32>
    %526 = vector.broadcast %525 : vector<15x1xf32> to vector<15x32xf32>
    %527 = arith.subf %517, %526 : vector<15x32xf32>
    %528 = arith.mulf %527, %527 : vector<15x32xf32>
    %cst_288 = arith.constant dense<0.000000e+00> : vector<15xf32>
    %529 = vector.multi_reduction <add>, %528, %cst_288 [1] : vector<15x32xf32> to vector<15xf32>
    %530 = vector.shape_cast %529 : vector<15xf32> to vector<15x1xf32>
    %cst_289 = arith.constant 3.200000e+01 : f32
    %531 = vector.broadcast %cst_289 : f32 to vector<15x1xf32>
    %532 = arith.divf %530, %531 : vector<15x1xf32>
    %533 = vector.broadcast %525 : vector<15x1xf32> to vector<15x32xf32>
    %534 = arith.subf %517, %533 : vector<15x32xf32>
    %cst_290 = arith.constant 9.99999974E-6 : f32
    %535 = vector.broadcast %cst_290 : f32 to vector<15x1xf32>
    %536 = arith.addf %532, %535 : vector<15x1xf32>
    %537 = math.rsqrt %536 : vector<15x1xf32>
    %538 = vector.broadcast %537 : vector<15x1xf32> to vector<15x32xf32>
    %539 = arith.mulf %534, %538 : vector<15x32xf32>
    %540 = vector.broadcast %519 : vector<1x32xf32> to vector<15x32xf32>
    %541 = arith.mulf %539, %540 : vector<15x32xf32>
    %542 = vector.broadcast %521 : vector<1x32xf32> to vector<15x32xf32>
    %543 = arith.addf %541, %542 : vector<15x32xf32>
    %c2_291 = arith.constant 2 : index
    %c0_292 = arith.constant 0 : index
    %c0_293 = arith.constant 0 : index
    %544 = vector.load %arg20[%c2_291, %c0_292, %c0_293] : memref<4x32x128xf32, #tpu.memory_space<vmem>>, vector<1x32x128xf32>
    %545 = vector.shape_cast %544 : vector<1x32x128xf32> to vector<32x128xf32>
    %cst_294 = arith.constant dense<0.000000e+00> : vector<15x128xf32>
    %546 = tpu.matmul %543, %545, %cst_294 {dimension_numbers = #tpu.dot_dimension_numbers<[1], [0], [0], [1], [0, 0, 1, 1], [], []>} : vector<15x32xf32>, vector<32x128xf32>, vector<15x128xf32> -> vector<15x128xf32>
    %c2_295 = arith.constant 2 : index
    %c0_296 = arith.constant 0 : index
    %c0_297 = arith.constant 0 : index
    %547 = vector.load %arg21[%c2_295, %c0_296, %c0_297] : memref<4x1x128xf32, #tpu.memory_space<vmem>>, vector<1x1x128xf32>
    %548 = vector.shape_cast %547 : vector<1x1x128xf32> to vector<1x128xf32>
    %549 = vector.broadcast %548 : vector<1x128xf32> to vector<15x128xf32>
    %550 = arith.addf %546, %549 : vector<15x128xf32>
    %cst_298 = arith.constant 0.000000e+00 : f32
    %551 = vector.broadcast %cst_298 : f32 to vector<15x128xf32>
    %552 = arith.maximumf %550, %551 : vector<15x128xf32>
    %c2_299 = arith.constant 2 : index
    %c0_300 = arith.constant 0 : index
    %c0_301 = arith.constant 0 : index
    %553 = vector.load %arg22[%c2_299, %c0_300, %c0_301] : memref<4x128x32xf32, #tpu.memory_space<vmem>>, vector<1x128x32xf32>
    %554 = vector.shape_cast %553 : vector<1x128x32xf32> to vector<128x32xf32>
    %cst_302 = arith.constant dense<0.000000e+00> : vector<15x32xf32>
    %555 = tpu.matmul %552, %554, %cst_302 {dimension_numbers = #tpu.dot_dimension_numbers<[1], [0], [0], [1], [0, 0, 1, 1], [], []>} : vector<15x128xf32>, vector<128x32xf32>, vector<15x32xf32> -> vector<15x32xf32>
    %c2_303 = arith.constant 2 : index
    %c0_304 = arith.constant 0 : index
    %c0_305 = arith.constant 0 : index
    %556 = vector.load %arg23[%c2_303, %c0_304, %c0_305] : memref<4x1x32xf32, #tpu.memory_space<vmem>>, vector<1x1x32xf32>
    %557 = vector.shape_cast %556 : vector<1x1x32xf32> to vector<1x32xf32>
    %558 = vector.broadcast %557 : vector<1x32xf32> to vector<15x32xf32>
    %559 = arith.addf %555, %558 : vector<15x32xf32>
    %560 = arith.addf %543, %559 : vector<15x32xf32>
    %c2_306 = arith.constant 2 : index
    %c0_307 = arith.constant 0 : index
    %c0_308 = arith.constant 0 : index
    %561 = vector.load %arg24[%c2_306, %c0_307, %c0_308] : memref<4x1x32xf32, #tpu.memory_space<vmem>>, vector<1x1x32xf32>
    %562 = vector.shape_cast %561 : vector<1x1x32xf32> to vector<1x32xf32>
    %c2_309 = arith.constant 2 : index
    %c0_310 = arith.constant 0 : index
    %c0_311 = arith.constant 0 : index
    %563 = vector.load %arg25[%c2_309, %c0_310, %c0_311] : memref<4x1x32xf32, #tpu.memory_space<vmem>>, vector<1x1x32xf32>
    %564 = vector.shape_cast %563 : vector<1x1x32xf32> to vector<1x32xf32>
    %cst_312 = arith.constant dense<0.000000e+00> : vector<15xf32>
    %565 = vector.multi_reduction <add>, %560, %cst_312 [1] : vector<15x32xf32> to vector<15xf32>
    %566 = vector.shape_cast %565 : vector<15xf32> to vector<15x1xf32>
    %cst_313 = arith.constant 3.200000e+01 : f32
    %567 = vector.broadcast %cst_313 : f32 to vector<15x1xf32>
    %568 = arith.divf %566, %567 : vector<15x1xf32>
    %569 = vector.broadcast %568 : vector<15x1xf32> to vector<15x32xf32>
    %570 = arith.subf %560, %569 : vector<15x32xf32>
    %571 = arith.mulf %570, %570 : vector<15x32xf32>
    %cst_314 = arith.constant dense<0.000000e+00> : vector<15xf32>
    %572 = vector.multi_reduction <add>, %571, %cst_314 [1] : vector<15x32xf32> to vector<15xf32>
    %573 = vector.shape_cast %572 : vector<15xf32> to vector<15x1xf32>
    %cst_315 = arith.constant 3.200000e+01 : f32
    %574 = vector.broadcast %cst_315 : f32 to vector<15x1xf32>
    %575 = arith.divf %573, %574 : vector<15x1xf32>
    %576 = vector.broadcast %568 : vector<15x1xf32> to vector<15x32xf32>
    %577 = arith.subf %560, %576 : vector<15x32xf32>
    %cst_316 = arith.constant 9.99999974E-6 : f32
    %578 = vector.broadcast %cst_316 : f32 to vector<15x1xf32>
    %579 = arith.addf %575, %578 : vector<15x1xf32>
    %580 = math.rsqrt %579 : vector<15x1xf32>
    %581 = vector.broadcast %580 : vector<15x1xf32> to vector<15x32xf32>
    %582 = arith.mulf %577, %581 : vector<15x32xf32>
    %583 = vector.broadcast %562 : vector<1x32xf32> to vector<15x32xf32>
    %584 = arith.mulf %582, %583 : vector<15x32xf32>
    %585 = vector.broadcast %564 : vector<1x32xf32> to vector<15x32xf32>
    %586 = arith.addf %584, %585 : vector<15x32xf32>
    %c3_317 = arith.constant 3 : index
    %c0_318 = arith.constant 0 : index
    %c0_319 = arith.constant 0 : index
    %587 = vector.load %arg16[%c3_317, %c0_318, %c0_319] : memref<4x32x32xf32, #tpu.memory_space<vmem>>, vector<1x32x32xf32>
    %588 = vector.shape_cast %587 : vector<1x32x32xf32> to vector<32x32xf32>
    %c3_320 = arith.constant 3 : index
    %c0_321 = arith.constant 0 : index
    %c0_322 = arith.constant 0 : index
    %589 = vector.load %arg14[%c3_320, %c0_321, %c0_322] : memref<4x32x96xf32, #tpu.memory_space<vmem>>, vector<1x32x96xf32>
    %590 = vector.shape_cast %589 : vector<1x32x96xf32> to vector<32x96xf32>
    %cst_323 = arith.constant dense<0.000000e+00> : vector<15x96xf32>
    %591 = tpu.matmul %586, %590, %cst_323 {dimension_numbers = #tpu.dot_dimension_numbers<[1], [0], [0], [1], [0, 0, 1, 1], [], []>} : vector<15x32xf32>, vector<32x96xf32>, vector<15x96xf32> -> vector<15x96xf32>
    %c3_324 = arith.constant 3 : index
    %c0_325 = arith.constant 0 : index
    %c0_326 = arith.constant 0 : index
    %592 = vector.load %arg15[%c3_324, %c0_325, %c0_326] : memref<4x1x96xf32, #tpu.memory_space<vmem>>, vector<1x1x96xf32>
    %593 = vector.shape_cast %592 : vector<1x1x96xf32> to vector<1x96xf32>
    %594 = vector.broadcast %593 : vector<1x96xf32> to vector<15x96xf32>
    %595 = arith.addf %591, %594 : vector<15x96xf32>
    %596 = vector.extract_strided_slice %595 {offsets = [0, 0], sizes = [15, 64], strides = [1, 1]} : vector<15x96xf32> to vector<15x64xf32>
    %597 = arith.mulf %596, %80 : vector<15x64xf32>
    %cst_327 = arith.constant dense<0.000000e+00> : vector<15x64xf32>
    %598 = tpu.matmul %596, %82, %cst_327 {dimension_numbers = #tpu.dot_dimension_numbers<[1], [0], [0], [1], [0, 0, 1, 1], [], []>} : vector<15x64xf32>, vector<64x64xf32>, vector<15x64xf32> -> vector<15x64xf32>
    %599 = arith.mulf %598, %81 : vector<15x64xf32>
    %600 = arith.addf %597, %599 : vector<15x64xf32>
    %601 = vector.extract_strided_slice %600 {offsets = [0, 0], sizes = [1, 32], strides = [1, 1]} : vector<15x64xf32> to vector<1x32xf32>
    %602 = vector.extract_strided_slice %600 {offsets = [0, 32], sizes = [15, 32], strides = [1, 1]} : vector<15x64xf32> to vector<15x32xf32>
    %603 = vector.extract_strided_slice %595 {offsets = [0, 64], sizes = [15, 32], strides = [1, 1]} : vector<15x96xf32> to vector<15x32xf32>
    %cst_328 = arith.constant 0.000000e+00 : f32
    %604 = vector.broadcast %cst_328 : f32 to vector<1x32xf32>
    %c3_329 = arith.constant 3 : index
    %c0_330 = arith.constant 0 : index
    %c0_331 = arith.constant 0 : index
    %605 = vector.load %arg17[%c3_329, %c0_330, %c0_331] : memref<4x1x32xf32, #tpu.memory_space<vmem>>, vector<1x1x32xf32>
    %606 = vector.shape_cast %605 : vector<1x1x32xf32> to vector<1x32xf32>
    %607 = arith.addf %604, %606 : vector<1x32xf32>
    %608 = vector.extract_strided_slice %601 {offsets = [0, 0], sizes = [1, 8], strides = [1, 1]} : vector<1x32xf32> to vector<1x8xf32>
    %609 = vector.extract_strided_slice %602 {offsets = [0, 0], sizes = [15, 8], strides = [1, 1]} : vector<15x32xf32> to vector<15x8xf32>
    %610 = vector.extract_strided_slice %603 {offsets = [0, 0], sizes = [15, 8], strides = [1, 1]} : vector<15x32xf32> to vector<15x8xf32>
    %cst_332 = arith.constant dense<0.000000e+00> : vector<1x15xf32>
    %611 = tpu.matmul %608, %609, %cst_332 {dimension_numbers = #tpu.dot_dimension_numbers<[1], [1], [0], [0], [0, 0, 1, 0], [], []>} : vector<1x8xf32>, vector<15x8xf32>, vector<1x15xf32> -> vector<1x15xf32>
    %cst_333 = arith.constant dense<0xFF800000> : vector<1xf32>
    %612 = vector.multi_reduction <maximumf>, %611, %cst_333 [1] : vector<1x15xf32> to vector<1xf32>
    %613 = vector.shape_cast %612 : vector<1xf32> to vector<1x1xf32>
    %614 = vector.broadcast %613 : vector<1x1xf32> to vector<1x15xf32>
    %615 = arith.subf %611, %614 : vector<1x15xf32>
    %616 = math.exp %615 : vector<1x15xf32>
    %cst_334 = arith.constant dense<0.000000e+00> : vector<1xf32>
    %617 = vector.multi_reduction <add>, %616, %cst_334 [1] : vector<1x15xf32> to vector<1xf32>
    %618 = vector.shape_cast %617 : vector<1xf32> to vector<1x1xf32>
    %cst_335 = arith.constant 1.000000e+00 : f32
    %619 = vector.broadcast %cst_335 : f32 to vector<1x1xf32>
    %620 = arith.divf %619, %618 : vector<1x1xf32>
    %621 = vector.broadcast %620 : vector<1x1xf32> to vector<1x15xf32>
    %622 = arith.mulf %616, %621 : vector<1x15xf32>
    %cst_336 = arith.constant dense<0.000000e+00> : vector<1x8xf32>
    %623 = tpu.matmul %622, %610, %cst_336 {dimension_numbers = #tpu.dot_dimension_numbers<[1], [0], [0], [1], [0, 0, 1, 1], [], []>} : vector<1x15xf32>, vector<15x8xf32>, vector<1x8xf32> -> vector<1x8xf32>
    %624 = vector.extract_strided_slice %588 {offsets = [0, 0], sizes = [8, 32], strides = [1, 1]} : vector<32x32xf32> to vector<8x32xf32>
    %cst_337 = arith.constant dense<0.000000e+00> : vector<1x32xf32>
    %625 = tpu.matmul %623, %624, %cst_337 {dimension_numbers = #tpu.dot_dimension_numbers<[1], [0], [0], [1], [0, 0, 1, 1], [], []>} : vector<1x8xf32>, vector<8x32xf32>, vector<1x32xf32> -> vector<1x32xf32>
    %626 = arith.addf %607, %625 : vector<1x32xf32>
    %627 = vector.extract_strided_slice %601 {offsets = [0, 8], sizes = [1, 8], strides = [1, 1]} : vector<1x32xf32> to vector<1x8xf32>
    %628 = vector.extract_strided_slice %602 {offsets = [0, 8], sizes = [15, 8], strides = [1, 1]} : vector<15x32xf32> to vector<15x8xf32>
    %629 = vector.extract_strided_slice %603 {offsets = [0, 8], sizes = [15, 8], strides = [1, 1]} : vector<15x32xf32> to vector<15x8xf32>
    %cst_338 = arith.constant dense<0.000000e+00> : vector<1x15xf32>
    %630 = tpu.matmul %627, %628, %cst_338 {dimension_numbers = #tpu.dot_dimension_numbers<[1], [1], [0], [0], [0, 0, 1, 0], [], []>} : vector<1x8xf32>, vector<15x8xf32>, vector<1x15xf32> -> vector<1x15xf32>
    %cst_339 = arith.constant dense<0xFF800000> : vector<1xf32>
    %631 = vector.multi_reduction <maximumf>, %630, %cst_339 [1] : vector<1x15xf32> to vector<1xf32>
    %632 = vector.shape_cast %631 : vector<1xf32> to vector<1x1xf32>
    %633 = vector.broadcast %632 : vector<1x1xf32> to vector<1x15xf32>
    %634 = arith.subf %630, %633 : vector<1x15xf32>
    %635 = math.exp %634 : vector<1x15xf32>
    %cst_340 = arith.constant dense<0.000000e+00> : vector<1xf32>
    %636 = vector.multi_reduction <add>, %635, %cst_340 [1] : vector<1x15xf32> to vector<1xf32>
    %637 = vector.shape_cast %636 : vector<1xf32> to vector<1x1xf32>
    %cst_341 = arith.constant 1.000000e+00 : f32
    %638 = vector.broadcast %cst_341 : f32 to vector<1x1xf32>
    %639 = arith.divf %638, %637 : vector<1x1xf32>
    %640 = vector.broadcast %639 : vector<1x1xf32> to vector<1x15xf32>
    %641 = arith.mulf %635, %640 : vector<1x15xf32>
    %cst_342 = arith.constant dense<0.000000e+00> : vector<1x8xf32>
    %642 = tpu.matmul %641, %629, %cst_342 {dimension_numbers = #tpu.dot_dimension_numbers<[1], [0], [0], [1], [0, 0, 1, 1], [], []>} : vector<1x15xf32>, vector<15x8xf32>, vector<1x8xf32> -> vector<1x8xf32>
    %643 = vector.extract_strided_slice %588 {offsets = [8, 0], sizes = [8, 32], strides = [1, 1]} : vector<32x32xf32> to vector<8x32xf32>
    %cst_343 = arith.constant dense<0.000000e+00> : vector<1x32xf32>
    %644 = tpu.matmul %642, %643, %cst_343 {dimension_numbers = #tpu.dot_dimension_numbers<[1], [0], [0], [1], [0, 0, 1, 1], [], []>} : vector<1x8xf32>, vector<8x32xf32>, vector<1x32xf32> -> vector<1x32xf32>
    %645 = arith.addf %626, %644 : vector<1x32xf32>
    %646 = vector.extract_strided_slice %601 {offsets = [0, 16], sizes = [1, 8], strides = [1, 1]} : vector<1x32xf32> to vector<1x8xf32>
    %647 = vector.extract_strided_slice %602 {offsets = [0, 16], sizes = [15, 8], strides = [1, 1]} : vector<15x32xf32> to vector<15x8xf32>
    %648 = vector.extract_strided_slice %603 {offsets = [0, 16], sizes = [15, 8], strides = [1, 1]} : vector<15x32xf32> to vector<15x8xf32>
    %cst_344 = arith.constant dense<0.000000e+00> : vector<1x15xf32>
    %649 = tpu.matmul %646, %647, %cst_344 {dimension_numbers = #tpu.dot_dimension_numbers<[1], [1], [0], [0], [0, 0, 1, 0], [], []>} : vector<1x8xf32>, vector<15x8xf32>, vector<1x15xf32> -> vector<1x15xf32>
    %cst_345 = arith.constant dense<0xFF800000> : vector<1xf32>
    %650 = vector.multi_reduction <maximumf>, %649, %cst_345 [1] : vector<1x15xf32> to vector<1xf32>
    %651 = vector.shape_cast %650 : vector<1xf32> to vector<1x1xf32>
    %652 = vector.broadcast %651 : vector<1x1xf32> to vector<1x15xf32>
    %653 = arith.subf %649, %652 : vector<1x15xf32>
    %654 = math.exp %653 : vector<1x15xf32>
    %cst_346 = arith.constant dense<0.000000e+00> : vector<1xf32>
    %655 = vector.multi_reduction <add>, %654, %cst_346 [1] : vector<1x15xf32> to vector<1xf32>
    %656 = vector.shape_cast %655 : vector<1xf32> to vector<1x1xf32>
    %cst_347 = arith.constant 1.000000e+00 : f32
    %657 = vector.broadcast %cst_347 : f32 to vector<1x1xf32>
    %658 = arith.divf %657, %656 : vector<1x1xf32>
    %659 = vector.broadcast %658 : vector<1x1xf32> to vector<1x15xf32>
    %660 = arith.mulf %654, %659 : vector<1x15xf32>
    %cst_348 = arith.constant dense<0.000000e+00> : vector<1x8xf32>
    %661 = tpu.matmul %660, %648, %cst_348 {dimension_numbers = #tpu.dot_dimension_numbers<[1], [0], [0], [1], [0, 0, 1, 1], [], []>} : vector<1x15xf32>, vector<15x8xf32>, vector<1x8xf32> -> vector<1x8xf32>
    %662 = vector.extract_strided_slice %588 {offsets = [16, 0], sizes = [8, 32], strides = [1, 1]} : vector<32x32xf32> to vector<8x32xf32>
    %cst_349 = arith.constant dense<0.000000e+00> : vector<1x32xf32>
    %663 = tpu.matmul %661, %662, %cst_349 {dimension_numbers = #tpu.dot_dimension_numbers<[1], [0], [0], [1], [0, 0, 1, 1], [], []>} : vector<1x8xf32>, vector<8x32xf32>, vector<1x32xf32> -> vector<1x32xf32>
    %664 = arith.addf %645, %663 : vector<1x32xf32>
    %665 = vector.extract_strided_slice %601 {offsets = [0, 24], sizes = [1, 8], strides = [1, 1]} : vector<1x32xf32> to vector<1x8xf32>
    %666 = vector.extract_strided_slice %602 {offsets = [0, 24], sizes = [15, 8], strides = [1, 1]} : vector<15x32xf32> to vector<15x8xf32>
    %667 = vector.extract_strided_slice %603 {offsets = [0, 24], sizes = [15, 8], strides = [1, 1]} : vector<15x32xf32> to vector<15x8xf32>
    %cst_350 = arith.constant dense<0.000000e+00> : vector<1x15xf32>
    %668 = tpu.matmul %665, %666, %cst_350 {dimension_numbers = #tpu.dot_dimension_numbers<[1], [1], [0], [0], [0, 0, 1, 0], [], []>} : vector<1x8xf32>, vector<15x8xf32>, vector<1x15xf32> -> vector<1x15xf32>
    %cst_351 = arith.constant dense<0xFF800000> : vector<1xf32>
    %669 = vector.multi_reduction <maximumf>, %668, %cst_351 [1] : vector<1x15xf32> to vector<1xf32>
    %670 = vector.shape_cast %669 : vector<1xf32> to vector<1x1xf32>
    %671 = vector.broadcast %670 : vector<1x1xf32> to vector<1x15xf32>
    %672 = arith.subf %668, %671 : vector<1x15xf32>
    %673 = math.exp %672 : vector<1x15xf32>
    %cst_352 = arith.constant dense<0.000000e+00> : vector<1xf32>
    %674 = vector.multi_reduction <add>, %673, %cst_352 [1] : vector<1x15xf32> to vector<1xf32>
    %675 = vector.shape_cast %674 : vector<1xf32> to vector<1x1xf32>
    %cst_353 = arith.constant 1.000000e+00 : f32
    %676 = vector.broadcast %cst_353 : f32 to vector<1x1xf32>
    %677 = arith.divf %676, %675 : vector<1x1xf32>
    %678 = vector.broadcast %677 : vector<1x1xf32> to vector<1x15xf32>
    %679 = arith.mulf %673, %678 : vector<1x15xf32>
    %cst_354 = arith.constant dense<0.000000e+00> : vector<1x8xf32>
    %680 = tpu.matmul %679, %667, %cst_354 {dimension_numbers = #tpu.dot_dimension_numbers<[1], [0], [0], [1], [0, 0, 1, 1], [], []>} : vector<1x15xf32>, vector<15x8xf32>, vector<1x8xf32> -> vector<1x8xf32>
    %681 = vector.extract_strided_slice %588 {offsets = [24, 0], sizes = [8, 32], strides = [1, 1]} : vector<32x32xf32> to vector<8x32xf32>
    %cst_355 = arith.constant dense<0.000000e+00> : vector<1x32xf32>
    %682 = tpu.matmul %680, %681, %cst_355 {dimension_numbers = #tpu.dot_dimension_numbers<[1], [0], [0], [1], [0, 0, 1, 1], [], []>} : vector<1x8xf32>, vector<8x32xf32>, vector<1x32xf32> -> vector<1x32xf32>
    %683 = arith.addf %664, %682 : vector<1x32xf32>
    %684 = vector.extract_strided_slice %586 {offsets = [0, 0], sizes = [1, 32], strides = [1, 1]} : vector<15x32xf32> to vector<1x32xf32>
    %685 = arith.addf %684, %683 : vector<1x32xf32>
    %c3_356 = arith.constant 3 : index
    %c0_357 = arith.constant 0 : index
    %c0_358 = arith.constant 0 : index
    %686 = vector.load %arg18[%c3_356, %c0_357, %c0_358] : memref<4x1x32xf32, #tpu.memory_space<vmem>>, vector<1x1x32xf32>
    %687 = vector.shape_cast %686 : vector<1x1x32xf32> to vector<1x32xf32>
    %c3_359 = arith.constant 3 : index
    %c0_360 = arith.constant 0 : index
    %c0_361 = arith.constant 0 : index
    %688 = vector.load %arg19[%c3_359, %c0_360, %c0_361] : memref<4x1x32xf32, #tpu.memory_space<vmem>>, vector<1x1x32xf32>
    %689 = vector.shape_cast %688 : vector<1x1x32xf32> to vector<1x32xf32>
    %cst_362 = arith.constant dense<0.000000e+00> : vector<1xf32>
    %690 = vector.multi_reduction <add>, %685, %cst_362 [1] : vector<1x32xf32> to vector<1xf32>
    %691 = vector.shape_cast %690 : vector<1xf32> to vector<1x1xf32>
    %cst_363 = arith.constant 3.200000e+01 : f32
    %692 = vector.broadcast %cst_363 : f32 to vector<1x1xf32>
    %693 = arith.divf %691, %692 : vector<1x1xf32>
    %694 = vector.broadcast %693 : vector<1x1xf32> to vector<1x32xf32>
    %695 = arith.subf %685, %694 : vector<1x32xf32>
    %696 = arith.mulf %695, %695 : vector<1x32xf32>
    %cst_364 = arith.constant dense<0.000000e+00> : vector<1xf32>
    %697 = vector.multi_reduction <add>, %696, %cst_364 [1] : vector<1x32xf32> to vector<1xf32>
    %698 = vector.shape_cast %697 : vector<1xf32> to vector<1x1xf32>
    %cst_365 = arith.constant 3.200000e+01 : f32
    %699 = vector.broadcast %cst_365 : f32 to vector<1x1xf32>
    %700 = arith.divf %698, %699 : vector<1x1xf32>
    %701 = vector.broadcast %693 : vector<1x1xf32> to vector<1x32xf32>
    %702 = arith.subf %685, %701 : vector<1x32xf32>
    %cst_366 = arith.constant 9.99999974E-6 : f32
    %703 = vector.broadcast %cst_366 : f32 to vector<1x1xf32>
    %704 = arith.addf %700, %703 : vector<1x1xf32>
    %705 = math.rsqrt %704 : vector<1x1xf32>
    %706 = vector.broadcast %705 : vector<1x1xf32> to vector<1x32xf32>
    %707 = arith.mulf %702, %706 : vector<1x32xf32>
    %708 = arith.mulf %707, %687 : vector<1x32xf32>
    %709 = arith.addf %708, %689 : vector<1x32xf32>
    %c3_367 = arith.constant 3 : index
    %c0_368 = arith.constant 0 : index
    %c0_369 = arith.constant 0 : index
    %710 = vector.load %arg20[%c3_367, %c0_368, %c0_369] : memref<4x32x128xf32, #tpu.memory_space<vmem>>, vector<1x32x128xf32>
    %711 = vector.shape_cast %710 : vector<1x32x128xf32> to vector<32x128xf32>
    %cst_370 = arith.constant dense<0.000000e+00> : vector<1x128xf32>
    %712 = tpu.matmul %709, %711, %cst_370 {dimension_numbers = #tpu.dot_dimension_numbers<[1], [0], [0], [1], [0, 0, 1, 1], [], []>} : vector<1x32xf32>, vector<32x128xf32>, vector<1x128xf32> -> vector<1x128xf32>
    %c3_371 = arith.constant 3 : index
    %c0_372 = arith.constant 0 : index
    %c0_373 = arith.constant 0 : index
    %713 = vector.load %arg21[%c3_371, %c0_372, %c0_373] : memref<4x1x128xf32, #tpu.memory_space<vmem>>, vector<1x1x128xf32>
    %714 = vector.shape_cast %713 : vector<1x1x128xf32> to vector<1x128xf32>
    %715 = arith.addf %712, %714 : vector<1x128xf32>
    %cst_374 = arith.constant 0.000000e+00 : f32
    %716 = vector.broadcast %cst_374 : f32 to vector<1x128xf32>
    %717 = arith.maximumf %715, %716 : vector<1x128xf32>
    %c3_375 = arith.constant 3 : index
    %c0_376 = arith.constant 0 : index
    %c0_377 = arith.constant 0 : index
    %718 = vector.load %arg22[%c3_375, %c0_376, %c0_377] : memref<4x128x32xf32, #tpu.memory_space<vmem>>, vector<1x128x32xf32>
    %719 = vector.shape_cast %718 : vector<1x128x32xf32> to vector<128x32xf32>
    %cst_378 = arith.constant dense<0.000000e+00> : vector<1x32xf32>
    %720 = tpu.matmul %717, %719, %cst_378 {dimension_numbers = #tpu.dot_dimension_numbers<[1], [0], [0], [1], [0, 0, 1, 1], [], []>} : vector<1x128xf32>, vector<128x32xf32>, vector<1x32xf32> -> vector<1x32xf32>
    %c3_379 = arith.constant 3 : index
    %c0_380 = arith.constant 0 : index
    %c0_381 = arith.constant 0 : index
    %721 = vector.load %arg23[%c3_379, %c0_380, %c0_381] : memref<4x1x32xf32, #tpu.memory_space<vmem>>, vector<1x1x32xf32>
    %722 = vector.shape_cast %721 : vector<1x1x32xf32> to vector<1x32xf32>
    %723 = arith.addf %720, %722 : vector<1x32xf32>
    %724 = arith.addf %709, %723 : vector<1x32xf32>
    %c3_382 = arith.constant 3 : index
    %c0_383 = arith.constant 0 : index
    %c0_384 = arith.constant 0 : index
    %725 = vector.load %arg24[%c3_382, %c0_383, %c0_384] : memref<4x1x32xf32, #tpu.memory_space<vmem>>, vector<1x1x32xf32>
    %726 = vector.shape_cast %725 : vector<1x1x32xf32> to vector<1x32xf32>
    %c3_385 = arith.constant 3 : index
    %c0_386 = arith.constant 0 : index
    %c0_387 = arith.constant 0 : index
    %727 = vector.load %arg25[%c3_385, %c0_386, %c0_387] : memref<4x1x32xf32, #tpu.memory_space<vmem>>, vector<1x1x32xf32>
    %728 = vector.shape_cast %727 : vector<1x1x32xf32> to vector<1x32xf32>
    %cst_388 = arith.constant dense<0.000000e+00> : vector<1xf32>
    %729 = vector.multi_reduction <add>, %724, %cst_388 [1] : vector<1x32xf32> to vector<1xf32>
    %730 = vector.shape_cast %729 : vector<1xf32> to vector<1x1xf32>
    %cst_389 = arith.constant 3.200000e+01 : f32
    %731 = vector.broadcast %cst_389 : f32 to vector<1x1xf32>
    %732 = arith.divf %730, %731 : vector<1x1xf32>
    %733 = vector.broadcast %732 : vector<1x1xf32> to vector<1x32xf32>
    %734 = arith.subf %724, %733 : vector<1x32xf32>
    %735 = arith.mulf %734, %734 : vector<1x32xf32>
    %cst_390 = arith.constant dense<0.000000e+00> : vector<1xf32>
    %736 = vector.multi_reduction <add>, %735, %cst_390 [1] : vector<1x32xf32> to vector<1xf32>
    %737 = vector.shape_cast %736 : vector<1xf32> to vector<1x1xf32>
    %cst_391 = arith.constant 3.200000e+01 : f32
    %738 = vector.broadcast %cst_391 : f32 to vector<1x1xf32>
    %739 = arith.divf %737, %738 : vector<1x1xf32>
    %740 = vector.broadcast %732 : vector<1x1xf32> to vector<1x32xf32>
    %741 = arith.subf %724, %740 : vector<1x32xf32>
    %cst_392 = arith.constant 9.99999974E-6 : f32
    %742 = vector.broadcast %cst_392 : f32 to vector<1x1xf32>
    %743 = arith.addf %739, %742 : vector<1x1xf32>
    %744 = math.rsqrt %743 : vector<1x1xf32>
    %745 = vector.broadcast %744 : vector<1x1xf32> to vector<1x32xf32>
    %746 = arith.mulf %741, %745 : vector<1x32xf32>
    %747 = arith.mulf %746, %726 : vector<1x32xf32>
    %748 = arith.addf %747, %728 : vector<1x32xf32>
    %c0_393 = arith.constant 0 : index
    %c0_394 = arith.constant 0 : index
    %749 = vector.load %arg26[%c0_393, %c0_394] : memref<32x128xf32, #tpu.memory_space<vmem>>, vector<32x128xf32>
    %cst_395 = arith.constant dense<0.000000e+00> : vector<1x128xf32>
    %750 = tpu.matmul %748, %749, %cst_395 {dimension_numbers = #tpu.dot_dimension_numbers<[1], [0], [0], [1], [0, 0, 1, 1], [], []>} : vector<1x32xf32>, vector<32x128xf32>, vector<1x128xf32> -> vector<1x128xf32>
    %c0_396 = arith.constant 0 : index
    %c0_397 = arith.constant 0 : index
    %751 = vector.load %arg27[%c0_396, %c0_397] : memref<1x128xf32, #tpu.memory_space<vmem>>, vector<1x128xf32>
    %752 = arith.addf %750, %751 : vector<1x128xf32>
    %c0_398 = arith.constant 0 : index
    %c0_399 = arith.constant 0 : index
    %c0_400 = arith.constant 0 : index
    %753 = vector.load %arg28[%c0_398, %c0_399, %c0_400] : memref<1x1x128xf32, #tpu.memory_space<vmem>>, vector<1x1x128xf32>
    %754 = vector.shape_cast %753 : vector<1x1x128xf32> to vector<1x128xf32>
    %755 = vector.shape_cast %752 : vector<1x128xf32> to vector<1x1x128xf32>
    tpu.vector_store %arg28[%c0_398, %c0_399, %c0_400], %755 {strides = array<i32>} : memref<1x1x128xf32, #tpu.memory_space<vmem>>, vector<1x1x128xf32>,
    return
  }
  func.func @transform_0(%arg0: i32) -> (i32, i32, i32) {
    %c0_i32 = arith.constant 0 : i32
    %c0_i32_0 = arith.constant 0 : i32
    %c0_i32_1 = arith.constant 0 : i32
    return %arg0, %c0_i32, %c0_i32_0 : i32, i32, i32
  }
  func.func @transform_1(%arg0: i32) -> (i32, i32, i32) {
    %c0_i32 = arith.constant 0 : i32
    %c0_i32_0 = arith.constant 0 : i32
    %c0_i32_1 = arith.constant 0 : i32
    %c0_i32_2 = arith.constant 0 : i32
    return %c0_i32, %c0_i32_0, %c0_i32_1 : i32, i32, i32
  }
  func.func @transform_2(%arg0: i32) -> (i32, i32) {
    %c0_i32 = arith.constant 0 : i32
    %c0_i32_0 = arith.constant 0 : i32
    %c0_i32_1 = arith.constant 0 : i32
    return %c0_i32, %c0_i32_0 : i32, i32
  }
  func.func @transform_3(%arg0: i32) -> (i32, i32) {
    %c0_i32 = arith.constant 0 : i32
    %c0_i32_0 = arith.constant 0 : i32
    %c0_i32_1 = arith.constant 0 : i32
    return %c0_i32, %c0_i32_0 : i32, i32
  }
  func.func @transform_4(%arg0: i32) -> (i32, i32) {
    %c0_i32 = arith.constant 0 : i32
    %c0_i32_0 = arith.constant 0 : i32
    %c0_i32_1 = arith.constant 0 : i32
    return %c0_i32, %c0_i32_0 : i32, i32
  }
  func.func @transform_5(%arg0: i32) -> (i32, i32, i32) {
    %c0_i32 = arith.constant 0 : i32
    %c0_i32_0 = arith.constant 0 : i32
    %c0_i32_1 = arith.constant 0 : i32
    %c0_i32_2 = arith.constant 0 : i32
    return %c0_i32, %c0_i32_0, %c0_i32_1 : i32, i32, i32
  }
  func.func @transform_6(%arg0: i32) -> (i32, i32) {
    %c0_i32 = arith.constant 0 : i32
    %c0_i32_0 = arith.constant 0 : i32
    %c0_i32_1 = arith.constant 0 : i32
    return %c0_i32, %c0_i32_0 : i32, i32
  }
  func.func @transform_7(%arg0: i32) -> (i32, i32) {
    %c0_i32 = arith.constant 0 : i32
    %c0_i32_0 = arith.constant 0 : i32
    %c0_i32_1 = arith.constant 0 : i32
    return %c0_i32, %c0_i32_0 : i32, i32
  }
  func.func @transform_8(%arg0: i32) -> (i32, i32) {
    %c0_i32 = arith.constant 0 : i32
    %c0_i32_0 = arith.constant 0 : i32
    %c0_i32_1 = arith.constant 0 : i32
    return %c0_i32, %c0_i32_0 : i32, i32
  }
  func.func @transform_9(%arg0: i32) -> (i32, i32) {
    %c0_i32 = arith.constant 0 : i32
    %c0_i32_0 = arith.constant 0 : i32
    %c0_i32_1 = arith.constant 0 : i32
    return %c0_i32, %c0_i32_0 : i32, i32
  }
  func.func @transform_10(%arg0: i32) -> (i32, i32) {
    %c0_i32 = arith.constant 0 : i32
    %c0_i32_0 = arith.constant 0 : i32
    %c0_i32_1 = arith.constant 0 : i32
    return %c0_i32, %c0_i32_0 : i32, i32
  }
  func.func @transform_11(%arg0: i32) -> (i32, i32) {
    %c0_i32 = arith.constant 0 : i32
    %c0_i32_0 = arith.constant 0 : i32
    %c0_i32_1 = arith.constant 0 : i32
    return %c0_i32, %c0_i32_0 : i32, i32
  }
  func.func @transform_12(%arg0: i32) -> (i32, i32) {
    %c0_i32 = arith.constant 0 : i32
    %c0_i32_0 = arith.constant 0 : i32
    %c0_i32_1 = arith.constant 0 : i32
    return %c0_i32, %c0_i32_0 : i32, i32
  }
  func.func @transform_13(%arg0: i32) -> (i32, i32, i32) {
    %c0_i32 = arith.constant 0 : i32
    %c0_i32_0 = arith.constant 0 : i32
    %c0_i32_1 = arith.constant 0 : i32
    %c0_i32_2 = arith.constant 0 : i32
    return %c0_i32, %c0_i32_0, %c0_i32_1 : i32, i32, i32
  }
  func.func @transform_14(%arg0: i32) -> (i32, i32, i32) {
    %c0_i32 = arith.constant 0 : i32
    %c0_i32_0 = arith.constant 0 : i32
    %c0_i32_1 = arith.constant 0 : i32
    %c0_i32_2 = arith.constant 0 : i32
    return %c0_i32, %c0_i32_0, %c0_i32_1 : i32, i32, i32
  }
  func.func @transform_15(%arg0: i32) -> (i32, i32, i32) {
    %c0_i32 = arith.constant 0 : i32
    %c0_i32_0 = arith.constant 0 : i32
    %c0_i32_1 = arith.constant 0 : i32
    %c0_i32_2 = arith.constant 0 : i32
    return %c0_i32, %c0_i32_0, %c0_i32_1 : i32, i32, i32
  }
  func.func @transform_16(%arg0: i32) -> (i32, i32, i32) {
    %c0_i32 = arith.constant 0 : i32
    %c0_i32_0 = arith.constant 0 : i32
    %c0_i32_1 = arith.constant 0 : i32
    %c0_i32_2 = arith.constant 0 : i32
    return %c0_i32, %c0_i32_0, %c0_i32_1 : i32, i32, i32
  }
  func.func @transform_17(%arg0: i32) -> (i32, i32, i32) {
    %c0_i32 = arith.constant 0 : i32
    %c0_i32_0 = arith.constant 0 : i32
    %c0_i32_1 = arith.constant 0 : i32
    %c0_i32_2 = arith.constant 0 : i32
    return %c0_i32, %c0_i32_0, %c0_i32_1 : i32, i32, i32
  }
  func.func @transform_18(%arg0: i32) -> (i32, i32, i32) {
    %c0_i32 = arith.constant 0 : i32
    %c0_i32_0 = arith.constant 0 : i32
    %c0_i32_1 = arith.constant 0 : i32
    %c0_i32_2 = arith.constant 0 : i32
    return %c0_i32, %c0_i32_0, %c0_i32_1 : i32, i32, i32
  }
  func.func @transform_19(%arg0: i32) -> (i32, i32, i32) {
    %c0_i32 = arith.constant 0 : i32
    %c0_i32_0 = arith.constant 0 : i32
    %c0_i32_1 = arith.constant 0 : i32
    %c0_i32_2 = arith.constant 0 : i32
    return %c0_i32, %c0_i32_0, %c0_i32_1 : i32, i32, i32
  }
  func.func @transform_20(%arg0: i32) -> (i32, i32, i32) {
    %c0_i32 = arith.constant 0 : i32
    %c0_i32_0 = arith.constant 0 : i32
    %c0_i32_1 = arith.constant 0 : i32
    %c0_i32_2 = arith.constant 0 : i32
    return %c0_i32, %c0_i32_0, %c0_i32_1 : i32, i32, i32
  }
  func.func @transform_21(%arg0: i32) -> (i32, i32, i32) {
    %c0_i32 = arith.constant 0 : i32
    %c0_i32_0 = arith.constant 0 : i32
    %c0_i32_1 = arith.constant 0 : i32
    %c0_i32_2 = arith.constant 0 : i32
    return %c0_i32, %c0_i32_0, %c0_i32_1 : i32, i32, i32
  }
  func.func @transform_22(%arg0: i32) -> (i32, i32, i32) {
    %c0_i32 = arith.constant 0 : i32
    %c0_i32_0 = arith.constant 0 : i32
    %c0_i32_1 = arith.constant 0 : i32
    %c0_i32_2 = arith.constant 0 : i32
    return %c0_i32, %c0_i32_0, %c0_i32_1 : i32, i32, i32
  }
  func.func @transform_23(%arg0: i32) -> (i32, i32, i32) {
    %c0_i32 = arith.constant 0 : i32
    %c0_i32_0 = arith.constant 0 : i32
    %c0_i32_1 = arith.constant 0 : i32
    %c0_i32_2 = arith.constant 0 : i32
    return %c0_i32, %c0_i32_0, %c0_i32_1 : i32, i32, i32
  }
  func.func @transform_24(%arg0: i32) -> (i32, i32, i32) {
    %c0_i32 = arith.constant 0 : i32
    %c0_i32_0 = arith.constant 0 : i32
    %c0_i32_1 = arith.constant 0 : i32
    %c0_i32_2 = arith.constant 0 : i32
    return %c0_i32, %c0_i32_0, %c0_i32_1 : i32, i32, i32
  }
  func.func @transform_25(%arg0: i32) -> (i32, i32) {
    %c0_i32 = arith.constant 0 : i32
    %c0_i32_0 = arith.constant 0 : i32
    %c0_i32_1 = arith.constant 0 : i32
    return %c0_i32, %c0_i32_0 : i32, i32
  }
  func.func @transform_26(%arg0: i32) -> (i32, i32) {
    %c0_i32 = arith.constant 0 : i32
    %c0_i32_0 = arith.constant 0 : i32
    %c0_i32_1 = arith.constant 0 : i32
    return %c0_i32, %c0_i32_0 : i32, i32
  }
  func.func @transform_27(%arg0: i32) -> (i32, i32, i32) {
    %c0_i32 = arith.constant 0 : i32
    %c0_i32_0 = arith.constant 0 : i32
    %c0_i32_1 = arith.constant 0 : i32
    return %arg0, %c0_i32, %c0_i32_0 : i32, i32, i32
  }
}

</mosaic_0001>

<bundles_post_ra>
// kernel: har_transformer_forward.1
= control target key start
LH: loop header
LB: loop body
LE: loop exit
PB: predicated region body
PF: predicated region fallthrough
CT: control target
= control target key end

     0   :  { %s6920_s0 = inlined_call_operand.vmem [shape: f32[2,16,6], index: 0, kind: input, shape index: {}]   ;;  %s6921_s1 = inlined_call_operand.vmem [shape: f32[5,6,32], index: 1, kind: input, shape index: {}]   ;;  %s6922_s2 = inlined_call_operand.vmem [shape: f32[1,32], index: 2, kind: input, shape index: {}]   ;;  %s6923_s3 = inlined_call_operand.vmem [shape: f32[1,32], index: 3, kind: input, shape index: {}]   ;;  %s6924_s4 = inlined_call_operand.vmem [shape: f32[1,32], index: 4, kind: input, shape index: {}]   ;;  %s6925_s5 = inlined_call_operand.vmem [shape: f32[3,32,32], index: 5, kind: input, shape index: {}]   ;;  %s6926_s6 = inlined_call_operand.vmem [shape: f32[1,32], index: 6, kind: input, shape index: {}]   ;;  %s6927_s7 = inlined_call_operand.vmem [shape: f32[1,32], index: 7, kind: input, shape index: {}]   ;;  %s6928_s8 = inlined_call_operand.vmem [shape: f32[1,32], index: 8, kind: input, shape index: {}]   ;;  %s6929_s9 = inlined_call_operand.vmem [shape: f32[1,32], index: 9, kind: input, shape index: {}]   ;;  %s6930_s10 = inlined_call_operand.vmem [shape: f32[15,64], index: 10, kind: input, shape index: {}]   ;;  %s6931_s11 = inlined_call_operand.vmem [shape: f32[15,64], index: 11, kind: input, shape index: {}]   ;;  %s6932_s12 = inlined_call_operand.vmem [shape: f32[64,64], index: 12, kind: input, shape index: {}]   ;;  %s6933_s13 = inlined_call_operand.vmem [shape: f32[4,32,96], index: 13, kind: input, shape index: {}]   ;;  %s6934_s14 = inlined_call_operand.vmem [shape: f32[4,1,96], index: 14, kind: input, shape index: {}]   ;;  %s6935_s15 = inlined_call_operand.vmem [shape: f32[4,32,32], index: 15, kind: input, shape index: {}]   ;;  %s6936_s16 = inlined_call_operand.vmem [shape: f32[4,1,32], index: 16, kind: input, shape index: {}]   ;;  %s6937_s17 = inlined_call_operand.vmem [shape: f32[4,1,32], index: 17, kind: input, shape index: {}]   ;;  %s6938_s18 = inlined_call_operand.vmem [shape: f32[4,1,32], index: 18, kind: input, shape index: {}]   ;;  %s6939_s19 = inlined_call_operand.vmem [shape: f32[4,32,128], index: 19, kind: input, shape index: {}]   ;;  %s6940_s20 = inlined_call_operand.vmem [shape: f32[4,1,128], index: 20, kind: input, shape index: {}]   ;;  %s6941_s21 = inlined_call_operand.vmem [shape: f32[4,128,32], index: 21, kind: input, shape index: {}]   ;;  %s6942_s22 = inlined_call_operand.vmem [shape: f32[4,1,32], index: 22, kind: input, shape index: {}]   ;;  %s6943_s23 = inlined_call_operand.vmem [shape: f32[4,1,32], index: 23, kind: input, shape index: {}]   ;;  %s6944_s24 = inlined_call_operand.vmem [shape: f32[4,1,32], index: 24, kind: input, shape index: {}]   ;;  %s6945_s25 = inlined_call_operand.vmem [shape: f32[32,128], index: 25, kind: input, shape index: {}]   ;;  %s6946_s26 = inlined_call_operand.vmem [shape: f32[1,128], index: 26, kind: input, shape index: {}]   ;;  %s6947_s27 = inlined_call_operand.hbm [shape: f32[2,1,128], index: 27, kind: output, shape index: {}]  }
   0x1   :  { %6998 = sst [smem:[#allocation17_spill]] %s6920_s0 }
   0x2   :  { %6999 = sst [smem:[#allocation18_spill]] %s6921_s1 }
   0x3   :  { %7000 = sst [smem:[#allocation19_spill]] %s6922_s2 }
   0x4   :  { %7001 = sst [smem:[#allocation20_spill]] %s6923_s3 }
   0x5   :  { %7002 = sst [smem:[#allocation21_spill]] %s6924_s4 }
   0x6   :  { %7003 = sst [smem:[#allocation22_spill]] %s6925_s5 }
   0x7   :  { %7004 = sst [smem:[#allocation23_spill]] %s6926_s6 }
   0x8   :  { %7005 = sst [smem:[#allocation24_spill]] %s6927_s7 }
   0x9   :  { %7006 = sst [smem:[#allocation25_spill]] %s6928_s8 }
   0xa   :  { %7007 = sst [smem:[#allocation26_spill]] %s6929_s9 }
   0xb   :  { %7008 = sst [smem:[#allocation27_spill]] %s6930_s10 }
   0xc   :  { %7009 = sst [smem:[#allocation28_spill]] %s6931_s11 }
   0xd   :  { %7010 = sst [smem:[#allocation29_spill]] %s6936_s16 }
   0xe   :  { %7011 = sst [smem:[#allocation30_spill]] %s6945_s25 }
   0xf   :  { %7012 = sst [smem:[#allocation31_spill]] %s6946_s26 }
  0x10   :  { %7013 = sst [smem:[#allocation32_spill]] %s6947_s27 }
  0x11   :  { %32 = vsyncpa [#allocation6], 0 }
  0x12   :  { %34 = vsyncpa [#allocation6 + $0x1], 0  ;;  %s5459_s7 = smov 0   ;;  %s5461_s4 = smov 0  }
  0x13   :  { %s5463_s8 = smov 0   ;;  %s5465_s30 = smov 0  }
  0x14 LB: > { %7014 = sst [smem:[#allocation8_spill]] %s5292_s7  ;;  %s5480_s9 = sadd.s32 4294967295, %s5304_s30   ;;  %s5304_s30 = sphi %s5465_s30, %s7075_s30   ;;  %s5300_s8 = sphi %s5463_s8, %s7078_s8   ;;  %s5296_s4 = sphi %s5461_s4, %s7077_s4   ;;  %s5292_s7 = sphi %s5459_s7, %s7076_s7  }
  0x15   : > { %7015 = sst [smem:[#allocation9_spill]] %s5296_s4  ;;  %s4682_s5 = sadd.s32 4294967294, %s5304_s30  }
  0x16   : > { %7016 = sst [smem:[#allocation10_spill]] %s5300_s8  ;;  %s5484_s28 = sadd.s32 1, %s5304_s30  }
  0x17   : > { %7017 = sst [smem:[#allocation11_spill]] %s5304_s30  ;;  %s619_s0 = sadd.s32 1, %s5300_s8 }
  0x18   : > { %7018 = sst [smem:[#allocation12_spill]] %s5480_s9  ;;  %s616_s10 = ssub.s32 %s5304_s30, %s5484_s28 }
  0x19   : > { %7019 = sst [smem:[#allocation13_spill]] %s5484_s28  ;;  %p629_p0 = scmp.ne.s32.totalorder %s5300_s8, %s5296_s4 }
  0x1a   : > { %p617_p1 = scmp.eq.s32.totalorder %s616_s10, 0  ;;  %p630_p2 = scmp.eq.s32.totalorder %s5480_s9, 1 }
  0x1b   : > { %p635_p3 = scmp.ne.s32.totalorder %s5296_s4, %s5292_s7  ;;  %p636_p4 = scmp.eq.s32.totalorder %s4682_s5, 1 }
  0x1c   : > { %s5495_s29 = scalar_select %p617_p1, %s5300_s8, %s619_s0  }
  0x1d   : > { %p5497_p5 = por %p630_p2, %p629_p0  ;;  %p5501_p6 = por %p636_p4, %p635_p3 }
  0x1e   : > { %7020 = sst [smem:[#allocation14_spill]] %s5495_s29  ;;  %p4685_p7 = scmp.ge.s32.totalorder %s5304_s30, 1 }
  0x1f   : > { %s7021_s1 = scalar_select %p5497_p5, 1, 0 }
  0x20   : > { %s7023_s6 = scalar_select %p5501_p6, 1, 0 }
  0x21   : > { %7022 = sst [smem:[#allocation15_spill]] %s7021_s1  ;;  %p740_p8 = scmp.lt.s32.totalorder %s5304_s30, 3 }
  0x22   : > { %7024 = sst [smem:[#allocation16_spill]] %s7023_s6 }
  0x23   : > { %p741_p9 = pnand %p4685_p7, %p740_p8 }
  0x24   : > { %s7025_s3 = sld [smem:[#allocation18_spill]] (!%p741_p9)  ;;  %p811_p10 = scmp.lt.s32.totalorder (!%p741_p9), %s5480_s9, 1 }
  0x25   : > { %744 = sbr.rel (%p741_p9) target bundleno = 10193 (0x27d1), region = 128  ;;  %s7026_s6 = sld [smem:[#allocation17_spill]] (!%p741_p9) }
  0x26   : > { %s7027_s28 = sld [smem:[#allocation22_spill]] (!%p741_p9)  ;;  %s6977_s0 = smov (!%p741_p9), 88  }
  0x27   : > { %s7028_s11 = sld [smem:[#allocation19_spill]] (!%p741_p9)  ;;  %s6979_s10 = smov (!%p741_p9), 96  }
  0x28   : > { %s7031_s2 = sld [smem:[#allocation26_spill]] (!%p741_p9)  ;;  %s6963_s5 = smov (!%p741_p9), 104  }
  0x29   : > { %s6971_s30 = smov (!%p741_p9), 112   ;;  %s7038_s16 = sld [smem:[#allocation29_spill]] (!%p741_p9) }
  0x2a   : > { %v831_v0 = vld [vmem:[%s7025_s3] sm:$0x3f]  ;;  %vm838_vm0 = vcmask 1045504   ;;  %v4691_v1 = vld [vmem:[%s7025_s3 + $0x8] sm:$0x3f]  ;;  %vm816_vm1 = vcmask 40960  }
  0x2b   : > { %4688 = vmatpush.msk.msra.mxu0 %vm838_vm0, %v831_v0  ;;  %4988 = vmatpush.msk.msra.mxu2 %vm838_vm0, %v4691_v1  ;;  %v4695_v2 = vld [vmem:[%s7025_s3 + $0x10] sm:$0x3f]  ;;  %s812_s8 = scalar_select %p811_p10, %s5480_s9, 1  ;;  %v5306_v3 = vmov 0.0   ;;  %v4699_v4 = vld [vmem:[%s7025_s3 + $0x18] sm:$0x3f] }
  0x2c   : > { %817 = vst.msk [vmem:[#allocation2] sm:$0x1] %vm816_vm1, %v5306_v3  ;;  %4692 = vmatpush.msk.msra.mxu1 %vm838_vm0, %v4691_v1  ;;  %v4703_v5 = vld [vmem:[%s7025_s3 + $0x20] sm:$0x3f]  ;;  %vm821_vm2 = vcmask 48128   ;;  %vm6982_vm3 = vcmask 253952  }
  0x2d   : > { %4696 = vmatpush.msk.msrb.mxu2 %vm838_vm0, %v4695_v2  ;;  %818 = vst.msk [vmem:[#allocation2 + $0x11] sm:$0x1] %vm816_vm1, %v5306_v3  ;;  %s4987_s29 = sshll.u32 %s812_s8, 4  ;;  %4704 = vmatpush.msk.msrb.mxu0 %vm838_vm0, %v4703_v5  ;;  %v1050_v18 = vld [vmem:[%s7027_s28 + $0x18] sm:$0xff]  ;;  %v1049_v20 = vld [vmem:[%s7027_s28 + $0x10] sm:$0xff]  ;;  %v1048_v23 = vld [vmem:[%s7027_s28 + $0x8] sm:$0xff] }
  0x2e   : > { %4700 = vmatpush.msk.msrb.mxu1 %vm838_vm0, %v4699_v4  ;;  %s815_s7 = scalar_lea.vmem %s7026_s6, %s4987_s29  ;;  %v4712_v19 = vld [vmem:[%s7027_s28 + $0x38] sm:$0xff]  ;;  %1034 = vst.msk [vmem:[#allocation3] sm:$0x1] %vm6982_vm3, %v5306_v3  ;;  %v4711_v21 = vld [vmem:[%s7027_s28 + $0x30] sm:$0xff]  ;;  %v4710_v24 = vld [vmem:[%s7027_s28 + $0x28] sm:$0xff]  ;;  %s7029_s29 = sld [smem:[#allocation20_spill]] }
  0x2f   : > { %v819_v6 = vld [vmem:[%s815_s7] sm:$0xff]  ;;  %v820_v7 = vld [vmem:[%s815_s7 + $0x8] sm:$0xff]  ;;  %1035 = vst.msk [vmem:[#allocation3 + $0xf] sm:$0x1] %vm6982_vm3, %v5306_v3  ;;  %v4718_v27 = vld [vmem:[%s7027_s28 + $0x58] sm:$0xff]  ;;  %s7030_s8 = sld [smem:[#allocation21_spill]] }
  0x30   : > { %822 = vst.msk [vmem:[#allocation2 + $0x1] sm:$0xff] %vm821_vm2, %v819_v6  ;;  %v1047_v25 = vld [vmem:[%s7027_s28] sm:$0xff]  ;;  %v4717_v28 = vld [vmem:[%s7027_s28 + $0x50] sm:$0xff]  ;;  %1145 = vmatpush.msra.mxu3 %v4718_v27  ;;  %v4716_v31 = vld [vmem:[%s7027_s28 + $0x48] sm:$0xff]  ;;  %vm1036_vm4 = vcmask 261120   ;;  %vm1038_vm5 = vcmask 259072  }
  0x31   : > { %823 = vst.msk [vmem:[#allocation2 + $0x9] sm:$0xff] %vm821_vm2, %v820_v7  ;;  %v4709_v26 = vld [vmem:[%s7027_s28 + $0x20] sm:$0xff]  ;;  %v1197_v2 = vld [vmem:[%s6933_s13 + $0x18] sm:$0xff]  ;;  %v1196_v3 = vld [vmem:[%s6933_s13 + $0x10] sm:$0xff]  ;;  %s7033_s3 = sld [smem:[#allocation24_spill]]  ;;  %vm1233_vm6 = vcmask 523264  }
  0x32   : > { %v5041_v30 = vld [vmem:[%s7028_s11] ss:$0 sm:$0xff]  ;;  %1146 = vmatpush.msra.mxu3 %v4717_v28  ;;  %v1195_v4 = vld [vmem:[%s6933_s13 + $0x8] sm:$0xff]  ;;  %s7034_s7 = sld [smem:[#allocation25_spill]]  ;;  %s6975_s11 = smov 120   ;;  %vm1278_vm7 = vcmask 64512  }
  0x33   : > { %v4715_v34 = vld [vmem:[%s7027_s28 + $0x40] sm:$0xff]  ;;  %vm1310_vm8 = vcmask 121856   ;;  %vm1314_vm9 = vcmask 120832   ;;  %vm1373_vm10 = vcmask 1046528   ;;  %s7049_s28 = smov 48   ;;  %s7052_s1 = smov 104  }
  0x34   : > { %1147 = vmatpush.msra.mxu3 %v4716_v31  ;;  %v5042_v44 = vld [vmem:[%s7029_s29] ss:$0 sm:$0xff]  ;;  %s7035_s29 = sld [smem:[#allocation27_spill]]  ;;  %s7054_s26 = smov 40  }
  0x35   : > { %v5043_v46 = vld [vmem:[%s7030_s8] ss:$0 sm:$0xff]  ;;  %s7036_s8 = sld [smem:[#allocation28_spill]]  ;;  %s7055_s27 = smov 48  }
  0x36   : > { %1148 = vmatpush.msra.mxu3 %v4715_v34  ;;  %v1172_v1 = vld [vmem:[%s7031_s2] sm:$0x1]  ;;  %s7032_s2 = sld [smem:[#allocation23_spill]]  ;;  %s7059_s4 = smov 48  }
  0x37   : > { %v829_v8 = vld [vmem:[#allocation2] sm:$0xff]  ;;  %1173 = vst.msk [vmem:[#allocation4] sm:$0x1] %vm6982_vm3, %v1172_v1  ;;  %s7058_s25 = sld [smem:[#allocation29_spill]] }
  0x38   : > { %v867_v9 = vld [vmem:[#allocation2 + $0x1] sm:$0xff]  ;;  %4689 = vmatmul.msk.f32.vlgmr.msra.gmra.mxu0 %vm821_vm2, %v829_v8  ;;  %v868_v10 = vld [vmem:[#allocation2 + $0x9] sm:$0x3f]  ;;  %v5622_v8 = vld [vmem:[%s6932_s12 + $0x38] sm:$0xff] }
  0x39   : > { %4693 = vmatmul.msk.f32.vlgmr.msra.gmra.mxu1 %vm821_vm2, %v867_v9  ;;  %4694 = vmatmul.msk.f32.vlgmr.msra.gmra.mxu2 %vm821_vm2, %v868_v10  ;;  %v830_v11 = vld [vmem:[#allocation2 + $0x8] sm:$0x3f]  ;;  %v1194_v5 = vld [vmem:[%s6933_s13] sm:$0xff]  ;;  %v5627_v9 = vld [vmem:[%s6932_s12 + $0x30] sm:$0xff] }
  0x3a   : > { %v943_v12 = vld [vmem:[#allocation2 + $0x3] sm:$0xff]  ;;  %v944_v15 = vld [vmem:[#allocation2 + $0xb] sm:$0x3f]  ;;  %1069 = vmatpush.msra.mxu1 %v1050_v18  ;;  %1107 = vmatpush.msra.mxu2 %v4712_v19  ;;  %v5045_v18 = vld [vmem:[%s7033_s3] ss:$0 sm:$0xff]  ;;  %s6965_s3 = smov 72  }
  0x3b   : > { %v905_v13 = vld [vmem:[#allocation2 + $0x2] sm:$0xff]  ;;  %v906_v16 = vld [vmem:[#allocation2 + $0xa] sm:$0x3f]  ;;  %1220 = vmatpush.msra.mxu0 %v1197_v2  ;;  %v5654_v19 = vld [vmem:[%s6932_s12 + $0x10] sm:$0xff]  ;;  %s7037_s6 = smov %s7036_s8 }
  0x3c   : > { %v981_v14 = vld [vmem:[#allocation2 + $0x4] sm:$0xff]  ;;  %v982_v17 = vld [vmem:[#allocation2 + $0xc] sm:$0x3f]  ;;  %1070 = vmatpush.msra.mxu1 %v1049_v20  ;;  %1108 = vmatpush.msra.mxu2 %v4711_v21  ;;  %v5044_v7 = vld [vmem:[%s7032_s2] ss:$0 sm:$0xff]  ;;  %s6959_s2 = smov 80  }
  0x3d   : > { %1221 = vmatpush.msra.mxu0 %v1196_v3 }
  0x3e   : > { %1071 = vmatpush.msra.mxu1 %v1048_v23  ;;  %1109 = vmatpush.msra.mxu2 %v4710_v24 }
  0x3f   : > { %1222 = vmatpush.msra.mxu0 %v1195_v4 }
  0x40   : > { %4690 = vmatmul.msk.f32.gmra.mxu0 %vm821_vm2, %v830_v11  ;;  %1072 = vmatpush.msra.mxu1 %v1047_v25  ;;  %v5633_v11 = vld [vmem:[%s6932_s12 + $0x28] sm:$0xff] }
  0x41   : > { %4701 = vmatmul.msk.f32.vlgmr.msrb.gmra.mxu1 %vm821_vm2, %v943_v12  ;;  %4697 = vmatmul.msk.f32.vlgmr.msrb.gmra.mxu2 %vm821_vm2, %v905_v13  ;;  %v5639_v13 = vld [vmem:[%s6932_s12 + $0x20] sm:$0xff] }
  0x42   : > { %1110 = vmatpush.msra.mxu2 %v4709_v26  ;;  %1223 = vmatpush.msra.mxu0 %v1194_v5 }
  0x43   : > { %1248 = vmatpush.msrb.mxu1 %v5622_v8 }
  0x45   : > { %1249 = vmatpush.msrb.mxu1 %v5627_v9 }
  0x47   : > { %1250 = vmatpush.msrb.mxu1 %v5633_v11 }
  0x48   : > { %4705 = vmatmul.msk.f32.vlgmr.msrb.gmra.mxu0 %vm821_vm2, %v981_v14 }
  0x49   : > { %4702 = vmatmul.msk.f32.gmra.mxu1 %vm821_vm2, %v944_v15  ;;  %4698 = vmatmul.msk.f32.gmra.mxu2 %vm821_vm2, %v906_v16  ;;  %v5645_v15 = vld [vmem:[%s6932_s12 + $0x18] sm:$0xff] }
  0x4a   : > { %1251 = vmatpush.msrb.mxu1 %v5639_v13 }
  0x4c   : > { %1252 = vmatpush.msrb.mxu1 %v5645_v15 }
  0x4e   : > { %1253 = vmatpush.msrb.mxu1 %v5654_v19 }
  0x50   : > { %4706 = vmatmul.msk.f32.gmra.mxu0 %vm821_vm2, %v982_v17 }
  0xb5   : > { %v859_v22 = vpop.f32.mrf.mxu0 }
  0xb6   : > { %v897_v29 = vpop.f32.mrf.mxu1  ;;  %v865_v35 = vadd.f32 %v5041_v30, %v859_v22  ;;  %v5046_v22 = vld [vmem:[%s7034_s7] ss:$0 sm:$0xff]  ;;  %s6973_s7 = smov 64  }
  0xb8   : > { %v903_v37 = vadd.f32 %v897_v29, %v865_v35  ;;  %v5674_v35 = vld [vmem:[%s6932_s12 + $0x8] sm:$0xff] }
  0xb9   : > { %1254 = vmatpush.msrb.mxu1 %v5674_v35 }
  0xbc   : > { %v900_v32 = vpop.f32.mrf.mxu2 }
  0xbd   : > { %v862_v33 = vpop.f32.mrf.mxu0 }
  0xbe   : > { %v973_v36 = vpop.f32.mrf.mxu1  ;;  %v866_v41 = vadd.f32 %v5041_v30, %v862_v33 }
  0xc0   : > { %v904_v47 = vadd.f32 %v900_v32, %v866_v41 }
  0xc4   : > { %v935_v38 = vpop.f32.mrf.mxu2 }
  0xc5   : > { %v941_v39 = vadd.f32 %v935_v38, %v903_v37  ;;  %v1011_v40 = vpop.f32.mrf.mxu0  ;;  %v5047_v37 = vld [vmem:[%s6934_s14] ss:$0 sm:$0xff] }
  0xc6   : > { %v976_v49 = vpop.f32.mrf.mxu1 }
  0xc7   : > { %v979_v42 = vadd.f32 %v973_v36, %v941_v39  ;;  %v5680_v36 = vld [vmem:[%s6932_s12] sm:$0xff] }
  0xc8   : > { %1255 = vmatpush.msrb.mxu1 %v5680_v36 }
  0xc9   : > { %v1017_v43 = vadd.f32 %v1011_v40, %v979_v42  ;;  %v1178_v42 = vld [vmem:[%s7035_s29] sm:$0xff] }
  0xcb   : > { %v1019_v45 = vmax.f32 %v1017_v43, 0.0  ;;  %v1180_v43 = vld [vmem:[%s7036_s8] sm:$0xff]  ;;  %s6961_s8 = smov 56  }
  0xcc   : > { %v938_v48 = vpop.f32.mrf.mxu2 }
  0xcd   : > { %v1025_v50 = vmul.f32 %v5042_v44, %v1019_v45  ;;  %v942_v51 = vadd.f32 %v938_v48, %v904_v47  ;;  %v1014_v52 = vpop.f32.mrf.mxu0  ;;  %v1179_v48 = vld [vmem:[%s7035_s29 + $0x8] sm:$0x7f] }
  0xcf   : > { %v1031_v53 = vadd.f32 %v5043_v46, %v1025_v50  ;;  %v980_v54 = vadd.f32 %v976_v49, %v942_v51  ;;  %v1181_v49 = vld [vmem:[%s7037_s6 + $0x8] sm:$0x7f] }
  0xd1   : > { %1037 = vst.msk [vmem:[#allocation3 + $0x1] sm:$0xff] %vm1036_vm4, %v1031_v53  ;;  %v1018_v55 = vadd.f32 %v1014_v52, %v980_v54 }
  0xd3   : > { %v1020_v56 = vmax.f32 %v1018_v55, 0.0 }
  0xd5   : > { %v1026_v57 = vmul.f32 %v5042_v44, %v1020_v56 }
  0xd7   : > { %v1032_v58 = vadd.f32 %v5043_v46, %v1026_v57 }
  0xd8   : > { %v1045_v59 = vld [vmem:[#allocation3] sm:$0xff] }
  0xd9   : > { %v1082_v60 = vld [vmem:[#allocation3 + $0x1] sm:$0xff]  ;;  %1039 = vst.msk [vmem:[#allocation3 + $0x9] sm:$0x3f] %vm1038_vm5, %v1032_v58  ;;  %4707 = vmatmul.msk.f32.vlgmr.msra.gmra.mxu1 %vm1036_vm4, %v1045_v59 }
  0xda   : > { %4713 = vmatmul.msk.f32.vlgmr.msra.gmra.mxu2 %vm1036_vm4, %v1082_v60 }
  0xe0   : > { %v1046_v61 = vld [vmem:[#allocation3 + $0x8] sm:$0x3f] }
  0xe1   : > { %v1083_v62 = vld [vmem:[#allocation3 + $0x9] sm:$0x3f]  ;;  %4708 = vmatmul.msk.f32.gmra.mxu1 %vm1036_vm4, %v1046_v61 }
  0xe2   : > { %v1120_v63 = vld [vmem:[#allocation3 + $0x2] sm:$0xff]  ;;  %4714 = vmatmul.msk.f32.gmra.mxu2 %vm1036_vm4, %v1083_v62  ;;  %v1121_v0 = vld [vmem:[#allocation3 + $0xa] sm:$0x3f] }
  0xe3   : > { %4719 = vmatmul.msk.f32.vlgmr.msra.gmra.mxu3 %vm1036_vm4, %v1120_v63 }
  0xeb   : > { %4720 = vmatmul.msk.f32.gmra.mxu3 %vm1036_vm4, %v1121_v0 }
 0x156   : > { %v1074_v6 = vpop.f32.mrf.mxu1 }
 0x157   : > { %v1080_v12 = vadd.f32 %v5044_v7, %v1074_v6 }
 0x15d   : > { %v1112_v10 = vpop.f32.mrf.mxu2 }
 0x15e   : > { %v1118_v14 = vadd.f32 %v1112_v10, %v1080_v12  ;;  %v1077_v20 = vpop.f32.mrf.mxu1 }
 0x15f   : > { %v1081_v24 = vadd.f32 %v5044_v7, %v1077_v20 }
 0x165   : > { %v1115_v23 = vpop.f32.mrf.mxu2 }
 0x166   : > { %v1150_v16 = vpop.f32.mrf.mxu3  ;;  %v1119_v26 = vadd.f32 %v1115_v23, %v1081_v24 }
 0x167   : > { %v1156_v17 = vadd.f32 %v1150_v16, %v1118_v14 }
 0x169   : > { %v1158_v21 = vmax.f32 %v1156_v17, 0.0 }
 0x16b   : > { %v1164_v25 = vmul.f32 %v5045_v18, %v1158_v21 }
 0x16d   : > { %v1170_v27 = vadd.f32 %v5046_v22, %v1164_v25 }
 0x16e   : > { %v1153_v28 = vpop.f32.mrf.mxu3 }
 0x16f   : > { %1174 = vst.msk [vmem:[#allocation4 + $0x1] sm:$0xff] %vm1036_vm4, %v1170_v27  ;;  %v1157_v29 = vadd.f32 %v1153_v28, %v1119_v26 }
 0x171   : > { %v1159_v30 = vmax.f32 %v1157_v29, 0.0 }
 0x173   : > { %v1165_v31 = vmul.f32 %v5045_v18, %v1159_v30 }
 0x175   : > { %v1171_v32 = vadd.f32 %v5046_v22, %v1165_v31 }
 0x176   : > { %v5662_v33 = vld [vmem:[#allocation4] sm:$0xff] }
 0x177   : > { %1175 = vst.msk [vmem:[#allocation4 + $0x9] sm:$0x3f] %vm1038_vm5, %v1171_v32  ;;  %4721 = vmatmul.msk.f32.vlgmr.msra.gmra.mxu0 %vm1036_vm4, %v5662_v33 }
 0x17e   : > { %v5667_v34 = vld [vmem:[#allocation4 + $0x8] sm:$0x7f] }
 0x17f   : > { %4722 = vmatmul.msk.f32.gmra.mxu0 %vm1036_vm4, %v5667_v34 }
 0x1f4   : > { %v1225_v38 = vpop.f32.mrf.mxu0 }
 0x1f5   : > { %v5686_v39 = vadd.f32 %v5047_v37, %v1225_v38 }
 0x1f7   : > { %4723 = vmatmul.msk.f32.vlgmr.msrb.gmra.mxu1 %vm1233_vm6, %v5686_v39  ;;  %v1231_v45 = vmul.f32 %v5686_v39, %v1178_v42  ;;  %v1190_v42 = vld [vmem:[%s6935_s15] sm:$0xff] }
 0x1f8   : > { %1420 = vmatpush.msrb.mxu0 %v1190_v42 }
 0x1fc   : > { %v1228_v40 = vpop.f32.mrf.mxu0 }
 0x1fd   : > { %v5690_v41 = vadd.f32 %v5047_v37, %v1228_v40 }
 0x1ff   : > { %4724 = vmatmul.msk.f32.gmra.mxu1 %vm1233_vm6, %v5690_v41  ;;  %v1232_v51 = vmul.f32 %v5690_v41, %v1179_v48 }
 0x274   : > { %v1257_v44 = vpop.f32.mrf.mxu1 }
 0x275   : > { %v1263_v46 = vmul.f32 %v1257_v44, %v1180_v43 }
 0x277   : > { %v5701_v47 = vadd.f32 %v1263_v46, %v1231_v45 }
 0x279   : > { %1430 = vrot.lane.b32.xlu2 %v5701_v47, %s6975_s11 }
 0x27c   : > { %v1260_v50 = vpop.f32.mrf.mxu1 }
 0x27d   : > { %v1264_v52 = vmul.f32 %v1260_v50, %v1181_v49 }
 0x27f   : > { %v5712_v53 = vadd.f32 %v1264_v52, %v1232_v51  ;;  %v1191_v52 = vld [vmem:[%s6935_s15 + $0x8] sm:$0xff] }
 0x281   : > { %1432 = vrot.lane.b32.xlu2 %v5712_v53, %s6975_s11  ;;  %1436 = vrot.lane.b32.xlu1 %v5712_v53, %s6977_s0  ;;  %s7039_s11 = smov 88  }
 0x282   : > { %1276 = vrot.lane.b32.xlu0 %v5712_v53, %s6979_s10 }
 0x289   : > { %1434 = vrot.lane.b32.xlu1 %v5701_v47, %s6977_s0  ;;  %s7040_s0 = smov 120  }
 0x28a   : > { %1274 = vrot.lane.b32.xlu0 %v5701_v47, %s6979_s10 }
 0x2d3   : > { %v1431_v57 = vpop.permute.xlu2 %1430 }
 0x2db   : > { %v1433_v59 = vpop.permute.xlu2 %1432 }
 0x2f3   : > { %v1437_v54 = vpop.permute.xlu1 %1436 }
 0x2f4   : > { %v1277_v55 = vpop.permute.xlu0 %1276  ;;  %4734 = vmatpush.xpose.msk.msra.mxu1 %vm1278_vm7, %v1437_v54 }
 0x2f5   : > { %4725 = vmatpush.xpose.msk.msrb.mxu2 %vm1278_vm7, %v1277_v55 }
 0x2fb   : > { %v1435_v56 = vpop.permute.xlu1 %1434 }
 0x2fc   : > { %v1275_v58 = vpop.permute.xlu0 %1274  ;;  %4735 = vmatpush.xpose.msk.msra.mxu1 %vm1278_vm7, %v1435_v56 }
 0x2fd   : > { %4726 = vmatpush.xpose.msk.msrb.mxu2 %vm1278_vm7, %v1275_v58 }
 0x2ff   : > { %4736 = vmatmul.msk.f32.vlgmr.msra.gmra.mxu1 %vm1278_vm7, %v1431_v57 }
 0x300   : > { %4727 = vmatmul.msk.f32.vlgmr.msrb.gmra.mxu2 %vm1278_vm7, %v5701_v47 }
 0x307   : > { %4737 = vmatmul.msk.f32.gmra.mxu1 %vm1278_vm7, %v1433_v59 }
 0x308   : > { %4728 = vmatmul.msk.f32.gmra.mxu2 %vm1278_vm7, %v5712_v53 }
 0x37c   : > { %v1463_v60 = vpop.f32.mrf.mxu1 }
 0x37d   : > { %v1469_v61 = vsel %vm1310_vm8, %v1463_v60, -inf }
 0x37e   : > { %1470 = vmax.xlane.f32.xlu1 %v1469_v61 }
 0x383   : > { %v1304_v62 = vpop.f32.mrf.mxu2 }
 0x384   : > { %v1311_v63 = vsel %vm1310_vm8, %v1304_v62, -inf  ;;  %v1466_v2 = vpop.f32.mrf.mxu1 }
 0x385   : > { %1312 = vmax.xlane.f32.xlu0 %v1311_v63  ;;  %v1472_v3 = vsel %vm1314_vm9, %v1466_v2, -inf }
 0x38b   : > { %v1307_v0 = vpop.f32.mrf.mxu2 }
 0x38c   : > { %v1315_v1 = vsel %vm1314_vm9, %v1307_v0, -inf }
 0x38d   : > { %1316 = vmax.xlane.f32.xlu2 %v1315_v1 }
 0x395   : > { %1473 = vmax.xlane.f32.xlu2 %v1472_v3 }
 0x397   : > { %1364 = vrot.lane.b32.xlu1 %v5690_v41, %s6973_s7 }
 0x3f1   : > { %v1471_v4 = vpop.xlane.xlu1 %1470 }
 0x3f2   : > { %v1475_v5 = vsub.f32 %v1463_v60, %v1471_v4 }
 0x3f4   : > { %v1477_v6 = vmul.f32 1.442695, %v1475_v5 }
 0x3f6   : > { %5072 = vpow2.f32 %v1477_v6 }
 0x3f8   : > { %v1313_v7 = vpop.xlane.xlu0 %1312 }
 0x3f9   : > { %v1318_v10 = vsub.f32 %v1304_v62, %v1313_v7 }
 0x3fb   : > { %v1320_v12 = vmul.f32 1.442695, %v1318_v10 }
 0x3fc   : > { %v5740_v14 = vpop.eup %5072 }
 0x3fd   : > { %5074 = vpow2.f32 %v1320_v12  ;;  %v1481_v16 = vsel %vm1310_vm8, %v5740_v14, 0.0 }
 0x3fe   : > { %1482 = vadd.xlane.f32.xlu1 %v1481_v16 }
 0x400   : > { %v1317_v17 = vpop.xlane.xlu2 %1316 }
 0x401   : > { %v1319_v18 = vsub.f32 %v1307_v0, %v1317_v17 }
 0x403   : > { %v5744_v20 = vpop.eup %5074  ;;  %v1322_v21 = vmul.f32 1.442695, %v1319_v18 }
 0x404   : > { %v1324_v22 = vsel %vm1310_vm8, %v5744_v20, 0.0 }
 0x405   : > { %5076 = vpow2.f32 %v1322_v21  ;;  %1325 = vadd.xlane.f32.xlu0 %v1324_v22 }
 0x408   : > { %v1474_v23 = vpop.xlane.xlu2 %1473 }
 0x409   : > { %v1476_v24 = vsub.f32 %v1466_v2, %v1474_v23  ;;  %v1365_v25 = vpop.permute.xlu1 %1364 }
 0x40a   : > { %4729 = vmatpush.msk.msrb.mxu3 %vm1373_vm10, %v1365_v25 }
 0x40b   : > { %v5749_v26 = vpop.eup %5076  ;;  %v1479_v27 = vmul.f32 1.442695, %v1476_v24 }
 0x40c   : > { %v1327_v28 = vsel %vm1314_vm9, %v5749_v26, 0.0 }
 0x40d   : > { %5078 = vpow2.f32 %v1479_v27  ;;  %1328 = vadd.xlane.f32.xlu2 %v1327_v28 }
 0x413   : > { %v5753_v29 = vpop.eup %5078 }
 0x414   : > { %v1484_v30 = vsel %vm1314_vm9, %v5753_v29, 0.0 }
 0x415   : > { %1485 = vadd.xlane.f32.xlu0 %v1484_v30 }
 0x417   : > { %1519 = vrot.lane.b32.xlu1 %v5686_v39, %s6961_s8 }
 0x41f   : > { %1590 = vrot.lane.b32.xlu1 %v5701_v47, %s6959_s2 }
 0x425   : > { %1362 = vrot.lane.b32.xlu2 %v5686_v39, %s6973_s7  ;;  %s7045_s7 = smov 72  }
 0x427   : > { %1742 = vrot.lane.b32.xlu1 %v5701_v47, %s6963_s5 }
 0x429   : > { %1521 = vrot.lane.b32.xlu0 %v5690_v41, %s6961_s8  ;;  %s6969_s8 = smov 48  }
 0x42d   : > { %1748 = vrot.lane.b32.xlu2 %v5712_v53, %s6965_s3 }
 0x431   : > { %1592 = vrot.lane.b32.xlu0 %v5712_v53, %s6959_s2  ;;  %s6967_s2 = smov 40  }
 0x435   : > { %1586 = vrot.lane.b32.xlu2 %v5701_v47, %s6971_s30 }
 0x439   : > { %1746 = vrot.lane.b32.xlu0 %v5701_v47, %s6965_s3  ;;  %s7042_s3 = smov 56  }
 0x43d   : > { %1744 = vrot.lane.b32.xlu2 %v5712_v53, %s6963_s5  ;;  %s7041_s5 = smov 64  }
 0x441   : > { %1588 = vrot.lane.b32.xlu0 %v5712_v53, %s6971_s30  ;;  %s7046_s30 = smov 104  }
 0x471   : > { %v1483_v32 = vpop.xlane.xlu1 %1482 }
 0x472   : > { %v1498_v17 = vand.u32 2147483648, %v1483_v32  ;;  %v1496_v18 = vand.u32 2147483647, %v1483_v32 }
 0x474   : > { %v1499_v22 = vor.u32 1.1754944e-38, %v1498_v17 }
 0x478   : > { %v1326_v31 = vpop.xlane.xlu0 %1325 }
 0x479   : > { %5080 = vrcp.f32 %v1326_v31  ;;  %v1341_v44 = vand.u32 2147483648, %v1326_v31  ;;  %v1339_v47 = vand.u32 2147483647, %v1326_v31  ;;  %vm1335_vm12 = vweird.f32 %v1326_v31 }
 0x47a   : > { %5082 = vrcp.f32 %v1483_v32 }
 0x47b   : > { %v1342_v51 = vor.u32 1.1754944e-38, %v1341_v44  ;;  %vm1340_vm14 = vcmp.eq.f32.partialorder %v1339_v47, 8.507059e+37 }
 0x47f   : > { %v5081_v37 = vpop.eup %5080 }
 0x480   : > { %v1331_v38 = vmul.f32 %v5081_v37, %v1326_v31  ;;  %v1329_v40 = vpop.xlane.xlu2 %1328  ;;  %v5083_v45 = vpop.eup %5082  ;;  %vm1336_vm11 = vweird.f32 %v5081_v37 }
 0x481   : > { %5084 = vrcp.f32 %v1329_v40  ;;  %v1488_v50 = vmul.f32 %v5083_v45, %v1483_v32  ;;  %vm1337_vm13 = vmor %vm1335_vm12, %vm1336_vm11  ;;  %v1356_v61 = vand.u32 2147483648, %v1329_v40  ;;  %v1354_v63 = vand.u32 2147483647, %v1329_v40 }
 0x482   : > { %v1332_v43 = vsub.f32 1.0, %v1331_v38  ;;  %vm1350_vm0 = vweird.f32 %v1329_v40  ;;  %vm1493_vm5 = vweird.f32 %v5083_v45  ;;  %vm1492_vm11 = vweird.f32 %v1483_v32 }
 0x483   : > { %v1489_v60 = vsub.f32 1.0, %v1488_v50  ;;  %v1357_v3 = vor.u32 1.1754944e-38, %v1356_v61  ;;  %vm1355_vm2 = vcmp.eq.f32.partialorder %v1354_v63, 8.507059e+37  ;;  %vm1494_vm12 = vmor %vm1492_vm11, %vm1493_vm5 }
 0x484   : > { %v1333_v46 = vmul.f32 %v5081_v37, %v1332_v43 }
 0x485   : > { %v1490_v2 = vmul.f32 %v5083_v45, %v1489_v60 }
 0x486   : > { %v1334_v48 = vadd.f32 %v5081_v37, %v1333_v46 }
 0x487   : > { %v5085_v49 = vpop.eup %5084  ;;  %v1491_v12 = vadd.f32 %v5083_v45, %v1490_v2 }
 0x488   : > { %v1346_v53 = vmul.f32 %v5085_v49, %v1329_v40  ;;  %v1486_v54 = vpop.xlane.xlu0 %1485  ;;  %v1363_v55 = vpop.permute.xlu2 %1362  ;;  %v1338_v56 = vsel %vm1337_vm13, %v5081_v37, %v1334_v48  ;;  %vm1351_vm15 = vweird.f32 %v5085_v49  ;;  %vm1497_vm13 = vcmp.eq.f32.partialorder %v1496_v18, 8.507059e+37 }
 0x489   : > { %5086 = vrcp.f32 %v1486_v54  ;;  %1391 = vmatpush.msrb.mxu3 %v1363_v55  ;;  %v1343_v57 = vsel %vm1340_vm14, %v1342_v51, %v1338_v56  ;;  %vm1352_vm1 = vmor %vm1350_vm0, %vm1351_vm15  ;;  %v1520_v27 = vpop.permute.xlu1 %1519  ;;  %vm1507_vm15 = vweird.f32 %v1486_v54  ;;  %v1511_v30 = vand.u32 2147483647, %v1486_v54 }
 0x48a   : > { %v1347_v58 = vsub.f32 1.0, %v1346_v53  ;;  %v1360_v59 = vmul.f32 %v5744_v20, %v1343_v57  ;;  %v1495_v20 = vsel %vm1494_vm12, %v5083_v45, %v1491_v12 }
 0x48b   : > { %1576 = vmatpush.msra.mxu3 %v1191_v52  ;;  %v1500_v23 = vsel %vm1497_vm13, %v1499_v22, %v1495_v20 }
 0x48c   : > { %4730 = vmatmul.msk.f32.vlgmr.msrb.gmra.mxu3 %vm1310_vm8, %v1360_v59  ;;  %v1348_v62 = vmul.f32 %v5085_v49, %v1347_v58  ;;  %v1517_v28 = vmul.f32 %v5740_v14, %v1500_v23 }
 0x48e   : > { %v1349_v0 = vadd.f32 %v5085_v49, %v1348_v62 }
 0x48f   : > { %v5087_v1 = vpop.eup %5086 }
 0x490   : > { %v1503_v4 = vmul.f32 %v5087_v1, %v1486_v54  ;;  %v1749_v5 = vpop.permute.xlu2 %1748  ;;  %v1353_v6 = vsel %vm1352_vm1, %v5085_v49, %v1349_v0  ;;  %vm1508_vm14 = vweird.f32 %v5087_v1  ;;  %vm1512_vm1 = vcmp.eq.f32.partialorder %v1511_v30, 8.507059e+37 }
 0x491   : > { %4752 = vmatpush.xpose.msk.msrb.mxu3 %vm1278_vm7, %v1749_v5  ;;  %v1358_v7 = vsel %vm1355_vm2, %v1357_v3, %v1353_v6  ;;  %vm1509_vm0 = vmor %vm1507_vm15, %vm1508_vm14  ;;  %v1591_v42 = vpop.permute.xlu1 %1590 }
 0x492   : > { %v1361_v10 = vmul.f32 %v5749_v26, %v1358_v7  ;;  %v1504_v16 = vsub.f32 1.0, %v1503_v4  ;;  %v1513_v26 = vand.u32 2147483648, %v1486_v54 }
 0x494   : > { %4731 = vmatmul.msk.f32.gmra.mxu3 %vm1310_vm8, %v1361_v10  ;;  %v1505_v21 = vmul.f32 %v5087_v1, %v1504_v16  ;;  %v1514_v32 = vor.u32 1.1754944e-38, %v1513_v26 }
 0x496   : > { %v1506_v25 = vadd.f32 %v5087_v1, %v1505_v21 }
 0x498   : > { %v1510_v31 = vsel %vm1509_vm0, %v5087_v1, %v1506_v25  ;;  %v1587_v45 = vpop.permute.xlu2 %1586 }
 0x499   : > { %v1515_v37 = vsel %vm1512_vm1, %v1514_v32, %v1510_v31  ;;  %v1743_v48 = vpop.permute.xlu1 %1742 }
 0x49a   : > { %v1518_v40 = vmul.f32 %v5753_v29, %v1515_v37 }
 0x49b   : > { %v1522_v24 = vpop.permute.xlu0 %1521 }
 0x49c   : > { %4738 = vmatpush.msk.msra.mxu2 %vm1373_vm10, %v1522_v24 }
 0x49e   : > { %1547 = vmatpush.msra.mxu2 %v1520_v27 }
 0x49f   : > { %4739 = vmatmul.msk.f32.vlgmr.msra.gmra.mxu2 %vm1310_vm8, %v1517_v28 }
 0x4a0   : > { %v1745_v49 = vpop.permute.xlu2 %1744 }
 0x4a3   : > { %v1593_v38 = vpop.permute.xlu0 %1592 }
 0x4a4   : > { %4743 = vmatpush.xpose.msk.msra.mxu0 %vm1278_vm7, %v1593_v38 }
 0x4a7   : > { %4740 = vmatmul.msk.f32.gmra.mxu2 %vm1310_vm8, %v1518_v40  ;;  %v1192_v40 = vld [vmem:[%s6935_s15 + $0x10] sm:$0xff] }
 0x4a8   : > { %4744 = vmatpush.xpose.msk.msra.mxu0 %vm1278_vm7, %v1591_v42  ;;  %1732 = vmatpush.msrb.mxu2 %v1192_v40 }
 0x4ab   : > { %v1747_v14 = vpop.permute.xlu0 %1746 }
 0x4ac   : > { %4753 = vmatpush.xpose.msk.msrb.mxu3 %vm1278_vm7, %v1747_v14 }
 0x4b3   : > { %v1589_v29 = vpop.permute.xlu0 %1588 }
 0x50f   : > { %v1393_v43 = vpop.f32.mrf.mxu3 }
 0x510   : > { %4732 = vmatmul.msk.f32.vlgmr.msrb.gmra.mxu0 %vm1278_vm7, %v1393_v43 }
 0x517   : > { %v1396_v44 = vpop.f32.mrf.mxu3 }
 0x518   : > { %4733 = vmatmul.msk.f32.gmra.mxu0 %vm1278_vm7, %v1396_v44 }
 0x520   : > { %4745 = vmatmul.msk.f32.vlgmr.msra.gmra.mxu0 %vm1278_vm7, %v1587_v45 }
 0x522   : > { %v1549_v46 = vpop.f32.mrf.mxu2 }
 0x523   : > { %4741 = vmatmul.msk.f32.vlgmr.msra.gmra.mxu3 %vm1278_vm7, %v1549_v46 }
 0x528   : > { %4746 = vmatmul.msk.f32.gmra.mxu0 %vm1278_vm7, %v1589_v29 }
 0x52a   : > { %v1552_v47 = vpop.f32.mrf.mxu2 }
 0x52b   : > { %4742 = vmatmul.msk.f32.gmra.mxu3 %vm1278_vm7, %v1552_v47 }
 0x533   : > { %4754 = vmatmul.msk.f32.vlgmr.msrb.gmra.mxu3 %vm1278_vm7, %v1743_v48 }
 0x53b   : > { %4755 = vmatmul.msk.f32.gmra.mxu3 %vm1278_vm7, %v1745_v49 }
 0x58d   : > { %v5806_v50 = vpop.f32.mrf.mxu0 }
 0x595   : > { %v5808_v51 = vpop.f32.mrf.mxu0 }
 0x59d   : > { %v1619_v52 = vpop.f32.mrf.mxu0 }
 0x59e   : > { %v1625_v53 = vsel %vm1310_vm8, %v1619_v52, -inf }
 0x59f   : > { %1626 = vmax.xlane.f32.xlu1 %v1625_v53 }
 0x5a5   : > { %v1622_v54 = vpop.f32.mrf.mxu0 }
 0x5a6   : > { %v5811_v55 = vpop.f32.mrf.mxu3  ;;  %v1628_v56 = vsel %vm1314_vm9, %v1622_v54, -inf }
 0x5a7   : > { %1629 = vmax.xlane.f32.xlu0 %v1628_v56 }
 0x5ae   : > { %v5814_v57 = vpop.f32.mrf.mxu3 }
 0x5b6   : > { %v1775_v58 = vpop.f32.mrf.mxu3 }
 0x5b7   : > { %v1781_v59 = vsel %vm1310_vm8, %v1775_v58, -inf }
 0x5b8   : > { %1782 = vmax.xlane.f32.xlu2 %v1781_v59 }
 0x5be   : > { %v1778_v60 = vpop.f32.mrf.mxu3 }
 0x5bf   : > { %v1784_v61 = vsel %vm1314_vm9, %v1778_v60, -inf }
 0x5c0   : > { %1785 = vmax.xlane.f32.xlu1 %v1784_v61 }
 0x5d0   : > { %1677 = vrot.lane.b32.xlu2 %v5690_v41, %s6969_s8 }
 0x612   : > { %v1627_v62 = vpop.xlane.xlu1 %1626 }
 0x613   : > { %v1631_v63 = vsub.f32 %v1619_v52, %v1627_v62 }
 0x615   : > { %v1633_v0 = vmul.f32 1.442695, %v1631_v63 }
 0x617   : > { %5088 = vpow2.f32 %v1633_v0 }
 0x61a   : > { %v1630_v1 = vpop.xlane.xlu0 %1629 }
 0x61b   : > { %v1632_v2 = vsub.f32 %v1622_v54, %v1630_v1 }
 0x61d   : > { %v5820_v3 = vpop.eup %5088  ;;  %v1635_v4 = vmul.f32 1.442695, %v1632_v2 }
 0x61e   : > { %v1637_v5 = vsel %vm1310_vm8, %v5820_v3, 0.0 }
 0x61f   : > { %5090 = vpow2.f32 %v1635_v4  ;;  %1638 = vadd.xlane.f32.xlu0 %v1637_v5 }
 0x625   : > { %v5824_v6 = vpop.eup %5090 }
 0x626   : > { %v1640_v7 = vsel %vm1314_vm9, %v5824_v6, 0.0 }
 0x627   : > { %1641 = vadd.xlane.f32.xlu2 %v1640_v7 }
 0x62b   : > { %v1783_v10 = vpop.xlane.xlu2 %1782 }
 0x62c   : > { %v1787_v12 = vsub.f32 %v1775_v58, %v1783_v10 }
 0x62e   : > { %v1789_v16 = vmul.f32 1.442695, %v1787_v12 }
 0x630   : > { %5092 = vpow2.f32 %v1789_v16 }
 0x633   : > { %v1786_v17 = vpop.xlane.xlu1 %1785  ;;  %v1678_v18 = vpop.permute.xlu2 %1677 }
 0x634   : > { %v1788_v20 = vsub.f32 %v1778_v60, %v1786_v17  ;;  %4747 = vmatpush.msk.msrb.mxu1 %vm1373_vm10, %v1678_v18 }
 0x636   : > { %v5829_v21 = vpop.eup %5092  ;;  %v1791_v22 = vmul.f32 1.442695, %v1788_v20 }
 0x637   : > { %v1793_v23 = vsel %vm1310_vm8, %v5829_v21, 0.0 }
 0x638   : > { %5094 = vpow2.f32 %v1791_v22  ;;  %1794 = vadd.xlane.f32.xlu1 %v1793_v23 }
 0x63e   : > { %v5833_v24 = vpop.eup %5094 }
 0x63f   : > { %1831 = vrot.lane.b32.xlu2 %v5686_v39, %s6967_s2  ;;  %v1796_v25 = vsel %vm1314_vm9, %v5833_v24, 0.0 }
 0x640   : > { %1797 = vadd.xlane.f32.xlu0 %v1796_v25 }
 0x651   : > { %1675 = vrot.lane.b32.xlu1 %v5686_v39, %s6969_s8  ;;  %s7043_s8 = smov 112  }
 0x654   : > { %1833 = vrot.lane.b32.xlu0 %v5690_v41, %s6967_s2  ;;  %s7044_s2 = smov 80  }
 0x692   : > { %v1639_v26 = vpop.xlane.xlu0 %1638 }
 0x693   : > { %5096 = vrcp.f32 %v1639_v26  ;;  %v1654_v29 = vand.u32 2147483648, %v1639_v26  ;;  %vm1648_vm5 = vweird.f32 %v1639_v26  ;;  %v1652_v48 = vand.u32 2147483647, %v1639_v26 }
 0x695   : > { %v1655_v54 = vor.u32 1.1754944e-38, %v1654_v29  ;;  %vm1653_vm13 = vcmp.eq.f32.partialorder %v1652_v48, 8.507059e+37 }
 0x699   : > { %v5097_v28 = vpop.eup %5096 }
 0x69a   : > { %v1642_v27 = vpop.xlane.xlu2 %1641  ;;  %v1644_v31 = vmul.f32 %v5097_v28, %v1639_v26  ;;  %vm1649_vm2 = vweird.f32 %v5097_v28 }
 0x69b   : > { %5098 = vrcp.f32 %v1642_v27  ;;  %vm1650_vm11 = vmor %vm1648_vm5, %vm1649_vm2  ;;  %v1669_v63 = vand.u32 2147483648, %v1642_v27  ;;  %vm1663_vm1 = vweird.f32 %v1642_v27  ;;  %v1667_v7 = vand.u32 2147483647, %v1642_v27 }
 0x69c   : > { %v1645_v37 = vsub.f32 1.0, %v1644_v31 }
 0x69d   : > { %v1670_v16 = vor.u32 1.1754944e-38, %v1669_v63  ;;  %v1964_v63 = vld [vmem:[%s6939_s19] sm:$0xff] }
 0x69e   : > { %v1646_v41 = vmul.f32 %v5097_v28, %v1645_v37 }
 0x6a0   : > { %v1647_v44 = vadd.f32 %v5097_v28, %v1646_v41 }
 0x6a1   : > { %v5099_v32 = vpop.eup %5098 }
 0x6a2   : > { %v1659_v14 = vmul.f32 %v5099_v32, %v1642_v27  ;;  %v1651_v52 = vsel %vm1650_vm11, %v5097_v28, %v1647_v44  ;;  %vm1664_vm0 = vweird.f32 %v5099_v32  ;;  %v1832_v22 = vpop.permute.xlu2 %1831  ;;  %v5318_v44 = vmov 32.0  }
 0x6a3   : > { %v1656_v61 = vsel %vm1653_vm13, %v1655_v54, %v1651_v52  ;;  %vm1665_vm5 = vmor %vm1663_vm1, %vm1664_vm0  ;;  %vm1905_vm0 = vcmask 260096  }
 0x6a4   : > { %v1660_v45 = vsub.f32 1.0, %v1659_v14  ;;  %v1673_v5 = vmul.f32 %v5820_v3, %v1656_v61  ;;  %v1966_v61 = vld [vmem:[%s6939_s19 + $0x10] sm:$0xff] }
 0x6a6   : > { %v1661_v53 = vmul.f32 %v5099_v32, %v1660_v45 }
 0x6a8   : > { %v1662_v62 = vadd.f32 %v5099_v32, %v1661_v53 }
 0x6aa   : > { %v1666_v12 = vsel %vm1665_vm5, %v5099_v32, %v1662_v62  ;;  %v1965_v62 = vld [vmem:[%s6939_s19 + $0x8] sm:$0xff] }
 0x6ab   : > { %v1795_v30 = vpop.xlane.xlu1 %1794 }
 0x6ac   : > { %5100 = vrcp.f32 %v1795_v30  ;;  %v1810_v59 = vand.u32 2147483648, %v1795_v30  ;;  %vm1804_vm14 = vweird.f32 %v1795_v30  ;;  %v1808_v60 = vand.u32 2147483647, %v1795_v30 }
 0x6ae   : > { %v1811_v2 = vor.u32 1.1754944e-38, %v1810_v59  ;;  %vm1809_vm2 = vcmp.eq.f32.partialorder %v1808_v60, 8.507059e+37  ;;  %v1967_v60 = vld [vmem:[%s6939_s19 + $0x18] sm:$0xff] }
 0x6af   : > { %1990 = vmatpush.msra.mxu2 %v1967_v60 }
 0x6b1   : > { %1991 = vmatpush.msra.mxu2 %v1966_v61 }
 0x6b2   : > { %v5101_v38 = vpop.eup %5100 }
 0x6b3   : > { %v1800_v42 = vmul.f32 %v5101_v38, %v1795_v30  ;;  %v1798_v39 = vpop.xlane.xlu0 %1797  ;;  %vm1805_vm12 = vweird.f32 %v5101_v38  ;;  %1992 = vmatpush.msra.mxu2 %v1965_v62 }
 0x6b4   : > { %5102 = vrcp.f32 %v1798_v39  ;;  %vm1806_vm15 = vmor %vm1804_vm14, %vm1805_vm12  ;;  %v1825_v20 = vand.u32 2147483648, %v1798_v39  ;;  %vm1668_vm12 = vcmp.eq.f32.partialorder %v1667_v7, 8.507059e+37  ;;  %vm1819_vm13 = vweird.f32 %v1798_v39  ;;  %v2016_v7 = vld [vmem:[%s6941_s21 + $0x68] sm:$0xff] }
 0x6b5   : > { %v1801_v43 = vsub.f32 1.0, %v1800_v42  ;;  %v1671_v23 = vsel %vm1668_vm12, %v1670_v16, %v1666_v12  ;;  %v1823_v25 = vand.u32 2147483647, %v1798_v39  ;;  %5104 = vrcp.f32 %v5318_v44  ;;  %1993 = vmatpush.msra.mxu2 %v1964_v63  ;;  %v2015_v16 = vld [vmem:[%s6941_s21 + $0x60] sm:$0xff] }
 0x6b6   : > { %v1826_v27 = vor.u32 1.1754944e-38, %v1825_v20  ;;  %v1674_v28 = vmul.f32 %v5824_v6, %v1671_v23  ;;  %v2014_v20 = vld [vmem:[%s6941_s21 + $0x58] sm:$0xff]  ;;  %v2003_v44 = vld [vmem:[%s6941_s21] sm:$0xff] }
 0x6b7   : > { %v1802_v47 = vmul.f32 %v5101_v38, %v1801_v43 }
 0x6b9   : > { %v1803_v56 = vadd.f32 %v5101_v38, %v1802_v47 }
 0x6ba   : > { %v5103_v46 = vpop.eup %5102 }
 0x6bb   : > { %v1815_v49 = vmul.f32 %v5103_v46, %v1798_v39  ;;  %v1807_v0 = vsel %vm1806_vm15, %v5101_v38, %v1803_v56  ;;  %vm1820_vm11 = vweird.f32 %v5103_v46  ;;  %vm1824_vm15 = vcmp.eq.f32.partialorder %v1823_v25, 8.507059e+37  ;;  %v2012_v25 = vld [vmem:[%s6941_s21 + $0x48] sm:$0xff] }
 0x6bc   : > { %v1812_v10 = vsel %vm1809_vm2, %v1811_v2, %v1807_v0  ;;  %vm1821_vm14 = vmor %vm1819_vm13, %vm1820_vm11 }
 0x6bd   : > { %v1816_v58 = vsub.f32 1.0, %v1815_v49  ;;  %v1829_v3 = vmul.f32 %v5829_v21, %v1812_v10  ;;  %v1193_v21 = vld [vmem:[%s6935_s15 + $0x18] sm:$0xff] }
 0x6bf   : > { %v1817_v1 = vmul.f32 %v5103_v46, %v1816_v58 }
 0x6c1   : > { %v1818_v18 = vadd.f32 %v5103_v46, %v1817_v1 }
 0x6c3   : > { %v1676_v4 = vpop.permute.xlu1 %1675  ;;  %v1822_v26 = vsel %vm1821_vm14, %v5103_v46, %v1818_v18 }
 0x6c4   : > { %1703 = vmatpush.msrb.mxu1 %v1676_v4  ;;  %v1827_v30 = vsel %vm1824_vm15, %v1826_v27, %v1822_v26  ;;  %v2018_v4 = vld [vmem:[%s6941_s21 + $0x78] sm:$0xff]  ;;  %v2011_v27 = vld [vmem:[%s6941_s21 + $0x40] sm:$0xff] }
 0x6c5   : > { %4748 = vmatmul.msk.f32.vlgmr.msrb.gmra.mxu1 %vm1310_vm8, %v1673_v5  ;;  %v1830_v31 = vmul.f32 %v5833_v24, %v1827_v30  ;;  %v2017_v5 = vld [vmem:[%s6941_s21 + $0x70] sm:$0xff]  ;;  %2023 = vmatpush.msra.mxu3 %v2018_v4 }
 0x6c6   : > { %v1834_v17 = vpop.permute.xlu0 %1833  ;;  %1888 = vmatpush.msra.mxu1 %v1193_v21 }
 0x6c7   : > { %4756 = vmatpush.msk.msrb.mxu0 %vm1373_vm10, %v1834_v17  ;;  %2024 = vmatpush.msra.mxu3 %v2017_v5 }
 0x6c8   : > { %2164 = vmatpush.msrb.mxu1 %v5622_v8 }
 0x6c9   : > { %1859 = vmatpush.msrb.mxu0 %v1832_v22  ;;  %2025 = vmatpush.msra.mxu3 %v2016_v7 }
 0x6ca   : > { %4757 = vmatmul.msk.f32.vlgmr.msrb.gmra.mxu0 %vm1310_vm8, %v1829_v3  ;;  %2165 = vmatpush.msrb.mxu1 %v5627_v9  ;;  %v2013_v3 = vld [vmem:[%s6941_s21 + $0x50] sm:$0xff] }
 0x6cb   : > { %2026 = vmatpush.msra.mxu3 %v2015_v16  ;;  %v4769_v16 = vld [vmem:[%s6933_s13 + $0x30] sm:$0xff] }
 0x6cc   : > { %2166 = vmatpush.msrb.mxu1 %v5633_v11  ;;  %v5048_v11 = vld [vmem:[%s7038_s16] ss:$0 sm:$0xff] }
 0x6cd   : > { %4749 = vmatmul.msk.f32.gmra.mxu1 %vm1310_vm8, %v1674_v28  ;;  %v1429_v37 = vadd.f32 %v5048_v11, %v5808_v51  ;;  %v5105_v51 = vpop.eup %5104  ;;  %2027 = vmatpush.msra.mxu3 %v2014_v20 }
 0x6ce   : > { %2167 = vmatpush.msrb.mxu1 %v5639_v13  ;;  %v1428_v13 = vadd.f32 %v5048_v11, %v5806_v50  ;;  %v1910_v45 = vmul.f32 32.0, %v5105_v51  ;;  %vm1914_vm1 = vweird.f32 %v5105_v51 }
 0x6cf   : > { %v1585_v40 = vadd.f32 %v5814_v57, %v1429_v37  ;;  %2028 = vmatpush.msra.mxu3 %v2013_v3 }
 0x6d0   : > { %2168 = vmatpush.msrb.mxu1 %v5645_v15  ;;  %v1584_v15 = vadd.f32 %v5811_v55, %v1428_v13 }
 0x6d1   : > { %2029 = vmatpush.msra.mxu3 %v2012_v25 }
 0x6d2   : > { %4758 = vmatmul.msk.f32.gmra.mxu0 %vm1310_vm8, %v1830_v31  ;;  %2169 = vmatpush.msrb.mxu1 %v5654_v19  ;;  %v2010_v31 = vld [vmem:[%s6941_s21 + $0x38] sm:$0xff] }
 0x6d3   : > { %2030 = vmatpush.msra.mxu3 %v2011_v27 }
 0x6d4   : > { %2170 = vmatpush.msrb.mxu1 %v5674_v35 }
 0x6d5   : > { %2031 = vmatpush.msra.mxu3 %v2010_v31 }
 0x6d6   : > { %2171 = vmatpush.msrb.mxu1 %v5680_v36 }
 0x742   : > { %v1705_v6 = vpop.f32.mrf.mxu1 }
 0x743   : > { %4750 = vmatmul.msk.f32.vlgmr.msrb.gmra.mxu2 %vm1278_vm7, %v1705_v6 }
 0x747   : > { %v1861_v24 = vpop.f32.mrf.mxu0 }
 0x748   : > { %4759 = vmatmul.msk.f32.vlgmr.msra.gmra.mxu1 %vm1278_vm7, %v1861_v24  ;;  %v5049_v24 = vld [vmem:[%s6937_s17] ss:$0 sm:$0xff] }
 0x74a   : > { %v1708_v8 = vpop.f32.mrf.mxu1 }
 0x74b   : > { %4751 = vmatmul.msk.f32.gmra.mxu2 %vm1278_vm7, %v1708_v8  ;;  %v2009_v8 = vld [vmem:[%s6941_s21 + $0x30] sm:$0xff] }
 0x74c   : > { %2032 = vmatpush.msra.mxu3 %v2009_v8 }
 0x74f   : > { %v1864_v9 = vpop.f32.mrf.mxu0 }
 0x750   : > { %4760 = vmatmul.msk.f32.gmra.mxu1 %vm1278_vm7, %v1864_v9 }
 0x7c5   : > { %v1890_v19 = vpop.f32.mrf.mxu1 }
 0x7c6   : > { %v1734_v35 = vpop.f32.mrf.mxu2 }
 0x7c7   : > { %v1740_v36 = vadd.f32 %v1734_v35, %v1584_v15  ;;  %v5050_v15 = vld [vmem:[%s6938_s18] ss:$0 sm:$0xff] }
 0x7c9   : > { %v1896_v32 = vadd.f32 %v1890_v19, %v1740_v36  ;;  %v2008_v19 = vld [vmem:[%s6941_s21 + $0x28] sm:$0xff] }
 0x7ca   : > { %2033 = vmatpush.msra.mxu3 %v2008_v19  ;;  %v5054_v19 = vld [vmem:[%s6944_s24] ss:$0 sm:$0xff] }
 0x7cb   : > { %v1898_v38 = vadd.f32 %v1896_v32, %v5662_v33  ;;  %v1911_v33 = vsub.f32 1.0, %v1910_v45  ;;  %v2007_v32 = vld [vmem:[%s6941_s21 + $0x20] sm:$0xff] }
 0x7cc   : > { %2034 = vmatpush.msra.mxu3 %v2007_v32 }
 0x7cd   : > { %v1902_v42 = vsel %vm1036_vm4, %v1898_v38, 0.0  ;;  %v1893_v14 = vpop.f32.mrf.mxu1  ;;  %v1912_v46 = vmul.f32 %v5105_v51, %v1911_v33 }
 0x7ce   : > { %v1737_v39 = vpop.f32.mrf.mxu2  ;;  %1903 = vadd.xlane.f32.xlu0 %v1902_v42 }
 0x7cf   : > { %v1741_v41 = vadd.f32 %v1737_v39, %v1585_v40  ;;  %v1913_v57 = vadd.f32 %v5105_v51, %v1912_v46  ;;  %v2006_v40 = vld [vmem:[%s6941_s21 + $0x18] sm:$0xff] }
 0x7d0   : > { %2035 = vmatpush.msra.mxu3 %v2006_v40 }
 0x7d1   : > { %v1897_v43 = vadd.f32 %v1893_v14, %v1741_v41  ;;  %v5881_v29 = vsel %vm1914_vm1, %v5105_v51, %v1913_v57  ;;  %v5051_v51 = vld [vmem:[%s6940_s20] ss:$0 sm:$0xff] }
 0x7d3   : > { %v1899_v50 = vadd.f32 %v1897_v43, %v5667_v34 }
 0x7d5   : > { %v1906_v55 = vsel %vm1905_vm0, %v1899_v50, 0.0 }
 0x7d6   : > { %1907 = vadd.xlane.f32.xlu1 %v1906_v55  ;;  %v2004_v55 = vld [vmem:[%s6941_s21 + $0x8] sm:$0xff] }
 0x841   : > { %v1904_v47 = vpop.xlane.xlu0 %1903 }
 0x842   : > { %v1916_v48 = vmul.f32 %v5881_v29, %v1904_v47 }
 0x844   : > { %v1918_v49 = vsub.f32 %v1898_v38, %v1916_v48 }
 0x846   : > { %v1920_v52 = vmul.f32 %v1918_v49, %v1918_v49 }
 0x848   : > { %v1922_v34 = vsel %vm1036_vm4, %v1920_v52, 0.0 }
 0x849   : > { %1923 = vadd.xlane.f32.xlu2 %v1922_v34  ;;  %v1908_v53 = vpop.xlane.xlu1 %1907 }
 0x84a   : > { %v1917_v54 = vmul.f32 %v5881_v29, %v1908_v53 }
 0x84c   : > { %v5886_v56 = vsub.f32 %v1899_v50, %v1917_v54  ;;  %v2005_v50 = vld [vmem:[%s6941_s21 + $0x10] sm:$0xff] }
 0x84d   : > { %2036 = vmatpush.msra.mxu3 %v2005_v50 }
 0x84e   : > { %v1921_v58 = vmul.f32 %v5886_v56, %v5886_v56 }
 0x84f   : > { %2037 = vmatpush.msra.mxu3 %v2004_v55 }
 0x850   : > { %v1925_v59 = vsel %vm1905_vm0, %v1921_v58, 0.0 }
 0x851   : > { %1926 = vadd.xlane.f32.xlu0 %v1925_v59  ;;  %2038 = vmatpush.msra.mxu3 %v2003_v44 }
 0x8bc   : > { %v1924_v0 = vpop.xlane.xlu2 %1923 }
 0x8bd   : > { %v1928_v1 = vmul.f32 %v1924_v0, %v5881_v29 }
 0x8bf   : > { %v1930_v2 = vadd.f32 1e-05, %v1928_v1 }
 0x8c1   : > { %5106 = vrsqrt.f32 %v1930_v2  ;;  %vm1938_vm5 = vweird.f32 %v1930_v2 }
 0x8c4   : > { %v1927_v10 = vpop.xlane.xlu0 %1926 }
 0x8c5   : > { %v1929_v12 = vmul.f32 %v1927_v10, %v5881_v29 }
 0x8c7   : > { %v5107_v17 = vpop.eup %5106  ;;  %v1931_v18 = vadd.f32 1e-05, %v1929_v12  ;;  %v4770_v12 = vld [vmem:[%s6933_s13 + $0x38] sm:$0xff] }
 0x8c8   : > { %v1933_v22 = vmul.f32 %v5107_v17, %v1930_v2  ;;  %vm1939_vm2 = vweird.f32 %v5107_v17  ;;  %2137 = vmatpush.msra.mxu0 %v4770_v12 }
 0x8c9   : > { %5108 = vrsqrt.f32 %v1931_v18  ;;  %vm1940_vm11 = vmor %vm1938_vm5, %vm1939_vm2  ;;  %vm1948_vm13 = vweird.f32 %v1931_v18 }
 0x8ca   : > { %v1934_v23 = vmul.f32 %v5107_v17, %v1933_v22  ;;  %2138 = vmatpush.msra.mxu0 %v4769_v16 }
 0x8cc   : > { %v1935_v26 = vmul.f32 0.5, %v1934_v23 }
 0x8ce   : > { %v1936_v28 = vsub.f32 1.5, %v1935_v26 }
 0x8cf   : > { %v5109_v30 = vpop.eup %5108 }
 0x8d0   : > { %v1937_v21 = vmul.f32 %v5107_v17, %v1936_v28  ;;  %v1943_v6 = vmul.f32 %v5109_v30, %v1931_v18  ;;  %vm1949_vm12 = vweird.f32 %v5109_v30  ;;  %v4767_v18 = vld [vmem:[%s6933_s13 + $0x20] sm:$0xff] }
 0x8d1   : > { %vm1950_vm14 = vmor %vm1948_vm13, %vm1949_vm12 }
 0x8d2   : > { %v1941_v9 = vsel %vm1940_vm11, %v5107_v17, %v1937_v21  ;;  %v1944_v11 = vmul.f32 %v5109_v30, %v1943_v6  ;;  %v4768_v17 = vld [vmem:[%s6933_s13 + $0x28] sm:$0xff] }
 0x8d3   : > { %v1952_v13 = vmul.f32 %v1941_v9, %v1918_v49  ;;  %v5052_v49 = vld [vmem:[%s6942_s22] ss:$0 sm:$0xff]  ;;  %2139 = vmatpush.msra.mxu0 %v4768_v17 }
 0x8d4   : > { %v1945_v35 = vmul.f32 0.5, %v1944_v11  ;;  %v5053_v9 = vld [vmem:[%s6943_s23] ss:$0 sm:$0xff] }
 0x8d5   : > { %v1957_v36 = vmul.f32 %v5049_v24, %v1952_v13  ;;  %2140 = vmatpush.msra.mxu0 %v4767_v18 }
 0x8d6   : > { %v1946_v37 = vsub.f32 1.5, %v1945_v35 }
 0x8d7   : > { %v1962_v38 = vadd.f32 %v5050_v15, %v1957_v36 }
 0x8d8   : > { %v1947_v42 = vmul.f32 %v5109_v30, %v1946_v37 }
 0x8d9   : > { %4761 = vmatmul.msk.f32.vlgmr.msra.gmra.mxu2 %vm1036_vm4, %v1962_v38 }
 0x8da   : > { %v1951_v39 = vsel %vm1950_vm14, %v5109_v30, %v1947_v42 }
 0x8db   : > { %v1953_v41 = vmul.f32 %v1951_v39, %v5886_v56 }
 0x8dd   : > { %v1958_v14 = vmul.f32 %v5049_v24, %v1953_v41 }
 0x8df   : > { %v1963_v43 = vadd.f32 %v5050_v15, %v1958_v14  ;;  %v5055_v14 = vld [vmem:[%s6934_s14 + $0x1] ss:$0 sm:$0xff] }
 0x8e1   : > { %4762 = vmatmul.msk.f32.gmra.mxu2 %vm1036_vm4, %v1963_v43 }
 0x95c   : > { %v1995_v45 = vpop.f32.mrf.mxu2 }
 0x95d   : > { %v1996_v33 = vadd.f32 %v5051_v51, %v1995_v45  ;;  %v5214_v45 = vld [vmem:[%s7035_s29] sm:$0xff] }
 0x95f   : > { %v2001_v46 = vmax.f32 %v1996_v33, 0.0 }
 0x961   : > { %2039 = vmatmul.f32.vlgmr.msra.gmra.mxu3 %v2001_v46  ;;  %v5215_v46 = vld [vmem:[%s7037_s6] sm:$0xff] }
 0x964   : > { %v1998_v57 = vpop.f32.mrf.mxu2 }
 0x965   : > { %v1999_v47 = vadd.f32 %v5051_v51, %v1998_v57 }
 0x967   : > { %v2002_v48 = vmax.f32 %v1999_v47, 0.0 }
 0x969   : > { %2042 = vmatmul.f32.gmra.mxu3 %v2002_v48 }
 0x9e4   : > { %v2040_v52 = vpop.f32.mrf.mxu3 }
 0x9e5   : > { %v2041_v34 = vadd.f32 %v5052_v49, %v2040_v52 }
 0x9e7   : > { %v2046_v53 = vadd.f32 %v2041_v34, %v1962_v38  ;;  %v5217_v34 = vld [vmem:[%s7037_s6 + $0x8] sm:$0x7f] }
 0x9e9   : > { %v2050_v54 = vsel %vm1036_vm4, %v2046_v53, 0.0 }
 0x9ea   : > { %2051 = vadd.xlane.f32.xlu1 %v2050_v54 }
 0x9ec   : > { %v2043_v56 = vpop.f32.mrf.mxu3 }
 0x9ed   : > { %v2044_v58 = vadd.f32 %v5052_v49, %v2043_v56  ;;  %v5216_v49 = vld [vmem:[%s7035_s29 + $0x8] sm:$0x7f] }
 0x9ef   : > { %v2047_v59 = vadd.f32 %v2044_v58, %v1963_v43 }
 0x9f1   : > { %v2053_v60 = vsel %vm1905_vm0, %v2047_v59, 0.0 }
 0x9f2   : > { %2054 = vadd.xlane.f32.xlu2 %v2053_v60 }
 0xa5d   : > { %v2052_v61 = vpop.xlane.xlu1 %2051 }
 0xa5e   : > { %v2056_v62 = vmul.f32 %v2052_v61, %v5881_v29 }
 0xa60   : > { %v2058_v63 = vsub.f32 %v2046_v53, %v2056_v62 }
 0xa62   : > { %v2060_v0 = vmul.f32 %v2058_v63, %v2058_v63 }
 0xa64   : > { %v2062_v1 = vsel %vm1036_vm4, %v2060_v0, 0.0 }
 0xa65   : > { %v2055_v2 = vpop.xlane.xlu2 %2054  ;;  %2063 = vadd.xlane.f32.xlu0 %v2062_v1 }
 0xa66   : > { %v2057_v4 = vmul.f32 %v2055_v2, %v5881_v29 }
 0xa68   : > { %v2059_v5 = vsub.f32 %v2047_v59, %v2057_v4 }
 0xa6a   : > { %v2061_v7 = vmul.f32 %v2059_v5, %v2059_v5 }
 0xa6c   : > { %v2065_v10 = vsel %vm1905_vm0, %v2061_v7, 0.0 }
 0xa6d   : > { %2066 = vadd.xlane.f32.xlu1 %v2065_v10 }
 0xad8   : > { %v2064_v20 = vpop.xlane.xlu0 %2063 }
 0xad9   : > { %v2068_v22 = vmul.f32 %v2064_v20, %v5881_v29 }
 0xadb   : > { %v2070_v3 = vadd.f32 1e-05, %v2068_v22 }
 0xadd   : > { %5110 = vrsqrt.f32 %v2070_v3  ;;  %vm2078_vm1 = vweird.f32 %v2070_v3 }
 0xae0   : > { %v2067_v23 = vpop.xlane.xlu1 %2066 }
 0xae1   : > { %v2069_v25 = vmul.f32 %v2067_v23, %v5881_v29 }
 0xae3   : > { %v5111_v26 = vpop.eup %5110  ;;  %v2071_v27 = vadd.f32 1e-05, %v2069_v25 }
 0xae4   : > { %v2073_v28 = vmul.f32 %v5111_v26, %v2070_v3  ;;  %vm2079_vm15 = vweird.f32 %v5111_v26 }
 0xae5   : > { %5112 = vrsqrt.f32 %v2071_v27  ;;  %vm2080_vm2 = vmor %vm2078_vm1, %vm2079_vm15  ;;  %vm2088_vm11 = vweird.f32 %v2071_v27 }
 0xae6   : > { %v2074_v30 = vmul.f32 %v5111_v26, %v2073_v28 }
 0xae8   : > { %v2075_v31 = vmul.f32 0.5, %v2074_v30 }
 0xaea   : > { %v2076_v21 = vsub.f32 1.5, %v2075_v31 }
 0xaeb   : > { %v5113_v6 = vpop.eup %5112 }
 0xaec   : > { %v2077_v24 = vmul.f32 %v5111_v26, %v2076_v21  ;;  %v2083_v8 = vmul.f32 %v5113_v6, %v2071_v27  ;;  %vm2089_vm5 = vweird.f32 %v5113_v6 }
 0xaed   : > { %vm2090_vm12 = vmor %vm2088_vm11, %vm2089_vm5 }
 0xaee   : > { %v2081_v11 = vsel %vm2080_vm2, %v5111_v26, %v2077_v24  ;;  %v2084_v13 = vmul.f32 %v5113_v6, %v2083_v8 }
 0xaef   : > { %v2092_v15 = vmul.f32 %v2081_v11, %v2058_v63 }
 0xaf0   : > { %v2085_v35 = vmul.f32 0.5, %v2084_v13 }
 0xaf1   : > { %v2097_v36 = vmul.f32 %v5053_v9, %v2092_v15  ;;  %v4763_v15 = vld [vmem:[%s6935_s15 + $0x20] sm:$0xff] }
 0xaf2   : > { %v2086_v32 = vsub.f32 1.5, %v2085_v35  ;;  %2333 = vmatpush.msra.mxu1 %v4763_v15 }
 0xaf3   : > { %v5994_v37 = vadd.f32 %v5054_v19, %v2097_v36 }
 0xaf4   : > { %v2087_v38 = vmul.f32 %v5113_v6, %v2086_v32 }
 0xaf5   : > { %4772 = vmatmul.msk.f32.vlgmr.msra.gmra.mxu0 %vm1036_vm4, %v5994_v37 }
 0xaf6   : > { %v2091_v40 = vsel %vm2090_vm12, %v5113_v6, %v2087_v38 }
 0xaf7   : > { %v2093_v42 = vmul.f32 %v2091_v40, %v2059_v5 }
 0xaf9   : > { %v2098_v39 = vmul.f32 %v5053_v9, %v2093_v42 }
 0xafb   : > { %v5998_v41 = vadd.f32 %v5054_v19, %v2098_v39 }
 0xafd   : > { %4773 = vmatmul.msk.f32.gmra.mxu0 %vm1036_vm4, %v5998_v41 }
 0xb72   : > { %v2142_v43 = vpop.f32.mrf.mxu0 }
 0xb73   : > { %v6005_v50 = vadd.f32 %v5055_v14, %v2142_v43 }
 0xb75   : > { %4774 = vmatmul.msk.f32.vlgmr.msrb.gmra.mxu1 %vm1233_vm6, %v6005_v50  ;;  %v2148_v33 = vmul.f32 %v5214_v45, %v6005_v50 }
 0xb7a   : > { %v2145_v55 = vpop.f32.mrf.mxu0 }
 0xb7b   : > { %v6009_v44 = vadd.f32 %v5055_v14, %v2145_v55 }
 0xb7d   : > { %4775 = vmatmul.msk.f32.gmra.mxu1 %vm1233_vm6, %v6009_v44  ;;  %v2149_v52 = vmul.f32 %v5216_v49, %v6009_v44 }
 0xbf2   : > { %v2173_v51 = vpop.f32.mrf.mxu1 }
 0xbf3   : > { %v2179_v57 = vmul.f32 %v5215_v46, %v2173_v51 }
 0xbf5   : > { %v6020_v47 = vadd.f32 %v2179_v57, %v2148_v33 }
 0xbf7   : > { %2191 = vrot.lane.b32.xlu0 %v6020_v47, %s6979_s10 }
 0xbfa   : > { %v2176_v48 = vpop.f32.mrf.mxu1 }
 0xbfb   : > { %v2180_v53 = vmul.f32 %v5217_v34, %v2176_v48 }
 0xbfd   : > { %v6031_v54 = vadd.f32 %v2180_v53, %v2149_v52 }
 0xbff   : > { %2347 = vrot.lane.b32.xlu0 %v6020_v47, %s7039_s11  ;;  %2349 = vrot.lane.b32.xlu1 %v6031_v54, %s7039_s11 }
 0xc00   : > { %2193 = vrot.lane.b32.xlu2 %v6031_v54, %s6979_s10  ;;  %s7050_s10 = smov 40  }
 0xc07   : > { %2345 = vrot.lane.b32.xlu1 %v6031_v54, %s7040_s0 }
 0xc08   : > { %2343 = vrot.lane.b32.xlu2 %v6020_v47, %s7040_s0 }
 0xc5a   : > { %v2194_v56 = vpop.permute.xlu2 %2193 }
 0xc5b   : > { %4777 = vmatpush.xpose.msk.msrb.mxu2 %vm1278_vm7, %v2194_v56 }
 0xc62   : > { %v2344_v61 = vpop.permute.xlu2 %2343 }
 0xc69   : > { %v2192_v58 = vpop.permute.xlu0 %2191 }
 0xc6a   : > { %4778 = vmatpush.xpose.msk.msrb.mxu2 %vm1278_vm7, %v2192_v58 }
 0xc6d   : > { %4779 = vmatmul.msk.f32.vlgmr.msrb.gmra.mxu2 %vm1278_vm7, %v6020_v47 }
 0xc71   : > { %v2350_v59 = vpop.permute.xlu1 %2349  ;;  %v2348_v60 = vpop.permute.xlu0 %2347 }
 0xc72   : > { %4786 = vmatpush.xpose.msk.msra.mxu2 %vm1278_vm7, %v2350_v59 }
 0xc75   : > { %4780 = vmatmul.msk.f32.gmra.mxu2 %vm1278_vm7, %v6031_v54 }
 0xc76   : > { %4787 = vmatpush.xpose.msk.msra.mxu2 %vm1278_vm7, %v2348_v60 }
 0xc79   : > { %v2346_v62 = vpop.permute.xlu1 %2345 }
 0xc7d   : > { %4788 = vmatmul.msk.f32.vlgmr.msra.gmra.mxu2 %vm1278_vm7, %v2344_v61 }
 0xc85   : > { %4789 = vmatmul.msk.f32.gmra.mxu2 %vm1278_vm7, %v2346_v62 }
 0xcf0   : > { %v2220_v63 = vpop.f32.mrf.mxu2 }
 0xcf1   : > { %v2226_v0 = vsel %vm1310_vm8, %v2220_v63, -inf }
 0xcf2   : > { %2227 = vmax.xlane.f32.xlu0 %v2226_v0 }
 0xcf8   : > { %v2223_v1 = vpop.f32.mrf.mxu2 }
 0xcf9   : > { %v2229_v2 = vsel %vm1314_vm9, %v2223_v1, -inf }
 0xcfa   : > { %2230 = vmax.xlane.f32.xlu1 %v2229_v2 }
 0xd00   : > { %v2376_v4 = vpop.f32.mrf.mxu2 }
 0xd01   : > { %v2382_v5 = vsel %vm1310_vm8, %v2376_v4, -inf }
 0xd02   : > { %2383 = vmax.xlane.f32.xlu2 %v2382_v5 }
 0xd08   : > { %v2379_v7 = vpop.f32.mrf.mxu2 }
 0xd09   : > { %v2385_v10 = vsel %vm1314_vm9, %v2379_v7, -inf }
 0xd0a   : > { %2386 = vmax.xlane.f32.xlu0 %v2385_v10 }
 0xd65   : > { %v2228_v12 = vpop.xlane.xlu0 %2227 }
 0xd66   : > { %v2232_v16 = vsub.f32 %v2220_v63, %v2228_v12 }
 0xd68   : > { %v2234_v17 = vmul.f32 1.442695, %v2232_v16 }
 0xd6a   : > { %5114 = vpow2.f32 %v2234_v17 }
 0xd6d   : > { %v2231_v18 = vpop.xlane.xlu1 %2230 }
 0xd6e   : > { %v2233_v20 = vsub.f32 %v2223_v1, %v2231_v18 }
 0xd70   : > { %v6057_v22 = vpop.eup %5114  ;;  %v2236_v3 = vmul.f32 1.442695, %v2233_v20 }
 0xd71   : > { %v2238_v23 = vsel %vm1310_vm8, %v6057_v22, 0.0 }
 0xd72   : > { %5116 = vpow2.f32 %v2236_v3  ;;  %2239 = vadd.xlane.f32.xlu2 %v2238_v23 }
 0xd75   : > { %v2384_v25 = vpop.xlane.xlu2 %2383 }
 0xd76   : > { %v2388_v26 = vsub.f32 %v2376_v4, %v2384_v25 }
 0xd78   : > { %v6061_v27 = vpop.eup %5116  ;;  %v2390_v28 = vmul.f32 1.442695, %v2388_v26 }
 0xd79   : > { %v2241_v30 = vsel %vm1314_vm9, %v6061_v27, 0.0 }
 0xd7a   : > { %5118 = vpow2.f32 %v2390_v28  ;;  %2242 = vadd.xlane.f32.xlu0 %v2241_v30 }
 0xd7d   : > { %v2387_v31 = vpop.xlane.xlu0 %2386 }
 0xd7e   : > { %v2389_v21 = vsub.f32 %v2379_v7, %v2387_v31  ;;  %v4764_v31 = vld [vmem:[%s6935_s15 + $0x28] sm:$0xff] }
 0xd80   : > { %v6065_v6 = vpop.eup %5118  ;;  %v2392_v24 = vmul.f32 1.442695, %v2389_v21 }
 0xd81   : > { %v2394_v8 = vsel %vm1310_vm8, %v6065_v6, 0.0 }
 0xd82   : > { %5120 = vpow2.f32 %v2392_v24  ;;  %2395 = vadd.xlane.f32.xlu1 %v2394_v8 }
 0xd88   : > { %v6069_v9 = vpop.eup %5120 }
 0xd89   : > { %v2397_v11 = vsel %vm1314_vm9, %v6069_v9, 0.0 }
 0xd8a   : > { %2398 = vadd.xlane.f32.xlu2 %v2397_v11 }
 0xd8e   : > { %2276 = vrot.lane.b32.xlu0 %v6005_v50, %s7041_s5 }
 0xd96   : > { %2432 = vrot.lane.b32.xlu0 %v6005_v50, %s7042_s3 }
 0xd9b   : > { %2278 = vrot.lane.b32.xlu1 %v6009_v44, %s7041_s5 }
 0xd9e   : > { %2499 = vrot.lane.b32.xlu0 %v6020_v47, %s7043_s8 }
 0xda2   : > { %2434 = vrot.lane.b32.xlu2 %v6009_v44, %s7042_s3 }
 0xda3   : > { %2505 = vrot.lane.b32.xlu1 %v6031_v54, %s7044_s2 }
 0xda6   : > { %2501 = vrot.lane.b32.xlu0 %v6031_v54, %s7043_s8 }
 0xdaa   : > { %2503 = vrot.lane.b32.xlu2 %v6020_v47, %s7044_s2 }
 0xdab   : > { %2661 = vrot.lane.b32.xlu1 %v6031_v54, %s7045_s7 }
 0xdb2   : > { %2659 = vrot.lane.b32.xlu2 %v6020_v47, %s7045_s7 }
 0xdb3   : > { %2655 = vrot.lane.b32.xlu1 %v6020_v47, %s7046_s30 }
 0xdba   : > { %2657 = vrot.lane.b32.xlu2 %v6031_v54, %s7046_s30  ;;  %s7053_s30 = sld [smem:[#allocation29_spill]] }
 0xde5   : > { %v2240_v13 = vpop.xlane.xlu2 %2239 }
 0xde6   : > { %5122 = vrcp.f32 %v2240_v13  ;;  %vm2249_vm5 = vweird.f32 %v2240_v13  ;;  %v2255_v58 = vand.u32 2147483648, %v2240_v13  ;;  %v2253_v61 = vand.u32 2147483647, %v2240_v13 }
 0xde8   : > { %v2256_v10 = vor.u32 1.1754944e-38, %v2255_v58 }
 0xdec   : > { %v5123_v19 = vpop.eup %5122 }
 0xded   : > { %v6100_v35 = vpop.xlane.xlu0 %2242  ;;  %v2245_v32 = vmul.f32 %v5123_v19, %v2240_v13  ;;  %vm2250_vm15 = vweird.f32 %v5123_v19 }
 0xdee   : > { %vm6108_vm11 = vmor %vm2249_vm5, %vm2250_vm15  ;;  %v2270_v23 = vand.u32 2147483648, %v6100_v35  ;;  %vm2264_vm5 = vweird.f32 %v6100_v35  ;;  %v2268_v30 = vand.u32 2147483647, %v6100_v35 }
 0xdef   : > { %v2246_v40 = vsub.f32 1.0, %v2245_v32 }
 0xdf1   : > { %v2247_v55 = vmul.f32 %v5123_v19, %v2246_v40 }
 0xdf3   : > { %v2248_v49 = vadd.f32 %v5123_v19, %v2247_v55 }
 0xdf5   : > { %v2396_v36 = vpop.xlane.xlu1 %2395  ;;  %v2252_v0 = vsel %vm6108_vm11, %v5123_v19, %v2248_v49 }
 0xdf6   : > { %5124 = vrcp.f32 %v2396_v36  ;;  %v2411_v51 = vand.u32 2147483648, %v2396_v36  ;;  %v2409_v57 = vand.u32 2147483647, %v2396_v36  ;;  %vm2405_vm14 = vweird.f32 %v2396_v36 }
 0xdf7   : > { %5126 = vrcp.f32 %v6100_v35 }
 0xdf8   : > { %v2412_v52 = vor.u32 1.1754944e-38, %v2411_v51  ;;  %vm2410_vm2 = vcmp.eq.f32.partialorder %v2409_v57, 8.507059e+37 }
 0xdfc   : > { %v5125_v38 = vpop.eup %5124 }
 0xdfd   : > { %v2401_v42 = vmul.f32 %v5125_v38, %v2396_v36  ;;  %v2399_v39 = vpop.xlane.xlu2 %2398  ;;  %v6103_v14 = vpop.eup %5126  ;;  %vm2406_vm13 = vweird.f32 %v5125_v38 }
 0xdfe   : > { %5128 = vrcp.f32 %v2399_v39  ;;  %v2260_v33 = vmul.f32 %v6103_v14, %v6100_v35  ;;  %vm2407_vm1 = vmor %vm2405_vm14, %vm2406_vm13  ;;  %v2426_v1 = vand.u32 2147483648, %v2399_v39  ;;  %v2424_v7 = vand.u32 2147483647, %v2399_v39 }
 0xdff   : > { %v2402_v43 = vsub.f32 1.0, %v2401_v42  ;;  %vm2254_vm13 = vcmp.eq.f32.partialorder %v2253_v61, 8.507059e+37  ;;  %vm2420_vm14 = vweird.f32 %v2399_v39  ;;  %v5056_v42 = vld [vmem:[%s7038_s16 + $0x1] ss:$0 sm:$0xff] }
 0xe00   : > { %v2277_v45 = vpop.permute.xlu0 %2276  ;;  %v2261_v34 = vsub.f32 1.0, %v2260_v33  ;;  %v2257_v16 = vsel %vm2254_vm13, %v2256_v10, %v2252_v0  ;;  %v2427_v17 = vor.u32 1.1754944e-38, %v2426_v1 }
 0xe01   : > { %v2403_v46 = vmul.f32 %v5125_v38, %v2402_v43  ;;  %v2274_v26 = vmul.f32 %v6057_v22, %v2257_v16 }
 0xe02   : > { %v2262_v4 = vmul.f32 %v6103_v14, %v2261_v34 }
 0xe03   : > { %v2404_v47 = vadd.f32 %v5125_v38, %v2403_v46 }
 0xe04   : > { %v5129_v48 = vpop.eup %5128  ;;  %v2263_v3 = vadd.f32 %v6103_v14, %v2262_v4 }
 0xe05   : > { %v2408_v53 = vsel %vm2407_vm1, %v5125_v38, %v2404_v47  ;;  %v2416_v54 = vmul.f32 %v5129_v48, %v2399_v39  ;;  %v2435_v56 = vpop.permute.xlu2 %2434  ;;  %vm2421_vm12 = vweird.f32 %v5129_v48  ;;  %vm2425_vm1 = vcmp.eq.f32.partialorder %v2424_v7, 8.507059e+37 }
 0xe06   : > { %v2413_v59 = vsel %vm2410_vm2, %v2412_v52, %v2408_v53  ;;  %4790 = vmatpush.msk.msrb.mxu3 %vm1373_vm10, %v2435_v56  ;;  %vm2422_vm15 = vmor %vm2420_vm14, %vm2421_vm12  ;;  %vm2265_vm2 = vweird.f32 %v6103_v14  ;;  %vm2269_vm12 = vcmp.eq.f32.partialorder %v2268_v30, 8.507059e+37 }
 0xe07   : > { %v2417_v62 = vsub.f32 1.0, %v2416_v54  ;;  %v2430_v63 = vmul.f32 %v6065_v6, %v2413_v59  ;;  %vm2266_vm11 = vmor %vm2264_vm5, %vm2265_vm2  ;;  %v2271_v6 = vor.u32 1.1754944e-38, %v2270_v23 }
 0xe08   : > { %v2433_v2 = vpop.permute.xlu0 %2432  ;;  %v2267_v21 = vsel %vm2266_vm11, %v6103_v14, %v2263_v3 }
 0xe09   : > { %v2418_v5 = vmul.f32 %v5129_v48, %v2417_v62  ;;  %2460 = vmatpush.msrb.mxu3 %v2433_v2  ;;  %v2272_v22 = vsel %vm2269_vm12, %v2271_v6, %v2267_v21 }
 0xe0a   : > { %4791 = vmatmul.msk.f32.vlgmr.msrb.gmra.mxu3 %vm1310_vm8, %v2430_v63 }
 0xe0b   : > { %v2419_v12 = vadd.f32 %v5129_v48, %v2418_v5 }
 0xe0d   : > { %v2279_v18 = vpop.permute.xlu1 %2278  ;;  %v2423_v20 = vsel %vm2422_vm15, %v5129_v48, %v2419_v12  ;;  %v2504_v8 = vpop.permute.xlu2 %2503 }
 0xe0e   : > { %4781 = vmatpush.msk.msrb.mxu0 %vm1373_vm10, %v2279_v18  ;;  %v2428_v25 = vsel %vm2425_vm1, %v2427_v17, %v2423_v20 }
 0xe0f   : > { %v2431_v28 = vmul.f32 %v6069_v9, %v2428_v25  ;;  %v2275_v9 = vmul.f32 %v6061_v27, %v2272_v22 }
 0xe10   : > { %2304 = vmatpush.msrb.mxu0 %v2277_v45  ;;  %v2500_v27 = vpop.permute.xlu0 %2499 }
 0xe11   : > { %4782 = vmatmul.msk.f32.vlgmr.msrb.gmra.mxu0 %vm1310_vm8, %v2274_v26 }
 0xe12   : > { %4792 = vmatmul.msk.f32.gmra.mxu3 %vm1310_vm8, %v2431_v28  ;;  %2489 = vmatpush.msra.mxu0 %v4764_v31 }
 0xe15   : > { %v2506_v24 = vpop.permute.xlu1 %2505  ;;  %v2660_v13 = vpop.permute.xlu2 %2659 }
 0xe16   : > { %4795 = vmatpush.xpose.msk.msrb.mxu1 %vm1278_vm7, %v2506_v24 }
 0xe18   : > { %v2502_v40 = vpop.permute.xlu0 %2501 }
 0xe19   : > { %4783 = vmatmul.msk.f32.gmra.mxu0 %vm1310_vm8, %v2275_v9 }
 0xe1a   : > { %4796 = vmatpush.xpose.msk.msrb.mxu1 %vm1278_vm7, %v2504_v8 }
 0xe1d   : > { %v2662_v11 = vpop.permute.xlu1 %2661  ;;  %v2658_v38 = vpop.permute.xlu2 %2657 }
 0xe1e   : > { %4804 = vmatpush.xpose.msk.msrb.mxu0 %vm1278_vm7, %v2662_v11 }
 0xe22   : > { %4805 = vmatpush.xpose.msk.msrb.mxu0 %vm1278_vm7, %v2660_v13 }
 0xe25   : > { %v2656_v32 = vpop.permute.xlu1 %2655 }
 0xe8d   : > { %v2462_v15 = vpop.f32.mrf.mxu3 }
 0xe8e   : > { %v2306_v19 = vpop.f32.mrf.mxu0  ;;  %4793 = vmatmul.msk.f32.vlgmr.msra.gmra.mxu0 %vm1278_vm7, %v2462_v15 }
 0xe8f   : > { %4784 = vmatmul.msk.f32.vlgmr.msra.gmra.mxu1 %vm1278_vm7, %v2306_v19 }
 0xe95   : > { %v2465_v35 = vpop.f32.mrf.mxu3 }
 0xe96   : > { %v2309_v36 = vpop.f32.mrf.mxu0  ;;  %4794 = vmatmul.msk.f32.gmra.mxu0 %vm1278_vm7, %v2465_v35 }
 0xe97   : > { %4785 = vmatmul.msk.f32.gmra.mxu1 %vm1278_vm7, %v2309_v36 }
 0xe9e   : > { %4806 = vmatmul.msk.f32.vlgmr.msrb.gmra.mxu0 %vm1278_vm7, %v2656_v32 }
 0xe9f   : > { %4797 = vmatmul.msk.f32.vlgmr.msrb.gmra.mxu1 %vm1278_vm7, %v2500_v27 }
 0xea6   : > { %4807 = vmatmul.msk.f32.gmra.mxu0 %vm1278_vm7, %v2658_v38 }
 0xea7   : > { %4798 = vmatmul.msk.f32.gmra.mxu1 %vm1278_vm7, %v2502_v40 }
 0xf0b   : > { %v2491_v39 = vpop.f32.mrf.mxu0 }
 0xf0c   : > { %v2335_v14 = vpop.f32.mrf.mxu1 }
 0xf0d   : > { %v2341_v43 = vadd.f32 %v5056_v42, %v2335_v14 }
 0xf0f   : > { %v6148_v55 = vadd.f32 %v2491_v39, %v2341_v43 }
 0xf13   : > { %v2494_v51 = vpop.f32.mrf.mxu0 }
 0xf14   : > { %v2338_v45 = vpop.f32.mrf.mxu1 }
 0xf15   : > { %v2342_v33 = vadd.f32 %v5056_v42, %v2338_v45 }
 0xf17   : > { %v6150_v46 = vadd.f32 %v2494_v51, %v2342_v33 }
 0xf1b   : > { %v2688_v57 = vpop.f32.mrf.mxu0 }
 0xf1c   : > { %v2532_v47 = vpop.f32.mrf.mxu1  ;;  %v2694_v48 = vsel %vm1310_vm8, %v2688_v57, -inf }
 0xf1d   : > { %2695 = vmax.xlane.f32.xlu2 %v2694_v48  ;;  %v2538_v49 = vsel %vm1310_vm8, %v2532_v47, -inf }
 0xf1e   : > { %2539 = vmax.xlane.f32.xlu0 %v2538_v49 }
 0xf23   : > { %v2691_v52 = vpop.f32.mrf.mxu0 }
 0xf24   : > { %v2535_v34 = vpop.f32.mrf.mxu1  ;;  %v2697_v53 = vsel %vm1314_vm9, %v2691_v52, -inf }
 0xf25   : > { %v2541_v54 = vsel %vm1314_vm9, %v2535_v34, -inf }
 0xf26   : > { %2698 = vmax.xlane.f32.xlu0 %v2697_v53  ;;  %2542 = vmax.xlane.f32.xlu1 %v2541_v54 }
 0xf3a   : > { %2588 = vrot.lane.b32.xlu0 %v6005_v50, %s7049_s28 }
 0xf90   : > { %v2696_v56 = vpop.xlane.xlu2 %2695 }
 0xf91   : > { %v2700_v58 = vsub.f32 %v2688_v57, %v2696_v56  ;;  %v2540_v59 = vpop.xlane.xlu0 %2539 }
 0xf92   : > { %v2544_v60 = vsub.f32 %v2532_v47, %v2540_v59 }
 0xf93   : > { %v2702_v61 = vmul.f32 1.442695, %v2700_v58 }
 0xf94   : > { %v2546_v62 = vmul.f32 1.442695, %v2544_v60 }
 0xf95   : > { %5130 = vpow2.f32 %v2702_v61 }
 0xf96   : > { %5132 = vpow2.f32 %v2546_v62 }
 0xf99   : > { %v2543_v63 = vpop.xlane.xlu1 %2542  ;;  %v2699_v0 = vpop.xlane.xlu0 %2698 }
 0xf9a   : > { %v2545_v1 = vsub.f32 %v2535_v34, %v2543_v63  ;;  %v2701_v2 = vsub.f32 %v2691_v52, %v2699_v0 }
 0xf9b   : > { %v5131_v4 = vpop.eup %5130 }
 0xf9c   : > { %v6158_v5 = vpop.eup %5132  ;;  %v2548_v7 = vmul.f32 1.442695, %v2545_v1  ;;  %v2704_v10 = vmul.f32 1.442695, %v2701_v2  ;;  %v2706_v12 = vsel %vm1310_vm8, %v5131_v4, 0.0 }
 0xf9d   : > { %2707 = vadd.xlane.f32.xlu0 %v2706_v12  ;;  %v2550_v16 = vsel %vm1310_vm8, %v6158_v5, 0.0  ;;  %v4766_v12 = vld [vmem:[%s6935_s15 + $0x38] sm:$0xff] }
 0xf9e   : > { %5134 = vpow2.f32 %v2548_v7  ;;  %2551 = vadd.xlane.f32.xlu2 %v2550_v16  ;;  %v5219_v16 = vld [vmem:[%s6932_s12 + $0x30] sm:$0xff] }
 0xf9f   : > { %5136 = vpow2.f32 %v2704_v10 }
 0xfa4   : > { %v6163_v17 = vpop.eup %5134 }
 0xfa5   : > { %v6165_v18 = vpop.eup %5136  ;;  %v2553_v20 = vsel %vm1314_vm9, %v6163_v17, 0.0 }
 0xfa6   : > { %2554 = vadd.xlane.f32.xlu1 %v2553_v20  ;;  %v2709_v3 = vsel %vm1314_vm9, %v6165_v18, 0.0  ;;  %v4765_v20 = vld [vmem:[%s6935_s15 + $0x30] sm:$0xff] }
 0xfa7   : > { %2710 = vadd.xlane.f32.xlu2 %v2709_v3  ;;  %2645 = vmatpush.msra.mxu3 %v4765_v20  ;;  %v5222_v3 = vld [vmem:[%s6932_s12 + $0x18] sm:$0xff]  ;;  %v5058_v20 = vld [vmem:[%s6938_s18 + $0x1] ss:$0 sm:$0xff] }
 0xfac   : > { %v6177_v23 = vpop.permute.xlu0 %2588 }
 0xfb1   : > { %2744 = vrot.lane.b32.xlu0 %v6005_v50, %s7050_s10 }
 0xfbf   : > { %2746 = vrot.lane.b32.xlu2 %v6009_v44, %s7050_s10  ;;  %2590 = vrot.lane.b32.xlu1 %v6009_v44, %s7049_s28  ;;  %s7051_s28 = smov 96   ;;  %s7060_s10 = smov 40  }
0x1010   : > { %v2708_v25 = vpop.xlane.xlu0 %2707 }
0x1011   : > { %5138 = vrcp.f32 %v2708_v25  ;;  %v2552_v26 = vpop.xlane.xlu2 %2551  ;;  %v2723_v50 = vand.u32 2147483648, %v2708_v25  ;;  %v2721_v8 = vand.u32 2147483647, %v2708_v25  ;;  %vm2717_vm14 = vweird.f32 %v2708_v25 }
0x1012   : > { %5140 = vrcp.f32 %v2552_v26  ;;  %v2567_v49 = vand.u32 2147483648, %v2552_v26  ;;  %v2565_v34 = vand.u32 2147483647, %v2552_v26 }
0x1013   : > { %v2724_v11 = vor.u32 1.1754944e-38, %v2723_v50  ;;  %vm2722_vm1 = vcmp.eq.f32.partialorder %v2721_v8, 8.507059e+37 }
0x1014   : > { %v2568_v59 = vor.u32 1.1754944e-38, %v2567_v49  ;;  %v4835_v49 = vld [vmem:[%s6941_s21 + $0xe8] sm:$0xff] }
0x1017   : > { %v5139_v28 = vpop.eup %5138 }
0x1018   : > { %v2713_v30 = vmul.f32 %v5139_v28, %v2708_v25  ;;  %v5141_v21 = vpop.eup %5140  ;;  %vm2718_vm13 = vweird.f32 %v5139_v28  ;;  %v5224_v25 = vld [vmem:[%s6932_s12 + $0x8] sm:$0xff] }
0x1019   : > { %v6179_v31 = vpop.xlane.xlu1 %2554  ;;  %v2557_v44 = vmul.f32 %v5141_v21, %v2552_v26  ;;  %vm2719_vm15 = vmor %vm2717_vm14, %vm2718_vm13  ;;  %vm2562_vm11 = vweird.f32 %v5141_v21  ;;  %vm2561_vm14 = vweird.f32 %v2552_v26  ;;  %v5225_v26 = vld [vmem:[%s6932_s12] sm:$0xff] }
0x101a   : > { %v2714_v6 = vsub.f32 1.0, %v2713_v30  ;;  %v2711_v22 = vpop.xlane.xlu2 %2710  ;;  %v2582_v63 = vand.u32 2147483648, %v6179_v31  ;;  %v2580_v1 = vand.u32 2147483647, %v6179_v31 }
0x101b   : > { %5142 = vrcp.f32 %v2711_v22  ;;  %v2558_v35 = vsub.f32 1.0, %v2557_v44  ;;  %v2738_v43 = vand.u32 2147483648, %v2711_v22  ;;  %v2736_v45 = vand.u32 2147483647, %v2711_v22 }
0x101c   : > { %v2715_v24 = vmul.f32 %v5139_v28, %v2714_v6  ;;  %5144 = vrcp.f32 %v6179_v31  ;;  %vm2732_vm5 = vweird.f32 %v2711_v22 }
0x101d   : > { %v2559_v39 = vmul.f32 %v5141_v21, %v2558_v35  ;;  %v2739_v48 = vor.u32 1.1754944e-38, %v2738_v43  ;;  %vm2737_vm13 = vcmp.eq.f32.partialorder %v2736_v45, 8.507059e+37  ;;  %v4816_v43 = vld [vmem:[%s6939_s19 + $0x28] sm:$0xff] }
0x101e   : > { %v2716_v9 = vadd.f32 %v5139_v28, %v2715_v24 }
0x101f   : > { %v2560_v57 = vadd.f32 %v5141_v21, %v2559_v39  ;;  %v4818_v39 = vld [vmem:[%s6939_s19 + $0x38] sm:$0xff] }
0x1020   : > { %v2720_v13 = vsel %vm2719_vm15, %v5139_v28, %v2716_v9  ;;  %vm2563_vm15 = vmor %vm2561_vm14, %vm2562_vm11  ;;  %vm2581_vm11 = vcmp.eq.f32.partialorder %v2580_v1, 8.507059e+37  ;;  %2899 = vmatpush.msrb.mxu3 %v4818_v39 }
0x1021   : > { %v5143_v15 = vpop.eup %5142  ;;  %v2725_v19 = vsel %vm2722_vm1, %v2724_v11, %v2720_v13  ;;  %v2564_v56 = vsel %vm2563_vm15, %v5141_v21, %v2560_v57  ;;  %vm2566_vm1 = vcmp.eq.f32.partialorder %v2565_v34, 8.507059e+37 }
0x1022   : > { %v5145_v36 = vpop.eup %5144  ;;  %v2728_v27 = vmul.f32 %v5143_v15, %v2711_v22  ;;  %v2747_v32 = vpop.permute.xlu2 %2746  ;;  %v2742_v38 = vmul.f32 %v5131_v4, %v2725_v19  ;;  %vm2733_vm2 = vweird.f32 %v5143_v15  ;;  %v2569_v60 = vsel %vm2566_vm1, %v2568_v59, %v2564_v56 }
0x1023   : > { %4808 = vmatpush.msk.msra.mxu1 %vm1373_vm10, %v2747_v32  ;;  %v2745_v40 = vpop.permute.xlu0 %2744  ;;  %v2572_v14 = vmul.f32 %v5145_v36, %v6179_v31  ;;  %vm2734_vm12 = vmor %vm2732_vm5, %vm2733_vm2  ;;  %vm2577_vm3 = vweird.f32 %v5145_v36  ;;  %vm2576_vm2 = vweird.f32 %v6179_v31  ;;  %v2586_v0 = vmul.f32 %v6158_v5, %v2569_v60  ;;  %v5218_v5 = vld [vmem:[%s6932_s12 + $0x38] sm:$0xff]  ;;  %v4832_v60 = vld [vmem:[%s6941_s21 + $0xd0] sm:$0xff] }
0x1024   : > { %v2729_v42 = vsub.f32 1.0, %v2728_v27  ;;  %vm2578_vm5 = vmor %vm2576_vm2, %vm2577_vm3  ;;  %v2583_v4 = vor.u32 1.1754944e-38, %v2582_v63 }
0x1025   : > { %2772 = vmatpush.msra.mxu1 %v2745_v40  ;;  %v2573_v47 = vsub.f32 1.0, %v2572_v14  ;;  %v4817_v14 = vld [vmem:[%s6939_s19 + $0x30] sm:$0xff] }
0x1026   : > { %v2730_v51 = vmul.f32 %v5143_v15, %v2729_v42  ;;  %4809 = vmatmul.msk.f32.vlgmr.msra.gmra.mxu1 %vm1310_vm8, %v2742_v38  ;;  %2900 = vmatpush.msrb.mxu3 %v4817_v14 }
0x1027   : > { %v2574_v58 = vmul.f32 %v5145_v36, %v2573_v47  ;;  %v4837_v47 = vld [vmem:[%s6941_s21 + $0xf8] sm:$0xff] }
0x1028   : > { %v2731_v33 = vadd.f32 %v5143_v15, %v2730_v51  ;;  %2901 = vmatpush.msrb.mxu3 %v4816_v43  ;;  %v4815_v51 = vld [vmem:[%s6939_s19 + $0x20] sm:$0xff]  ;;  %2934 = vmatpush.msra.mxu0 %v4837_v47 }
0x1029   : > { %v2575_v62 = vadd.f32 %v5145_v36, %v2574_v58  ;;  %v4833_v58 = vld [vmem:[%s6941_s21 + $0xd8] sm:$0xff] }
0x102a   : > { %v2735_v52 = vsel %vm2734_vm12, %v5143_v15, %v2731_v33  ;;  %2902 = vmatpush.msrb.mxu3 %v4815_v51 }
0x102b   : > { %v2740_v53 = vsel %vm2737_vm13, %v2739_v48, %v2735_v52  ;;  %v2579_v2 = vsel %vm2578_vm5, %v5145_v36, %v2575_v62  ;;  %v4836_v48 = vld [vmem:[%s6941_s21 + $0xf0] sm:$0xff]  ;;  %v4831_v62 = vld [vmem:[%s6941_s21 + $0xc8] sm:$0xff] }
0x102c   : > { %v2743_v54 = vmul.f32 %v6165_v18, %v2740_v53  ;;  %v2584_v7 = vsel %vm2581_vm11, %v2583_v4, %v2579_v2  ;;  %v5221_v18 = vld [vmem:[%s6932_s12 + $0x20] sm:$0xff]  ;;  %2935 = vmatpush.msra.mxu0 %v4836_v48  ;;  %v4829_v4 = vld [vmem:[%s6941_s21 + $0xb8] sm:$0xff] }
0x102d   : > { %v2587_v10 = vmul.f32 %v6163_v17, %v2584_v7  ;;  %v5220_v17 = vld [vmem:[%s6932_s12 + $0x28] sm:$0xff]  ;;  %v4834_v53 = vld [vmem:[%s6941_s21 + $0xe0] sm:$0xff] }
0x102e   : > { %4810 = vmatmul.msk.f32.gmra.mxu1 %vm1310_vm8, %v2743_v54  ;;  %2936 = vmatpush.msra.mxu0 %v4835_v49 }
0x1030   : > { %2937 = vmatpush.msra.mxu0 %v4834_v53  ;;  %v4847_v53 = vld [vmem:[%s6933_s13 + $0x50] sm:$0xff] }
0x1031   : > { %v2591_v61 = vpop.permute.xlu1 %2590 }
0x1032   : > { %4799 = vmatpush.msk.msrb.mxu2 %vm1373_vm10, %v2591_v61  ;;  %2938 = vmatpush.msra.mxu0 %v4833_v58 }
0x1034   : > { %2616 = vmatpush.msrb.mxu2 %v6177_v23  ;;  %v5223_v23 = vld [vmem:[%s6932_s12 + $0x10] sm:$0xff]  ;;  %2939 = vmatpush.msra.mxu0 %v4832_v60 }
0x1035   : > { %4800 = vmatmul.msk.f32.vlgmr.msrb.gmra.mxu2 %vm1310_vm8, %v2586_v0  ;;  %v4830_v0 = vld [vmem:[%s6941_s21 + $0xc0] sm:$0xff] }
0x1036   : > { %2801 = vmatpush.msra.mxu2 %v4766_v12  ;;  %2940 = vmatpush.msra.mxu0 %v4831_v62  ;;  %v5057_v12 = vld [vmem:[%s6937_s17 + $0x1] ss:$0 sm:$0xff] }
0x1038   : > { %3077 = vmatpush.msrb.mxu2 %v5218_v5  ;;  %2941 = vmatpush.msra.mxu0 %v4830_v0  ;;  %v4828_v5 = vld [vmem:[%s6941_s21 + $0xb0] sm:$0xff] }
0x103a   : > { %3078 = vmatpush.msrb.mxu2 %v5219_v16  ;;  %2942 = vmatpush.msra.mxu0 %v4829_v4 }
0x103c   : > { %3079 = vmatpush.msrb.mxu2 %v5220_v17  ;;  %2943 = vmatpush.msra.mxu0 %v4828_v5 }
0x103d   : > { %4801 = vmatmul.msk.f32.gmra.mxu2 %vm1310_vm8, %v2587_v10 }
0x103e   : > { %3080 = vmatpush.msrb.mxu2 %v5221_v18 }
0x1040   : > { %3081 = vmatpush.msrb.mxu2 %v5222_v3  ;;  %v4827_v3 = vld [vmem:[%s6941_s21 + $0xa8] sm:$0xff] }
0x1041   : > { %2944 = vmatpush.msra.mxu0 %v4827_v3  ;;  %v5062_v3 = vld [vmem:[%s6944_s24 + $0x1] ss:$0 sm:$0xff] }
0x1042   : > { %3082 = vmatpush.msrb.mxu2 %v5223_v23 }
0x1044   : > { %3083 = vmatpush.msrb.mxu2 %v5224_v25 }
0x1046   : > { %3084 = vmatpush.msrb.mxu2 %v5225_v26  ;;  %v4826_v26 = vld [vmem:[%s6941_s21 + $0xa0] sm:$0xff] }
0x1047   : > { %2945 = vmatpush.msra.mxu0 %v4826_v26 }
0x10a3   : > { %v2774_v28 = vpop.f32.mrf.mxu1 }
0x10a4   : > { %4811 = vmatmul.msk.f32.vlgmr.msra.gmra.mxu2 %vm1278_vm7, %v2774_v28 }
0x10ab   : > { %v2777_v30 = vpop.f32.mrf.mxu1 }
0x10ac   : > { %4812 = vmatmul.msk.f32.gmra.mxu2 %vm1278_vm7, %v2777_v30 }
0x10b8   : > { %v2618_v31 = vpop.f32.mrf.mxu2 }
0x10b9   : > { %4802 = vmatmul.msk.f32.vlgmr.msra.gmra.mxu3 %vm1278_vm7, %v2618_v31  ;;  %v4825_v31 = vld [vmem:[%s6941_s21 + $0x98] sm:$0xff] }
0x10ba   : > { %2946 = vmatpush.msra.mxu0 %v4825_v31 }
0x10c0   : > { %v2621_v21 = vpop.f32.mrf.mxu2 }
0x10c1   : > { %4803 = vmatmul.msk.f32.gmra.mxu3 %vm1278_vm7, %v2621_v21 }
0x1127   : > { %v2803_v6 = vpop.f32.mrf.mxu2 }
0x112f   : > { %v2806_v13 = vpop.f32.mrf.mxu2 }
0x113c   : > { %v2647_v22 = vpop.f32.mrf.mxu3 }
0x113d   : > { %v2653_v50 = vadd.f32 %v2647_v22, %v6148_v55 }
0x113f   : > { %v2809_v24 = vadd.f32 %v2803_v6, %v2653_v50 }
0x1141   : > { %v2811_v8 = vadd.f32 %v2809_v24, %v5994_v37 }
0x1143   : > { %v2817_v44 = vsel %vm1036_vm4, %v2811_v8, 0.0 }
0x1144   : > { %v2650_v9 = vpop.f32.mrf.mxu3  ;;  %2818 = vadd.xlane.f32.xlu1 %v2817_v44  ;;  %v4823_v44 = vld [vmem:[%s6941_s21 + $0x88] sm:$0xff] }
0x1145   : > { %v2654_v11 = vadd.f32 %v2650_v9, %v6150_v46  ;;  %v4822_v9 = vld [vmem:[%s6941_s21 + $0x80] sm:$0xff] }
0x1147   : > { %v2810_v15 = vadd.f32 %v2806_v13, %v2654_v11  ;;  %v5059_v11 = vld [vmem:[%s6940_s20 + $0x1] ss:$0 sm:$0xff] }
0x1149   : > { %v2812_v19 = vadd.f32 %v2810_v15, %v5998_v41 }
0x114b   : > { %v2820_v35 = vsel %vm1905_vm0, %v2812_v19, 0.0 }
0x114c   : > { %2821 = vadd.xlane.f32.xlu2 %v2820_v35 }
0x11b7   : > { %v2819_v36 = vpop.xlane.xlu1 %2818 }
0x11b8   : > { %v2823_v27 = vmul.f32 %v2819_v36, %v5881_v29 }
0x11ba   : > { %v2825_v55 = vsub.f32 %v2811_v8, %v2823_v27  ;;  %v4824_v8 = vld [vmem:[%s6941_s21 + $0x90] sm:$0xff] }
0x11bb   : > { %2947 = vmatpush.msra.mxu0 %v4824_v8 }
0x11bc   : > { %v2827_v32 = vmul.f32 %v2825_v55, %v2825_v55 }
0x11bd   : > { %2948 = vmatpush.msra.mxu0 %v4823_v44 }
0x11be   : > { %v2829_v37 = vsel %vm1036_vm4, %v2827_v32, 0.0 }
0x11bf   : > { %2830 = vadd.xlane.f32.xlu0 %v2829_v37  ;;  %v2822_v38 = vpop.xlane.xlu2 %2821  ;;  %2949 = vmatpush.msra.mxu0 %v4822_v9 }
0x11c0   : > { %v2824_v40 = vmul.f32 %v2822_v38, %v5881_v29 }
0x11c2   : > { %v6239_v42 = vsub.f32 %v2812_v19, %v2824_v40 }
0x11c4   : > { %v2828_v46 = vmul.f32 %v6239_v42, %v6239_v42 }
0x11c6   : > { %v2832_v41 = vsel %vm1905_vm0, %v2828_v46, 0.0 }
0x11c7   : > { %2833 = vadd.xlane.f32.xlu1 %v2832_v41 }
0x1232   : > { %v2831_v45 = vpop.xlane.xlu0 %2830 }
0x1233   : > { %v2835_v33 = vmul.f32 %v2831_v45, %v5881_v29 }
0x1235   : > { %v2837_v57 = vadd.f32 1e-05, %v2835_v33 }
0x1237   : > { %5146 = vrsqrt.f32 %v2837_v57  ;;  %vm2845_vm12 = vweird.f32 %v2837_v57 }
0x123a   : > { %v2834_v52 = vpop.xlane.xlu1 %2833 }
0x123b   : > { %v2836_v34 = vmul.f32 %v2834_v52, %v5881_v29 }
0x123d   : > { %v5147_v54 = vpop.eup %5146  ;;  %v2838_v56 = vadd.f32 1e-05, %v2836_v34  ;;  %v4848_v34 = vld [vmem:[%s6933_s13 + $0x58] sm:$0xff] }
0x123e   : > { %v2840_v59 = vmul.f32 %v5147_v54, %v2837_v57  ;;  %vm2846_vm3 = vweird.f32 %v5147_v54  ;;  %3050 = vmatpush.msrb.mxu1 %v4848_v34 }
0x123f   : > { %5148 = vrsqrt.f32 %v2838_v56  ;;  %vm2847_vm13 = vmor %vm2845_vm12, %vm2846_vm3  ;;  %vm2855_vm15 = vweird.f32 %v2838_v56 }
0x1240   : > { %v2841_v61 = vmul.f32 %v5147_v54, %v2840_v59  ;;  %3051 = vmatpush.msrb.mxu1 %v4847_v53 }
0x1242   : > { %v2842_v63 = vmul.f32 0.5, %v2841_v61 }
0x1244   : > { %v2843_v1 = vsub.f32 1.5, %v2842_v63 }
0x1245   : > { %v5149_v2 = vpop.eup %5148 }
0x1246   : > { %v2844_v7 = vmul.f32 %v5147_v54, %v2843_v1  ;;  %v2850_v10 = vmul.f32 %v5149_v2, %v2838_v56  ;;  %vm2856_vm14 = vweird.f32 %v5149_v2  ;;  %v4845_v56 = vld [vmem:[%s6933_s13 + $0x40] sm:$0xff] }
0x1247   : > { %vm2857_vm1 = vmor %vm2855_vm15, %vm2856_vm14 }
0x1248   : > { %v2848_v16 = vsel %vm2847_vm13, %v5147_v54, %v2844_v7  ;;  %v2851_v17 = vmul.f32 %v5149_v2, %v2850_v10  ;;  %v4846_v54 = vld [vmem:[%s6933_s13 + $0x48] sm:$0xff] }
0x1249   : > { %v2859_v18 = vmul.f32 %v2848_v16, %v2825_v55  ;;  %v5060_v55 = vld [vmem:[%s6942_s22 + $0x1] ss:$0 sm:$0xff]  ;;  %3052 = vmatpush.msrb.mxu1 %v4846_v54 }
0x124a   : > { %v2852_v23 = vmul.f32 0.5, %v2851_v17  ;;  %v5061_v16 = vld [vmem:[%s6943_s23 + $0x1] ss:$0 sm:$0xff] }
0x124b   : > { %v2864_v25 = vmul.f32 %v5057_v12, %v2859_v18  ;;  %3053 = vmatpush.msrb.mxu1 %v4845_v56 }
0x124c   : > { %v2853_v28 = vsub.f32 1.5, %v2852_v23 }
0x124d   : > { %v2869_v30 = vadd.f32 %v5058_v20, %v2864_v25 }
0x124e   : > { %v2854_v21 = vmul.f32 %v5149_v2, %v2853_v28 }
0x124f   : > { %4820 = vmatmul.msk.f32.vlgmr.msrb.gmra.mxu3 %vm1036_vm4, %v2869_v30 }
0x1250   : > { %v2858_v6 = vsel %vm2857_vm1, %v5149_v2, %v2854_v21 }
0x1251   : > { %v2860_v22 = vmul.f32 %v2858_v6, %v6239_v42 }
0x1253   : > { %v2865_v50 = vmul.f32 %v5057_v12, %v2860_v22 }
0x1255   : > { %v2870_v24 = vadd.f32 %v5058_v20, %v2865_v50  ;;  %v5063_v50 = vld [vmem:[%s6934_s14 + $0x2] ss:$0 sm:$0xff] }
0x1257   : > { %4821 = vmatmul.msk.f32.gmra.mxu3 %vm1036_vm4, %v2870_v24 }
0x12d2   : > { %v2904_v13 = vpop.f32.mrf.mxu3 }
0x12d3   : > { %v2905_v15 = vadd.f32 %v5059_v11, %v2904_v13  ;;  %v5226_v13 = vld [vmem:[%s7035_s29] sm:$0xff] }
0x12d5   : > { %v2910_v19 = vmax.f32 %v2905_v15, 0.0 }
0x12d7   : > { %2950 = vmatmul.f32.vlgmr.msra.gmra.mxu0 %v2910_v19  ;;  %v5227_v19 = vld [vmem:[%s7037_s6] sm:$0xff] }
0x12da   : > { %v2907_v35 = vpop.f32.mrf.mxu3 }
0x12db   : > { %v2908_v36 = vadd.f32 %v5059_v11, %v2907_v35 }
0x12dd   : > { %v2911_v27 = vmax.f32 %v2908_v36, 0.0 }
0x12df   : > { %2953 = vmatmul.f32.gmra.mxu0 %v2911_v27 }
0x1354   : > { %v2951_v32 = vpop.f32.mrf.mxu0 }
0x1355   : > { %v2952_v37 = vadd.f32 %v5060_v55, %v2951_v32 }
0x1357   : > { %v2957_v38 = vadd.f32 %v2952_v37, %v2869_v30  ;;  %v5229_v37 = vld [vmem:[%s7037_s6 + $0x8] sm:$0x7f] }
0x1359   : > { %v2963_v40 = vsel %vm1036_vm4, %v2957_v38, 0.0 }
0x135a   : > { %2964 = vadd.xlane.f32.xlu2 %v2963_v40 }
0x135c   : > { %v2954_v42 = vpop.f32.mrf.mxu0 }
0x135d   : > { %v2955_v46 = vadd.f32 %v5060_v55, %v2954_v42  ;;  %v5228_v55 = vld [vmem:[%s7035_s29 + $0x8] sm:$0x7f] }
0x135f   : > { %v2958_v41 = vadd.f32 %v2955_v46, %v2870_v24 }
0x1361   : > { %v2966_v39 = vsel %vm1905_vm0, %v2958_v41, 0.0 }
0x1362   : > { %2967 = vadd.xlane.f32.xlu0 %v2966_v39 }
0x13cd   : > { %v2965_v14 = vpop.xlane.xlu2 %2964 }
0x13ce   : > { %v2969_v43 = vmul.f32 %v2965_v14, %v5881_v29 }
0x13d0   : > { %v2971_v51 = vsub.f32 %v2957_v38, %v2969_v43 }
0x13d2   : > { %v2973_v45 = vmul.f32 %v2971_v51, %v2971_v51 }
0x13d4   : > { %v2975_v33 = vsel %vm1036_vm4, %v2973_v45, 0.0 }
0x13d5   : > { %v2968_v57 = vpop.xlane.xlu0 %2967  ;;  %2976 = vadd.xlane.f32.xlu1 %v2975_v33 }
0x13d6   : > { %v2970_v47 = vmul.f32 %v2968_v57, %v5881_v29 }
0x13d8   : > { %v2972_v48 = vsub.f32 %v2958_v41, %v2970_v47 }
0x13da   : > { %v2974_v49 = vmul.f32 %v2972_v48, %v2972_v48 }
0x13dc   : > { %v2978_v52 = vsel %vm1905_vm0, %v2974_v49, 0.0 }
0x13dd   : > { %2979 = vadd.xlane.f32.xlu2 %v2978_v52 }
0x1448   : > { %v2977_v58 = vpop.xlane.xlu1 %2976 }
0x1449   : > { %v2981_v59 = vmul.f32 %v2977_v58, %v5881_v29 }
0x144b   : > { %v2983_v60 = vadd.f32 1e-05, %v2981_v59 }
0x144d   : > { %5150 = vrsqrt.f32 %v2983_v60  ;;  %vm2991_vm5 = vweird.f32 %v2983_v60 }
0x1450   : > { %v2980_v61 = vpop.xlane.xlu2 %2979 }
0x1451   : > { %v2982_v62 = vmul.f32 %v2980_v61, %v5881_v29 }
0x1453   : > { %v5151_v63 = vpop.eup %5150  ;;  %v2984_v0 = vadd.f32 1e-05, %v2982_v62 }
0x1454   : > { %v2986_v1 = vmul.f32 %v5151_v63, %v2983_v60  ;;  %vm2992_vm2 = vweird.f32 %v5151_v63 }
0x1455   : > { %5152 = vrsqrt.f32 %v2984_v0  ;;  %vm2993_vm11 = vmor %vm2991_vm5, %vm2992_vm2  ;;  %vm3001_vm12 = vweird.f32 %v2984_v0 }
0x1456   : > { %v2987_v2 = vmul.f32 %v5151_v63, %v2986_v1 }
0x1458   : > { %v2988_v4 = vmul.f32 0.5, %v2987_v2 }
0x145a   : > { %v2989_v7 = vsub.f32 1.5, %v2988_v4 }
0x145b   : > { %v5153_v10 = vpop.eup %5152 }
0x145c   : > { %v2990_v12 = vmul.f32 %v5151_v63, %v2989_v7  ;;  %v2996_v5 = vmul.f32 %v5153_v10, %v2984_v0  ;;  %vm3002_vm3 = vweird.f32 %v5153_v10 }
0x145d   : > { %vm3003_vm13 = vmor %vm3001_vm12, %vm3002_vm3 }
0x145e   : > { %v2994_v17 = vsel %vm2993_vm11, %v5151_v63, %v2990_v12  ;;  %v2997_v18 = vmul.f32 %v5153_v10, %v2996_v5 }
0x145f   : > { %v3005_v20 = vmul.f32 %v2994_v17, %v2971_v51 }
0x1460   : > { %v2998_v23 = vmul.f32 0.5, %v2997_v18 }
0x1461   : > { %v3010_v25 = vmul.f32 %v5061_v16, %v3005_v20  ;;  %v4841_v20 = vld [vmem:[%s6935_s15 + $0x40] sm:$0xff] }
0x1462   : > { %v2999_v26 = vsub.f32 1.5, %v2998_v23  ;;  %3246 = vmatpush.msra.mxu2 %v4841_v20 }
0x1463   : > { %v6347_v28 = vadd.f32 %v5062_v3, %v3010_v25 }
0x1464   : > { %v3000_v30 = vmul.f32 %v5153_v10, %v2999_v26 }
0x1465   : > { %4850 = vmatmul.msk.f32.vlgmr.msrb.gmra.mxu1 %vm1036_vm4, %v6347_v28 }
0x1466   : > { %v3004_v31 = vsel %vm3003_vm13, %v5153_v10, %v3000_v30 }
0x1467   : > { %v3006_v21 = vmul.f32 %v3004_v31, %v2972_v48 }
0x1469   : > { %v3011_v6 = vmul.f32 %v5061_v16, %v3006_v21 }
0x146b   : > { %v6351_v22 = vadd.f32 %v5062_v3, %v3011_v6 }
0x146d   : > { %4851 = vmatmul.msk.f32.gmra.mxu1 %vm1036_vm4, %v6351_v22 }
0x14e2   : > { %v3055_v24 = vpop.f32.mrf.mxu1 }
0x14e3   : > { %v6358_v8 = vadd.f32 %v5063_v50, %v3055_v24 }
0x14e5   : > { %4852 = vmatmul.msk.f32.vlgmr.msrb.gmra.mxu2 %vm1233_vm6, %v6358_v8  ;;  %v3061_v15 = vmul.f32 %v5226_v13, %v6358_v8 }
0x14ea   : > { %v3058_v44 = vpop.f32.mrf.mxu1 }
0x14eb   : > { %v6362_v9 = vadd.f32 %v5063_v50, %v3058_v44 }
0x14ed   : > { %4853 = vmatmul.msk.f32.gmra.mxu2 %vm1233_vm6, %v6362_v9  ;;  %v3062_v32 = vmul.f32 %v5228_v55, %v6362_v9 }
0x1568   : > { %v3086_v11 = vpop.f32.mrf.mxu2 }
0x1569   : > { %v3092_v35 = vmul.f32 %v5227_v19, %v3086_v11  ;;  %v4842_v11 = vld [vmem:[%s6935_s15 + $0x48] sm:$0xff] }
0x156b   : > { %v6373_v36 = vadd.f32 %v3092_v35, %v3061_v15 }
0x156d   : > { %3104 = vrot.lane.b32.xlu1 %v6373_v36, %s7051_s28 }
0x1570   : > { %v3089_v27 = vpop.f32.mrf.mxu2 }
0x1571   : > { %v3093_v38 = vmul.f32 %v5229_v37, %v3089_v27 }
0x1573   : > { %v6384_v40 = vadd.f32 %v3093_v38, %v3062_v32 }
0x1575   : > { %3256 = vrot.lane.b32.xlu1 %v6373_v36, %s7040_s0  ;;  %3262 = vrot.lane.b32.xlu2 %v6384_v40, %s7039_s11 }
0x1576   : > { %3106 = vrot.lane.b32.xlu0 %v6384_v40, %s7051_s28 }
0x157e   : > { %3260 = vrot.lane.b32.xlu0 %v6373_v36, %s7039_s11 }
0x1586   : > { %3258 = vrot.lane.b32.xlu0 %v6384_v40, %s7040_s0 }
0x15cf   : > { %v3263_v41 = vpop.permute.xlu2 %3262 }
0x15df   : > { %v3105_v46 = vpop.permute.xlu1 %3104 }
0x15e7   : > { %v3257_v14 = vpop.permute.xlu1 %3256 }
0x15e8   : > { %v3107_v42 = vpop.permute.xlu0 %3106 }
0x15e9   : > { %4855 = vmatpush.xpose.msk.msra.mxu3 %vm1278_vm7, %v3107_v42 }
0x15ed   : > { %4856 = vmatpush.xpose.msk.msra.mxu3 %vm1278_vm7, %v3105_v46 }
0x15f0   : > { %4857 = vmatmul.msk.f32.vlgmr.msra.gmra.mxu3 %vm1278_vm7, %v6373_v36  ;;  %v3261_v39 = vpop.permute.xlu0 %3260 }
0x15f1   : > { %4864 = vmatpush.xpose.msk.msrb.mxu3 %vm1278_vm7, %v3263_v41 }
0x15f5   : > { %4865 = vmatpush.xpose.msk.msrb.mxu3 %vm1278_vm7, %v3261_v39 }
0x15f8   : > { %4858 = vmatmul.msk.f32.gmra.mxu3 %vm1278_vm7, %v6384_v40  ;;  %v3259_v43 = vpop.permute.xlu0 %3258 }
0x1600   : > { %4866 = vmatmul.msk.f32.vlgmr.msrb.gmra.mxu3 %vm1278_vm7, %v3257_v14 }
0x1608   : > { %4867 = vmatmul.msk.f32.gmra.mxu3 %vm1278_vm7, %v3259_v43 }
0x1673   : > { %v3133_v51 = vpop.f32.mrf.mxu3 }
0x1674   : > { %v3139_v45 = vsel %vm1310_vm8, %v3133_v51, -inf }
0x1675   : > { %3140 = vmax.xlane.f32.xlu2 %v3139_v45 }
0x167b   : > { %v3136_v33 = vpop.f32.mrf.mxu3 }
0x167c   : > { %v3142_v57 = vsel %vm1314_vm9, %v3136_v33, -inf }
0x167d   : > { %3143 = vmax.xlane.f32.xlu0 %v3142_v57 }
0x1683   : > { %v3289_v47 = vpop.f32.mrf.mxu3 }
0x1684   : > { %v3295_v48 = vsel %vm1310_vm8, %v3289_v47, -inf }
0x1685   : > { %3296 = vmax.xlane.f32.xlu1 %v3295_v48 }
0x168b   : > { %v3292_v49 = vpop.f32.mrf.mxu3 }
0x168c   : > { %v3298_v52 = vsel %vm1314_vm9, %v3292_v49, -inf }
0x168d   : > { %3299 = vmax.xlane.f32.xlu2 %v3298_v52 }
0x1691   : > { %3191 = vrot.lane.b32.xlu0 %v6362_v9, %s7041_s5 }
0x16e8   : > { %v3141_v34 = vpop.xlane.xlu2 %3140 }
0x16e9   : > { %v3145_v53 = vsub.f32 %v3133_v51, %v3141_v34 }
0x16eb   : > { %v3147_v54 = vmul.f32 1.442695, %v3145_v53 }
0x16ed   : > { %5154 = vpow2.f32 %v3147_v54 }
0x16f0   : > { %v3144_v56 = vpop.xlane.xlu0 %3143 }
0x16f1   : > { %v3146_v58 = vsub.f32 %v3136_v33, %v3144_v56 }
0x16f3   : > { %v5155_v59 = vpop.eup %5154  ;;  %v3149_v60 = vmul.f32 1.442695, %v3146_v58 }
0x16f4   : > { %v3151_v61 = vsel %vm1310_vm8, %v5155_v59, 0.0 }
0x16f5   : > { %5156 = vpow2.f32 %v3149_v60  ;;  %3152 = vadd.xlane.f32.xlu1 %v3151_v61 }
0x16f8   : > { %v3297_v62 = vpop.xlane.xlu1 %3296 }
0x16f9   : > { %v3301_v63 = vsub.f32 %v3289_v47, %v3297_v62 }
0x16fb   : > { %v6413_v0 = vpop.eup %5156  ;;  %v3303_v1 = vmul.f32 1.442695, %v3301_v63 }
0x16fc   : > { %v3154_v2 = vsel %vm1314_vm9, %v6413_v0, 0.0 }
0x16fd   : > { %5158 = vpow2.f32 %v3303_v1  ;;  %3155 = vadd.xlane.f32.xlu2 %v3154_v2 }
0x1700   : > { %v3300_v4 = vpop.xlane.xlu2 %3299 }
0x1701   : > { %v3302_v7 = vsub.f32 %v3292_v49, %v3300_v4 }
0x1703   : > { %v6417_v10 = vpop.eup %5158  ;;  %v3305_v12 = vmul.f32 1.442695, %v3302_v7  ;;  %v3192_v5 = vpop.permute.xlu0 %3191 }
0x1704   : > { %4859 = vmatpush.msk.msra.mxu1 %vm1373_vm10, %v3192_v5  ;;  %v3307_v16 = vsel %vm1310_vm8, %v6417_v10, 0.0 }
0x1705   : > { %5160 = vpow2.f32 %v3305_v12  ;;  %3308 = vadd.xlane.f32.xlu0 %v3307_v16 }
0x170b   : > { %v6422_v17 = vpop.eup %5160 }
0x170c   : > { %v3310_v18 = vsel %vm1314_vm9, %v6422_v17, 0.0 }
0x170d   : > { %3311 = vadd.xlane.f32.xlu1 %v3310_v18 }
0x1715   : > { %3189 = vrot.lane.b32.xlu2 %v6358_v8, %s7041_s5 }
0x1719   : > { %3345 = vrot.lane.b32.xlu0 %v6358_v8, %s7042_s3 }
0x171d   : > { %3418 = vrot.lane.b32.xlu2 %v6384_v40, %s7044_s2 }
0x1721   : > { %3574 = vrot.lane.b32.xlu0 %v6384_v40, %s7045_s7 }
0x1725   : > { %3572 = vrot.lane.b32.xlu2 %v6373_v36, %s7045_s7 }
0x1726   : > { %3347 = vrot.lane.b32.xlu1 %v6362_v9, %s7042_s3 }
0x1729   : > { %3412 = vrot.lane.b32.xlu0 %v6373_v36, %s7043_s8 }
0x172d   : > { %3414 = vrot.lane.b32.xlu2 %v6384_v40, %s7043_s8 }
0x172e   : > { %3416 = vrot.lane.b32.xlu1 %v6373_v36, %s7044_s2 }
0x1731   : > { %3570 = vrot.lane.b32.xlu0 %v6384_v40, %s7052_s1 }
0x1736   : > { %3568 = vrot.lane.b32.xlu1 %v6373_v36, %s7052_s1 }
0x1768   : > { %v3153_v3 = vpop.xlane.xlu1 %3152 }
0x1769   : > { %5162 = vrcp.f32 %v3153_v3  ;;  %v3168_v31 = vand.u32 2147483648, %v3153_v3  ;;  %v3166_v6 = vand.u32 2147483647, %v3153_v3  ;;  %vm3162_vm15 = vweird.f32 %v3153_v3 }
0x176b   : > { %v3169_v44 = vor.u32 1.1754944e-38, %v3168_v31  ;;  %vm3167_vm2 = vcmp.eq.f32.partialorder %v3166_v6, 8.507059e+37 }
0x176f   : > { %v5163_v23 = vpop.eup %5162 }
0x1770   : > { %v3158_v25 = vmul.f32 %v5163_v23, %v3153_v3  ;;  %v3156_v26 = vpop.xlane.xlu2 %3155  ;;  %vm3163_vm14 = vweird.f32 %v5163_v23 }
0x1771   : > { %5164 = vrcp.f32 %v3156_v26  ;;  %vm3164_vm1 = vmor %vm3162_vm15, %vm3163_vm14  ;;  %v3183_v32 = vand.u32 2147483648, %v3156_v26  ;;  %v3181_v38 = vand.u32 2147483647, %v3156_v26  ;;  %vm3177_vm11 = vweird.f32 %v3156_v26 }
0x1772   : > { %v3159_v30 = vsub.f32 1.0, %v3158_v25 }
0x1773   : > { %v3184_v42 = vor.u32 1.1754944e-38, %v3183_v32  ;;  %vm3182_vm12 = vcmp.eq.f32.partialorder %v3181_v38, 8.507059e+37 }
0x1774   : > { %v3160_v21 = vmul.f32 %v5163_v23, %v3159_v30 }
0x1776   : > { %v3161_v50 = vadd.f32 %v5163_v23, %v3160_v21 }
0x1777   : > { %v5165_v24 = vpop.eup %5164 }
0x1778   : > { %v3165_v13 = vsel %vm3164_vm1, %v5163_v23, %v3161_v50  ;;  %v3173_v15 = vmul.f32 %v5165_v24, %v3156_v26  ;;  %v3190_v19 = vpop.permute.xlu2 %3189  ;;  %v3309_v35 = vpop.xlane.xlu0 %3308  ;;  %vm3178_vm5 = vweird.f32 %v5165_v24 }
0x1779   : > { %v3170_v36 = vsel %vm3167_vm2, %v3169_v44, %v3165_v13  ;;  %3217 = vmatpush.msra.mxu1 %v3190_v19  ;;  %5166 = vrcp.f32 %v3309_v35  ;;  %vm3179_vm3 = vmor %vm3177_vm11, %vm3178_vm5  ;;  %v3324_v53 = vand.u32 2147483648, %v3309_v35  ;;  %vm3318_vm14 = vweird.f32 %v3309_v35 }
0x177a   : > { %v3174_v27 = vsub.f32 1.0, %v3173_v15  ;;  %v3187_v55 = vmul.f32 %v5155_v59, %v3170_v36  ;;  %v3322_v54 = vand.u32 2147483647, %v3309_v35 }
0x177b   : > { %3402 = vmatpush.msrb.mxu1 %v4842_v11  ;;  %v3325_v60 = vor.u32 1.1754944e-38, %v3324_v53 }
0x177c   : > { %v3175_v37 = vmul.f32 %v5165_v24, %v3174_v27  ;;  %4860 = vmatmul.msk.f32.vlgmr.msra.gmra.mxu1 %vm1310_vm8, %v3187_v55  ;;  %vm3323_vm1 = vcmp.eq.f32.partialorder %v3322_v54, 8.507059e+37 }
0x177e   : > { %v3176_v40 = vadd.f32 %v5165_v24, %v3175_v37 }
0x177f   : > { %v5167_v14 = vpop.eup %5166 }
0x1780   : > { %v3312_v46 = vpop.xlane.xlu1 %3311  ;;  %v3419_v41 = vpop.permute.xlu2 %3418  ;;  %v3180_v39 = vsel %vm3179_vm3, %v5165_v24, %v3176_v40  ;;  %v3314_v45 = vmul.f32 %v5167_v14, %v3309_v35  ;;  %vm3319_vm13 = vweird.f32 %v5167_v14  ;;  %v5064_v24 = vld [vmem:[%s7053_s30 + $0x2] ss:$0 sm:$0xff]  ;;  %s7068_s30 = sld [smem:[#allocation32_spill]] }
0x1781   : > { %4873 = vmatpush.xpose.msk.msrb.mxu2 %vm1278_vm7, %v3419_v41  ;;  %v3185_v43 = vsel %vm3182_vm12, %v3184_v42, %v3180_v39  ;;  %5168 = vrcp.f32 %v3312_v46  ;;  %vm3320_vm15 = vmor %vm3318_vm14, %vm3319_vm13  ;;  %v3339_v1 = vand.u32 2147483648, %v3312_v46  ;;  %vm3333_vm5 = vweird.f32 %v3312_v46 }
0x1782   : > { %v3188_v51 = vmul.f32 %v6413_v0, %v3185_v43  ;;  %v3315_v33 = vsub.f32 1.0, %v3314_v45  ;;  %v3337_v4 = vand.u32 2147483647, %v3312_v46 }
0x1783   : > { %v3340_v12 = vor.u32 1.1754944e-38, %v3339_v1 }
0x1784   : > { %4861 = vmatmul.msk.f32.gmra.mxu1 %vm1310_vm8, %v3188_v51  ;;  %v3316_v48 = vmul.f32 %v5167_v14, %v3315_v33  ;;  %vm3338_vm3 = vcmp.eq.f32.partialorder %v3337_v4, 8.507059e+37 }
0x1786   : > { %v3317_v52 = vadd.f32 %v5167_v14, %v3316_v48  ;;  %s7069_s1 = smov %s7068_s30 }
0x1787   : > { %v5169_v57 = vpop.eup %5168  ;;  %s5262_s16 = scalar_lea.hbm %s7069_s1, 2 }
0x1788   : > { %v3329_v49 = vmul.f32 %v5169_v57, %v3312_v46  ;;  %v3321_v58 = vsel %vm3320_vm15, %v5167_v14, %v3317_v52  ;;  %v3573_v62 = vpop.permute.xlu2 %3572  ;;  %vm3334_vm2 = vweird.f32 %v5169_v57 }
0x1789   : > { %v3326_v61 = vsel %vm3323_vm1, %v3325_v60, %v3321_v58  ;;  %vm3335_vm11 = vmor %vm3333_vm5, %vm3334_vm2 }
0x178a   : > { %v3330_v34 = vsub.f32 1.0, %v3329_v49  ;;  %v3343_v2 = vmul.f32 %v6417_v10, %v3326_v61 }
0x178b   : > { %v3346_v47 = vpop.permute.xlu0 %3345 }
0x178c   : > { %v3331_v59 = vmul.f32 %v5169_v57, %v3330_v34 }
0x178e   : > { %v3332_v0 = vadd.f32 %v5169_v57, %v3331_v59 }
0x1790   : > { %v3336_v7 = vsel %vm3335_vm11, %v5169_v57, %v3332_v0  ;;  %v3415_v23 = vpop.permute.xlu2 %3414 }
0x1791   : > { %v3341_v5 = vsel %vm3338_vm3, %v3340_v12, %v3336_v7 }
0x1792   : > { %v3344_v18 = vmul.f32 %v6422_v17, %v3341_v5 }
0x1793   : > { %v3575_v56 = vpop.permute.xlu0 %3574 }
0x1794   : > { %4882 = vmatpush.xpose.msk.msra.mxu1 %vm1278_vm7, %v3575_v56 }
0x1798   : > { %v3348_v63 = vpop.permute.xlu1 %3347  ;;  %4883 = vmatpush.xpose.msk.msra.mxu1 %vm1278_vm7, %v3573_v62 }
0x1799   : > { %4868 = vmatpush.msk.msrb.mxu0 %vm1373_vm10, %v3348_v63 }
0x179b   : > { %3373 = vmatpush.msrb.mxu0 %v3346_v47  ;;  %v3413_v3 = vpop.permute.xlu0 %3412 }
0x179c   : > { %4869 = vmatmul.msk.f32.vlgmr.msrb.gmra.mxu0 %vm1310_vm8, %v3343_v2 }
0x17a0   : > { %v3417_v16 = vpop.permute.xlu1 %3416 }
0x17a1   : > { %4874 = vmatpush.xpose.msk.msrb.mxu2 %vm1278_vm7, %v3417_v16 }
0x17a3   : > { %v3571_v30 = vpop.permute.xlu0 %3570 }
0x17a4   : > { %4870 = vmatmul.msk.f32.gmra.mxu0 %vm1310_vm8, %v3344_v18 }
0x17a8   : > { %v3569_v17 = vpop.permute.xlu1 %3568 }
0x17f9   : > { %v3219_v20 = vpop.f32.mrf.mxu1 }
0x17fa   : > { %4862 = vmatmul.msk.f32.vlgmr.msra.gmra.mxu2 %vm1278_vm7, %v3219_v20 }
0x1801   : > { %v3222_v10 = vpop.f32.mrf.mxu1 }
0x1802   : > { %4863 = vmatmul.msk.f32.gmra.mxu2 %vm1278_vm7, %v3222_v10 }
0x180a   : > { %4875 = vmatmul.msk.f32.vlgmr.msrb.gmra.mxu2 %vm1278_vm7, %v3413_v3 }
0x1812   : > { %4876 = vmatmul.msk.f32.gmra.mxu2 %vm1278_vm7, %v3415_v23 }
0x1819   : > { %v3375_v25 = vpop.f32.mrf.mxu0 }
0x181a   : > { %4871 = vmatmul.msk.f32.vlgmr.msrb.gmra.mxu1 %vm1278_vm7, %v3375_v25 }
0x1821   : > { %v3378_v26 = vpop.f32.mrf.mxu0 }
0x1822   : > { %4872 = vmatmul.msk.f32.gmra.mxu1 %vm1278_vm7, %v3378_v26 }
0x182a   : > { %4884 = vmatmul.msk.f32.vlgmr.msra.gmra.mxu1 %vm1278_vm7, %v3569_v17 }
0x1832   : > { %4885 = vmatmul.msk.f32.gmra.mxu1 %vm1278_vm7, %v3571_v30 }
0x187d   : > { %v3248_v31 = vpop.f32.mrf.mxu2 }
0x187e   : > { %v3254_v44 = vadd.f32 %v5064_v24, %v3248_v31 }
0x1885   : > { %v3251_v21 = vpop.f32.mrf.mxu2 }
0x1886   : > { %v3255_v15 = vadd.f32 %v5064_v24, %v3251_v21 }
0x188d   : > { %v3445_v6 = vpop.f32.mrf.mxu2 }
0x188e   : > { %v3451_v50 = vsel %vm1310_vm8, %v3445_v6, -inf }
0x188f   : > { %3452 = vmax.xlane.f32.xlu2 %v3451_v50 }
0x1895   : > { %v3448_v55 = vpop.f32.mrf.mxu2 }
0x1896   : > { %v3454_v37 = vsel %vm1314_vm9, %v3448_v55, -inf }
0x1897   : > { %v3404_v11 = vpop.f32.mrf.mxu1 }
0x1898   : > { %v6478_v13 = vadd.f32 %v3404_v11, %v3254_v44 }
0x189f   : > { %v3407_v19 = vpop.f32.mrf.mxu1 }
0x18a0   : > { %v6480_v35 = vadd.f32 %v3407_v19, %v3255_v15 }
0x18a7   : > { %v3601_v36 = vpop.f32.mrf.mxu1 }
0x18a8   : > { %v3607_v27 = vsel %vm1310_vm8, %v3601_v36, -inf }
0x18a9   : > { %3608 = vmax.xlane.f32.xlu1 %v3607_v27 }
0x18af   : > { %v3604_v32 = vpop.f32.mrf.mxu1 }
0x18b0   : > { %v3610_v38 = vsel %vm1314_vm9, %v3604_v32, -inf }
0x18b1   : > { %3455 = vmax.xlane.f32.xlu1 %v3454_v37  ;;  %3611 = vmax.xlane.f32.xlu0 %v3610_v38 }
0x18c5   : > { %3659 = vrot.lane.b32.xlu0 %v6362_v9, %s7054_s26 }
0x1902   : > { %v3453_v40 = vpop.xlane.xlu2 %3452 }
0x1903   : > { %v3457_v42 = vsub.f32 %v3445_v6, %v3453_v40 }
0x1905   : > { %v3459_v46 = vmul.f32 1.442695, %v3457_v42 }
0x1907   : > { %5170 = vpow2.f32 %v3459_v46 }
0x190d   : > { %v6487_v41 = vpop.eup %5170 }
0x190e   : > { %v3463_v39 = vsel %vm1310_vm8, %v6487_v41, 0.0 }
0x190f   : > { %3464 = vadd.xlane.f32.xlu0 %v3463_v39 }
0x191c   : > { %v3609_v14 = vpop.xlane.xlu1 %3608 }
0x191d   : > { %v3613_v57 = vsub.f32 %v3601_v36, %v3609_v14 }
0x191f   : > { %v3615_v49 = vmul.f32 1.442695, %v3613_v57 }
0x1923   : > { %3501 = vrot.lane.b32.xlu0 %v6358_v8, %s7055_s27 }
0x1924   : > { %v3456_v43 = vpop.xlane.xlu1 %3455  ;;  %v3612_v51 = vpop.xlane.xlu0 %3611 }
0x1925   : > { %v3458_v45 = vsub.f32 %v3448_v55, %v3456_v43  ;;  %v3614_v33 = vsub.f32 %v3604_v32, %v3612_v51 }
0x1927   : > { %v3461_v47 = vmul.f32 1.442695, %v3458_v45  ;;  %v3617_v48 = vmul.f32 1.442695, %v3614_v33 }
0x1929   : > { %5172 = vpow2.f32 %v3461_v47 }
0x192a   : > { %5174 = vpow2.f32 %v3617_v48 }
0x192b   : > { %5176 = vpow2.f32 %v3615_v49  ;;  %v4843_v49 = vld [vmem:[%s6935_s15 + $0x50] sm:$0xff] }
0x192c   : > { %3558 = vmatpush.msra.mxu0 %v4843_v49  ;;  %v5065_v49 = vld [vmem:[%s6937_s17 + $0x2] ss:$0 sm:$0xff] }
0x192f   : > { %v6493_v52 = vpop.eup %5172 }
0x1930   : > { %v6495_v34 = vpop.eup %5174  ;;  %v3466_v53 = vsel %vm1314_vm9, %v6493_v52, 0.0 }
0x1931   : > { %3467 = vadd.xlane.f32.xlu2 %v3466_v53  ;;  %v3622_v54 = vsel %vm1314_vm9, %v6495_v34, 0.0  ;;  %v6501_v56 = vpop.eup %5176  ;;  %v5230_v53 = vld [vmem:[%s6932_s12 + $0x38] sm:$0xff] }
0x1932   : > { %3623 = vadd.xlane.f32.xlu1 %v3622_v54  ;;  %v3619_v59 = vsel %vm1310_vm8, %v6501_v56, 0.0  ;;  %v5232_v54 = vld [vmem:[%s6932_s12 + $0x28] sm:$0xff] }
0x1937   : > { %v3660_v58 = vpop.permute.xlu0 %3659 }
0x1938   : > { %4886 = vmatpush.msk.msra.mxu2 %vm1373_vm10, %v3660_v58  ;;  %v5234_v58 = vld [vmem:[%s6932_s12 + $0x18] sm:$0xff] }
0x1939   : > { %3620 = vadd.xlane.f32.xlu2 %v3619_v59  ;;  %v5235_v59 = vld [vmem:[%s6932_s12 + $0x10] sm:$0xff] }
0x194b   : > { %3657 = vrot.lane.b32.xlu1 %v6358_v8, %s7054_s26 }
0x1951   : > { %3503 = vrot.lane.b32.xlu2 %v6362_v9, %s7055_s27  ;;  %s7065_s27 = sld [smem:[#allocation30_spill]] }
0x1982   : > { %v3465_v60 = vpop.xlane.xlu0 %3464 }
0x1983   : > { %5178 = vrcp.f32 %v3465_v60  ;;  %v3480_v16 = vand.u32 2147483648, %v3465_v60  ;;  %vm3474_vm12 = vweird.f32 %v3465_v60  ;;  %v3478_v9 = vand.u32 2147483647, %v3465_v60 }
0x1985   : > { %v3481_v23 = vor.u32 1.1754944e-38, %v3480_v16  ;;  %vm3479_vm14 = vcmp.eq.f32.partialorder %v3478_v9, 8.507059e+37 }
0x1989   : > { %v5179_v61 = vpop.eup %5178 }
0x198a   : > { %v3470_v62 = vmul.f32 %v5179_v61, %v3465_v60  ;;  %vm3475_vm9 = vweird.f32 %v5179_v61  ;;  %v5236_v60 = vld [vmem:[%s6932_s12 + $0x8] sm:$0xff] }
0x198b   : > { %vm3476_vm13 = vmor %vm3474_vm12, %vm3475_vm9 }
0x198c   : > { %v3471_v63 = vsub.f32 1.0, %v3470_v62 }
0x198e   : > { %v3472_v2 = vmul.f32 %v5179_v61, %v3471_v63 }
0x1990   : > { %v3473_v7 = vadd.f32 %v5179_v61, %v3472_v2 }
0x1992   : > { %v3477_v20 = vsel %vm3476_vm13, %v5179_v61, %v3473_v7  ;;  %v5237_v61 = vld [vmem:[%s6932_s12] sm:$0xff] }
0x1993   : > { %v3482_v26 = vsel %vm3479_vm14, %v3481_v23, %v3477_v20 }
0x1994   : > { %v3499_v44 = vmul.f32 %v6487_v41, %v3482_v26 }
0x1995   : > { %v3502_v50 = vpop.permute.xlu0 %3501 }
0x19a4   : > { %v3468_v0 = vpop.xlane.xlu2 %3467 }
0x19a5   : > { %5180 = vrcp.f32 %v3468_v0  ;;  %v6510_v1 = vpop.xlane.xlu1 %3623  ;;  %v3495_v6 = vand.u32 2147483648, %v3468_v0  ;;  %vm3489_vm1 = vweird.f32 %v3468_v0  ;;  %v3493_v11 = vand.u32 2147483647, %v3468_v0 }
0x19a6   : > { %5182 = vrcp.f32 %v6510_v1  ;;  %v3651_v41 = vand.u32 2147483648, %v6510_v1  ;;  %vm3645_vm14 = vweird.f32 %v6510_v1  ;;  %v3649_v43 = vand.u32 2147483647, %v6510_v1 }
0x19a7   : > { %v3496_v32 = vor.u32 1.1754944e-38, %v3495_v6  ;;  %vm3494_vm3 = vcmp.eq.f32.partialorder %v3493_v11, 8.507059e+37  ;;  %v4895_v6 = vld [vmem:[%s6939_s19 + $0x50] sm:$0xff] }
0x19a8   : > { %v3652_v57 = vor.u32 1.1754944e-38, %v3651_v41  ;;  %v4910_v41 = vld [vmem:[%s6941_s21 + $0x150] sm:$0xff] }
0x19ab   : > { %v5181_v4 = vpop.eup %5180 }
0x19ac   : > { %v3485_v12 = vmul.f32 %v5181_v4, %v3468_v0  ;;  %v3621_v8 = vpop.xlane.xlu2 %3620  ;;  %v5183_v5 = vpop.eup %5182  ;;  %vm3490_vm15 = vweird.f32 %v5181_v4 }
0x19ad   : > { %5184 = vrcp.f32 %v3621_v8  ;;  %v3641_v3 = vmul.f32 %v5183_v5, %v6510_v1  ;;  %v3634_v15 = vand.u32 2147483647, %v3621_v8  ;;  %v3636_v19 = vand.u32 2147483648, %v3621_v8  ;;  %vm3491_vm2 = vmor %vm3489_vm1, %vm3490_vm15 }
0x19ae   : > { %v3486_v18 = vsub.f32 1.0, %v3485_v12  ;;  %vm3630_vm11 = vweird.f32 %v3621_v8  ;;  %vm3646_vm12 = vweird.f32 %v5183_v5  ;;  %vm3650_vm1 = vcmp.eq.f32.partialorder %v3649_v43, 8.507059e+37 }
0x19af   : > { %v3642_v17 = vsub.f32 1.0, %v3641_v3  ;;  %v3637_v38 = vor.u32 1.1754944e-38, %v3636_v19  ;;  %vm3635_vm13 = vcmp.eq.f32.partialorder %v3634_v15, 8.507059e+37  ;;  %vm3647_vm15 = vmor %vm3645_vm14, %vm3646_vm12  ;;  %v4915_v19 = vld [vmem:[%s6941_s21 + $0x178] sm:$0xff] }
0x19b0   : > { %v3487_v10 = vmul.f32 %v5181_v4, %v3486_v18  ;;  %3847 = vmatpush.msrb.mxu1 %v4915_v19 }
0x19b1   : > { %v3643_v36 = vmul.f32 %v5183_v5, %v3642_v17 }
0x19b2   : > { %v3488_v21 = vadd.f32 %v5181_v4, %v3487_v10 }
0x19b3   : > { %v5185_v25 = vpop.eup %5184  ;;  %v3644_v42 = vadd.f32 %v5183_v5, %v3643_v36  ;;  %v4914_v36 = vld [vmem:[%s6941_s21 + $0x170] sm:$0xff] }
0x19b4   : > { %v3626_v30 = vmul.f32 %v5185_v25, %v3621_v8  ;;  %v3504_v31 = vpop.permute.xlu2 %3503  ;;  %vm3631_vm5 = vweird.f32 %v5185_v25  ;;  %v3492_v55 = vsel %vm3491_vm2, %v5181_v4, %v3488_v21  ;;  %v4896_v21 = vld [vmem:[%s6939_s19 + $0x58] sm:$0xff]  ;;  %3848 = vmatpush.msrb.mxu1 %v4914_v36 }
0x19b5   : > { %4877 = vmatpush.msk.msra.mxu3 %vm1373_vm10, %v3504_v31  ;;  %vm3632_vm9 = vmor %vm3630_vm11, %vm3631_vm5  ;;  %v3497_v40 = vsel %vm3494_vm3, %v3496_v32, %v3492_v55  ;;  %v3648_v33 = vsel %vm3647_vm15, %v5183_v5, %v3644_v42  ;;  %3812 = vmatpush.msrb.mxu0 %v4896_v21  ;;  %v4911_v42 = vld [vmem:[%s6941_s21 + $0x158] sm:$0xff] }
0x19b6   : > { %v3627_v24 = vsub.f32 1.0, %v3626_v30  ;;  %v3500_v45 = vmul.f32 %v6493_v52, %v3497_v40  ;;  %v3653_v47 = vsel %vm3650_vm1, %v3652_v57, %v3648_v33  ;;  %v4844_v52 = vld [vmem:[%s6935_s15 + $0x58] sm:$0xff] }
0x19b7   : > { %3529 = vmatpush.msra.mxu3 %v3502_v50  ;;  %v3656_v48 = vmul.f32 %v6495_v34, %v3653_v47  ;;  %v5231_v34 = vld [vmem:[%s6932_s12 + $0x30] sm:$0xff]  ;;  %3813 = vmatpush.msrb.mxu0 %v4895_v6  ;;  %v4894_v50 = vld [vmem:[%s6939_s19 + $0x48] sm:$0xff]  ;;  %v4907_v57 = vld [vmem:[%s6941_s21 + $0x138] sm:$0xff] }
0x19b8   : > { %v3628_v27 = vmul.f32 %v5185_v25, %v3627_v24  ;;  %4878 = vmatmul.msk.f32.vlgmr.msra.gmra.mxu3 %vm1310_vm8, %v3499_v44  ;;  %v4893_v24 = vld [vmem:[%s6939_s19 + $0x40] sm:$0xff] }
0x19b9   : > { %3714 = vmatpush.msrb.mxu3 %v4844_v52  ;;  %3814 = vmatpush.msrb.mxu0 %v4894_v50  ;;  %v4906_v52 = vld [vmem:[%s6941_s21 + $0x130] sm:$0xff] }
0x19ba   : > { %v3629_v37 = vadd.f32 %v5185_v25, %v3628_v27  ;;  %v4913_v27 = vld [vmem:[%s6941_s21 + $0x168] sm:$0xff] }
0x19bb   : > { %3990 = vmatpush.msra.mxu3 %v5230_v53  ;;  %3815 = vmatpush.msrb.mxu0 %v4893_v24 }
0x19bc   : > { %v3633_v46 = vsel %vm3632_vm9, %v5185_v25, %v3629_v37  ;;  %v4912_v37 = vld [vmem:[%s6941_s21 + $0x160] sm:$0xff]  ;;  %3849 = vmatpush.msrb.mxu1 %v4913_v27 }
0x19bd   : > { %v3638_v39 = vsel %vm3635_vm13, %v3637_v38, %v3633_v46  ;;  %v3658_v14 = vpop.permute.xlu1 %3657  ;;  %3991 = vmatpush.msra.mxu3 %v5231_v34 }
0x19be   : > { %v3655_v51 = vmul.f32 %v6501_v56, %v3638_v39  ;;  %3685 = vmatpush.msra.mxu2 %v3658_v14  ;;  %v5233_v56 = vld [vmem:[%s6932_s12 + $0x20] sm:$0xff]  ;;  %3850 = vmatpush.msrb.mxu1 %v4912_v37  ;;  %v4909_v14 = vld [vmem:[%s6941_s21 + $0x148] sm:$0xff]  ;;  %v4925_v37 = vld [vmem:[%s6933_s13 + $0x70] sm:$0xff] }
0x19bf   : > { %3992 = vmatpush.msra.mxu3 %v5232_v54  ;;  %v5066_v54 = vld [vmem:[%s6938_s18 + $0x2] ss:$0 sm:$0xff] }
0x19c0   : > { %4879 = vmatmul.msk.f32.gmra.mxu3 %vm1310_vm8, %v3500_v45  ;;  %4887 = vmatmul.msk.f32.vlgmr.msra.gmra.mxu2 %vm1310_vm8, %v3655_v51  ;;  %v4908_v51 = vld [vmem:[%s6941_s21 + $0x140] sm:$0xff] }
0x19c1   : > { %3993 = vmatpush.msra.mxu3 %v5233_v56  ;;  %3851 = vmatpush.msrb.mxu1 %v4911_v42 }
0x19c3   : > { %3994 = vmatpush.msra.mxu3 %v5234_v58  ;;  %3852 = vmatpush.msrb.mxu1 %v4910_v41  ;;  %v4905_v58 = vld [vmem:[%s6941_s21 + $0x128] sm:$0xff] }
0x19c5   : > { %3995 = vmatpush.msra.mxu3 %v5235_v59  ;;  %3853 = vmatpush.msrb.mxu1 %v4909_v14 }
0x19c7   : > { %3996 = vmatpush.msra.mxu3 %v5236_v60  ;;  %3854 = vmatpush.msrb.mxu1 %v4908_v51 }
0x19c8   : > { %4888 = vmatmul.msk.f32.gmra.mxu2 %vm1310_vm8, %v3656_v48 }
0x19c9   : > { %3997 = vmatpush.msra.mxu3 %v5237_v61  ;;  %3855 = vmatpush.msrb.mxu1 %v4907_v57  ;;  %v4904_v61 = vld [vmem:[%s6941_s21 + $0x120] sm:$0xff] }
0x19cb   : > { %3856 = vmatpush.msrb.mxu1 %v4906_v52 }
0x19cd   : > { %3857 = vmatpush.msrb.mxu1 %v4905_v58 }
0x19cf   : > { %3858 = vmatpush.msrb.mxu1 %v4904_v61 }
0x1a3b   : > { %v3531_v62 = vpop.f32.mrf.mxu3 }
0x1a3c   : > { %4880 = vmatmul.msk.f32.vlgmr.msra.gmra.mxu0 %vm1278_vm7, %v3531_v62 }
0x1a43   : > { %v3534_v63 = vpop.f32.mrf.mxu3  ;;  %v3687_v0 = vpop.f32.mrf.mxu2 }
0x1a44   : > { %4881 = vmatmul.msk.f32.gmra.mxu0 %vm1278_vm7, %v3534_v63  ;;  %4889 = vmatmul.msk.f32.vlgmr.msrb.gmra.mxu3 %vm1278_vm7, %v3687_v0  ;;  %v4903_v0 = vld [vmem:[%s6941_s21 + $0x118] sm:$0xff] }
0x1a45   : > { %3859 = vmatpush.msrb.mxu1 %v4903_v0 }
0x1a4b   : > { %v3690_v1 = vpop.f32.mrf.mxu2 }
0x1a4c   : > { %4890 = vmatmul.msk.f32.gmra.mxu3 %vm1278_vm7, %v3690_v1 }
0x1ab9   : > { %v3560_v2 = vpop.f32.mrf.mxu0 }
0x1aba   : > { %v3566_v4 = vadd.f32 %v3560_v2, %v6478_v13 }
0x1ac1   : > { %v3563_v5 = vpop.f32.mrf.mxu0 }
0x1ac2   : > { %v3567_v9 = vadd.f32 %v3563_v5, %v6480_v35  ;;  %v4901_v5 = vld [vmem:[%s6941_s21 + $0x108] sm:$0xff] }
0x1ac7   : > { %v3716_v7 = vpop.f32.mrf.mxu3 }
0x1ac8   : > { %v3722_v12 = vadd.f32 %v3716_v7, %v3566_v4 }
0x1aca   : > { %v3724_v8 = vadd.f32 %v3722_v12, %v6347_v28 }
0x1acc   : > { %v3730_v16 = vsel %vm1036_vm4, %v3724_v8, 0.0 }
0x1acd   : > { %3731 = vadd.xlane.f32.xlu0 %v3730_v16  ;;  %v4900_v16 = vld [vmem:[%s6941_s21 + $0x100] sm:$0xff] }
0x1acf   : > { %v3719_v18 = vpop.f32.mrf.mxu3 }
0x1ad0   : > { %v3723_v20 = vadd.f32 %v3719_v18, %v3567_v9  ;;  %v5067_v9 = vld [vmem:[%s6940_s20 + $0x2] ss:$0 sm:$0xff] }
0x1ad2   : > { %v3725_v10 = vadd.f32 %v3723_v20, %v6351_v22 }
0x1ad4   : > { %v3733_v3 = vsel %vm1905_vm0, %v3725_v10, 0.0 }
0x1ad5   : > { %3734 = vadd.xlane.f32.xlu1 %v3733_v3 }
0x1b40   : > { %v3732_v23 = vpop.xlane.xlu0 %3731 }
0x1b41   : > { %v3736_v13 = vmul.f32 %v3732_v23, %v5881_v29 }
0x1b43   : > { %v3738_v25 = vsub.f32 %v3724_v8, %v3736_v13  ;;  %v4902_v8 = vld [vmem:[%s6941_s21 + $0x110] sm:$0xff] }
0x1b44   : > { %3860 = vmatpush.msrb.mxu1 %v4902_v8 }
0x1b45   : > { %v3740_v26 = vmul.f32 %v3738_v25, %v3738_v25 }
0x1b46   : > { %3861 = vmatpush.msrb.mxu1 %v4901_v5 }
0x1b47   : > { %v3742_v28 = vsel %vm1036_vm4, %v3740_v26, 0.0 }
0x1b48   : > { %3743 = vadd.xlane.f32.xlu2 %v3742_v28  ;;  %v3735_v17 = vpop.xlane.xlu1 %3734  ;;  %3862 = vmatpush.msrb.mxu1 %v4900_v16 }
0x1b49   : > { %v3737_v30 = vmul.f32 %v3735_v17, %v5881_v29 }
0x1b4b   : > { %v6569_v31 = vsub.f32 %v3725_v10, %v3737_v30 }
0x1b4d   : > { %v3741_v35 = vmul.f32 %v6569_v31, %v6569_v31 }
0x1b4f   : > { %v3745_v22 = vsel %vm1905_vm0, %v3741_v35, 0.0 }
0x1b50   : > { %3746 = vadd.xlane.f32.xlu2 %v3745_v22 }
0x1bbb   : > { %v3744_v44 = vpop.xlane.xlu2 %3743 }
0x1bbc   : > { %v3748_v11 = vmul.f32 %v3744_v44, %v5881_v29 }
0x1bbe   : > { %v3750_v15 = vadd.f32 1e-05, %v3748_v11 }
0x1bc0   : > { %5186 = vrsqrt.f32 %v3750_v15  ;;  %vm3758_vm5 = vweird.f32 %v3750_v15 }
0x1bc3   : > { %v3747_v55 = vpop.xlane.xlu2 %3746 }
0x1bc4   : > { %v3749_v32 = vmul.f32 %v3747_v55, %v5881_v29 }
0x1bc6   : > { %v5187_v38 = vpop.eup %5186  ;;  %v3751_v40 = vadd.f32 1e-05, %v3749_v32  ;;  %v4926_v32 = vld [vmem:[%s6933_s13 + $0x78] sm:$0xff] }
0x1bc7   : > { %v3753_v46 = vmul.f32 %v5187_v38, %v3750_v15  ;;  %vm3759_vm2 = vweird.f32 %v5187_v38  ;;  %3963 = vmatpush.msrb.mxu2 %v4926_v32 }
0x1bc8   : > { %5188 = vrsqrt.f32 %v3751_v40  ;;  %vm3760_vm11 = vmor %vm3758_vm5, %vm3759_vm2  ;;  %vm3768_vm9 = vweird.f32 %v3751_v40 }
0x1bc9   : > { %v3754_v39 = vmul.f32 %v5187_v38, %v3753_v46  ;;  %3964 = vmatpush.msrb.mxu2 %v4925_v37 }
0x1bcb   : > { %v3755_v43 = vmul.f32 0.5, %v3754_v39 }
0x1bcd   : > { %v3756_v45 = vsub.f32 1.5, %v3755_v43 }
0x1bce   : > { %v5189_v33 = vpop.eup %5188 }
0x1bcf   : > { %v3757_v47 = vmul.f32 %v5187_v38, %v3756_v45  ;;  %v3763_v48 = vmul.f32 %v5189_v33, %v3751_v40  ;;  %vm3769_vm3 = vweird.f32 %v5189_v33  ;;  %v4923_v40 = vld [vmem:[%s6933_s13 + $0x60] sm:$0xff] }
0x1bd0   : > { %vm3770_vm12 = vmor %vm3768_vm9, %vm3769_vm3 }
0x1bd1   : > { %v3761_v53 = vsel %vm3760_vm11, %v5187_v38, %v3757_v47  ;;  %v3764_v34 = vmul.f32 %v5189_v33, %v3763_v48  ;;  %v4924_v38 = vld [vmem:[%s6933_s13 + $0x68] sm:$0xff] }
0x1bd2   : > { %v3772_v56 = vmul.f32 %v3761_v53, %v3738_v25  ;;  %v5068_v25 = vld [vmem:[%s6942_s22 + $0x2] ss:$0 sm:$0xff]  ;;  %3965 = vmatpush.msrb.mxu2 %v4924_v38 }
0x1bd3   : > { %v3765_v59 = vmul.f32 0.5, %v3764_v34  ;;  %v5069_v53 = vld [vmem:[%s6943_s23 + $0x2] ss:$0 sm:$0xff] }
0x1bd4   : > { %v3777_v60 = vmul.f32 %v5065_v49, %v3772_v56  ;;  %3966 = vmatpush.msrb.mxu2 %v4923_v40  ;;  %v5070_v56 = vld [vmem:[%s6944_s24 + $0x2] ss:$0 sm:$0xff] }
0x1bd5   : > { %v3766_v62 = vsub.f32 1.5, %v3765_v59 }
0x1bd6   : > { %v3782_v63 = vadd.f32 %v5066_v54, %v3777_v60 }
0x1bd7   : > { %v3767_v1 = vmul.f32 %v5189_v33, %v3766_v62 }
0x1bd8   : > { %4898 = vmatmul.msk.f32.vlgmr.msrb.gmra.mxu0 %vm1036_vm4, %v3782_v63 }
0x1bd9   : > { %v3771_v2 = vsel %vm3770_vm12, %v5189_v33, %v3767_v1 }
0x1bda   : > { %v3773_v4 = vmul.f32 %v3771_v2, %v6569_v31 }
0x1bdc   : > { %v3778_v7 = vmul.f32 %v5065_v49, %v3773_v4 }
0x1bde   : > { %v3783_v12 = vadd.f32 %v5066_v54, %v3778_v7  ;;  %v5071_v7 = vld [vmem:[%s6934_s14 + $0x3] ss:$0 sm:$0xff] }
0x1be0   : > { %4899 = vmatmul.msk.f32.gmra.mxu0 %vm1036_vm4, %v3783_v12 }
0x1c55   : > { %v3817_v18 = vpop.f32.mrf.mxu0 }
0x1c56   : > { %v3818_v20 = vadd.f32 %v5067_v9, %v3817_v18  ;;  %v5238_v18 = vld [vmem:[%s7035_s29] sm:$0xff] }
0x1c58   : > { %v3823_v10 = vmax.f32 %v3818_v20, 0.0 }
0x1c5a   : > { %3863 = vmatmul.f32.vlgmr.msrb.gmra.mxu1 %v3823_v10  ;;  %v5239_v10 = vld [vmem:[%s7037_s6] sm:$0xff] }
0x1c5d   : > { %v3820_v3 = vpop.f32.mrf.mxu0 }
0x1c5e   : > { %v3821_v23 = vadd.f32 %v5067_v9, %v3820_v3 }
0x1c60   : > { %v3824_v13 = vmax.f32 %v3821_v23, 0.0 }
0x1c62   : > { %3866 = vmatmul.f32.gmra.mxu1 %v3824_v13 }
0x1cd7   : > { %v3864_v26 = vpop.f32.mrf.mxu1 }
0x1cd8   : > { %v3865_v28 = vadd.f32 %v5068_v25, %v3864_v26 }
0x1cda   : > { %v3870_v17 = vadd.f32 %v3865_v28, %v3782_v63  ;;  %v5241_v28 = vld [vmem:[%s7037_s6 + $0x8] sm:$0x7f] }
0x1cdc   : > { %v3876_v30 = vsel %vm1036_vm4, %v3870_v17, 0.0 }
0x1cdd   : > { %3877 = vadd.xlane.f32.xlu0 %v3876_v30 }
0x1cdf   : > { %v3867_v31 = vpop.f32.mrf.mxu1 }
0x1ce0   : > { %v3868_v35 = vadd.f32 %v5068_v25, %v3867_v31  ;;  %v5240_v25 = vld [vmem:[%s7035_s29 + $0x8] sm:$0x7f] }
0x1ce2   : > { %v3871_v22 = vadd.f32 %v3868_v35, %v3783_v12 }
0x1ce4   : > { %v3879_v21 = vsel %vm1905_vm0, %v3871_v22, 0.0 }
0x1ce5   : > { %3880 = vadd.xlane.f32.xlu1 %v3879_v21 }
0x1d50   : > { %v3878_v6 = vpop.xlane.xlu0 %3877 }
0x1d51   : > { %v3882_v50 = vmul.f32 %v3878_v6, %v5881_v29 }
0x1d53   : > { %v3884_v24 = vsub.f32 %v3870_v17, %v3882_v50 }
0x1d55   : > { %v3886_v44 = vmul.f32 %v3884_v24, %v3884_v24 }
0x1d57   : > { %v3888_v11 = vsel %vm1036_vm4, %v3886_v44, 0.0 }
0x1d58   : > { %3889 = vadd.xlane.f32.xlu2 %v3888_v11  ;;  %v3881_v15 = vpop.xlane.xlu1 %3880 }
0x1d59   : > { %v3883_v19 = vmul.f32 %v3881_v15, %v5881_v29 }
0x1d5b   : > { %v3885_v36 = vsub.f32 %v3871_v22, %v3883_v19 }
0x1d5d   : > { %v3887_v27 = vmul.f32 %v3885_v36, %v3885_v36 }
0x1d5f   : > { %v3891_v55 = vsel %vm1905_vm0, %v3887_v27, 0.0 }
0x1d60   : > { %3892 = vadd.xlane.f32.xlu0 %v3891_v55 }
0x1dcb   : > { %v3890_v42 = vpop.xlane.xlu2 %3889 }
0x1dcc   : > { %v3894_v46 = vmul.f32 %v3890_v42, %v5881_v29 }
0x1dce   : > { %v3896_v41 = vadd.f32 1e-05, %v3894_v46 }
0x1dd0   : > { %5190 = vrsqrt.f32 %v3896_v41  ;;  %vm3904_vm13 = vweird.f32 %v3896_v41 }
0x1dd3   : > { %v3893_v39 = vpop.xlane.xlu0 %3892 }
0x1dd4   : > { %v3895_v14 = vmul.f32 %v3893_v39, %v5881_v29 }
0x1dd6   : > { %v5191_v43 = vpop.eup %5190  ;;  %v3897_v51 = vadd.f32 1e-05, %v3895_v14 }
0x1dd7   : > { %v3899_v45 = vmul.f32 %v5191_v43, %v3896_v41  ;;  %vm3905_vm0 = vweird.f32 %v5191_v43 }
0x1dd8   : > { %5192 = vrsqrt.f32 %v3897_v51  ;;  %vm3906_vm14 = vmor %vm3904_vm13, %vm3905_vm0  ;;  %vm3914_vm1 = vweird.f32 %v3897_v51 }
0x1dd9   : > { %v3900_v33 = vmul.f32 %v5191_v43, %v3899_v45 }
0x1ddb   : > { %v3901_v57 = vmul.f32 0.5, %v3900_v33 }
0x1ddd   : > { %v3902_v47 = vsub.f32 1.5, %v3901_v57 }
0x1dde   : > { %v5193_v48 = vpop.eup %5192 }
0x1ddf   : > { %v3903_v49 = vmul.f32 %v5191_v43, %v3902_v47  ;;  %v3909_v52 = vmul.f32 %v5193_v48, %v3897_v51  ;;  %vm3915_vm15 = vweird.f32 %v5193_v48 }
0x1de0   : > { %vm3916_vm2 = vmor %vm3914_vm1, %vm3915_vm15 }
0x1de1   : > { %v3907_v34 = vsel %vm3906_vm14, %v5191_v43, %v3903_v49  ;;  %v3910_v54 = vmul.f32 %v5193_v48, %v3909_v52  ;;  %v4919_v43 = vld [vmem:[%s6935_s15 + $0x60] sm:$0xff] }
0x1de2   : > { %v3918_v58 = vmul.f32 %v3907_v34, %v3884_v24  ;;  %4118 = vmatpush.msrb.mxu3 %v4919_v43 }
0x1de3   : > { %v3911_v59 = vmul.f32 0.5, %v3910_v54 }
0x1de4   : > { %v3923_v60 = vmul.f32 %v5069_v53, %v3918_v58 }
0x1de5   : > { %v3912_v61 = vsub.f32 1.5, %v3911_v59 }
0x1de6   : > { %v6677_v62 = vadd.f32 %v5070_v56, %v3923_v60 }
0x1de7   : > { %v3913_v63 = vmul.f32 %v5193_v48, %v3912_v61 }
0x1de8   : > { %4928 = vmatmul.msk.f32.vlgmr.msrb.gmra.mxu2 %vm1036_vm4, %v6677_v62 }
0x1de9   : > { %v3917_v0 = vsel %vm3916_vm2, %v5193_v48, %v3913_v63 }
0x1dea   : > { %v3919_v1 = vmul.f32 %v3917_v0, %v3885_v36 }
0x1dec   : > { %v3924_v2 = vmul.f32 %v5069_v53, %v3919_v1 }
0x1dee   : > { %v3929_v4 = vadd.f32 %v5070_v56, %v3924_v2 }
0x1df0   : > { %4929 = vmatmul.msk.f32.gmra.mxu2 %vm1036_vm4, %v3929_v4 }
0x1e6b   : > { %v3968_v12 = vpop.f32.mrf.mxu2 }
0x1e6c   : > { %v6685_v8 = vadd.f32 %v5071_v7, %v3968_v12 }
0x1e6e   : > { %4930 = vmatmul.msk.f32.vlgmr.msra.gmra.mxu3 %vm1233_vm6, %v6685_v8  ;;  %v3974_v20 = vmul.f32 %v5238_v18, %v6685_v8 }
0x1e73   : > { %v3971_v5 = vpop.f32.mrf.mxu2 }
0x1e74   : > { %v6689_v16 = vadd.f32 %v5071_v7, %v3971_v5 }
0x1e76   : > { %4931 = vmatmul.msk.f32.gmra.mxu3 %vm1233_vm6, %v6689_v16  ;;  %v3975_v26 = vmul.f32 %v5240_v25, %v6689_v16  ;;  %vm4044_vm6 = vcmask 114688  }
0x1ef1   : > { %v3999_v9 = vpop.f32.mrf.mxu3 }
0x1ef2   : > { %v4005_v3 = vmul.f32 %v5239_v10, %v3999_v9 }
0x1ef4   : > { %v4007_v23 = vadd.f32 %v4005_v3, %v3974_v20  ;;  %v4920_v3 = vld [vmem:[%s6935_s15 + $0x68] sm:$0xff] }
0x1ef5   : > { %4229 = vmatpush.msra.mxu3 %v4920_v3 }
0x1ef6   : > { %4014 = vrot.lane.b32.xlu2 %v4007_v23, %s7051_s28 }
0x1ef9   : > { %v4002_v13 = vpop.f32.mrf.mxu3 }
0x1efa   : > { %v4006_v17 = vmul.f32 %v5241_v28, %v4002_v13 }
0x1efc   : > { %v4008_v30 = vadd.f32 %v4006_v17, %v3975_v26 }
0x1efe   : > { %4128 = vrot.lane.b32.xlu0 %v4008_v30, %s7039_s11  ;;  %4016 = vrot.lane.b32.xlu1 %v4008_v30, %s7051_s28  ;;  %s7071_s28 = sld [smem:[#allocation31_spill]] }
0x1f06   : > { %4124 = vrot.lane.b32.xlu0 %v4007_v23, %s7040_s0  ;;  %4126 = vrot.lane.b32.xlu1 %v4007_v23, %s7039_s11  ;;  %s7056_s11 = smov 104   ;;  %s7057_s0 = smov 112  }
0x1f0e   : > { %4070 = vrot.lane.b32.xlu0 %v6685_v8, %s7041_s5 }
0x1f50   : > { %v4015_v35 = vpop.permute.xlu2 %4014 }
0x1f70   : > { %v4017_v31 = vpop.permute.xlu1 %4016  ;;  %v4129_v22 = vpop.permute.xlu0 %4128 }
0x1f71   : > { %4933 = vmatpush.xpose.msk.msra.mxu0 %vm1278_vm7, %v4017_v31 }
0x1f75   : > { %4934 = vmatpush.xpose.msk.msra.mxu0 %vm1278_vm7, %v4015_v35 }
0x1f78   : > { %v4127_v21 = vpop.permute.xlu1 %4126  ;;  %4935 = vmatmul.msk.f32.vlgmr.msra.gmra.mxu0 %vm1278_vm7, %v4007_v23  ;;  %v4125_v6 = vpop.permute.xlu0 %4124 }
0x1f79   : > { %4939 = vmatpush.xpose.msk.msrb.mxu0 %vm1278_vm7, %v4129_v22 }
0x1f7d   : > { %4940 = vmatpush.xpose.msk.msrb.mxu0 %vm1278_vm7, %v4127_v21 }
0x1f80   : > { %4941 = vmatmul.msk.f32.vlgmr.msrb.gmra.mxu0 %vm1278_vm7, %v4125_v6  ;;  %v4071_v41 = vpop.permute.xlu0 %4070  ;;  %v4932_v6 = vld [vmem:[%s7058_s25 + $0x3] sm:$0x1] }
0x1ff5   : > { %v4041_v50 = vpop.f32.mrf.mxu0 }
0x1ff6   : > { %v4045_v24 = vsel %vm4044_vm6, %v4041_v50, -inf }
0x1ff7   : > { %4046 = vmax.xlane.f32.xlu2 %v4045_v24 }
0x1ffd   : > { %v4153_v44 = vpop.f32.mrf.mxu0 }
0x1ffe   : > { %v4156_v11 = vsel %vm4044_vm6, %v4153_v44, -inf }
0x1fff   : > { %4157 = vmax.xlane.f32.xlu1 %v4156_v11 }
0x2018   : > { %4072 = vrot.lane.b32.xlu1 %v6689_v16, %s7041_s5 }
0x2020   : > { %4239 = vrot.lane.b32.xlu1 %v4008_v30, %s7044_s2 }
0x2028   : > { %4348 = vrot.lane.b32.xlu1 %v4007_v23, %s7045_s7 }
0x206a   : > { %v4047_v15 = vpop.xlane.xlu2 %4046 }
0x206b   : > { %v4048_v19 = vsub.f32 %v4041_v50, %v4047_v15 }
0x206d   : > { %v4049_v36 = vmul.f32 1.442695, %v4048_v19 }
0x206f   : > { %5194 = vpow2.f32 %v4049_v36 }
0x2072   : > { %v4158_v27 = vpop.xlane.xlu1 %4157 }
0x2073   : > { %v4159_v55 = vsub.f32 %v4153_v44, %v4158_v27 }
0x2075   : > { %v5195_v32 = vpop.eup %5194  ;;  %v4160_v37 = vmul.f32 1.442695, %v4159_v55 }
0x2076   : > { %v4051_v38 = vsel %vm4044_vm6, %v5195_v32, 0.0 }
0x2077   : > { %5196 = vpow2.f32 %v4160_v37  ;;  %4052 = vadd.xlane.f32.xlu0 %v4051_v38 }
0x207d   : > { %v5197_v40 = vpop.eup %5196 }
0x207e   : > { %v4162_v42 = vsel %vm4044_vm6, %v5197_v40, 0.0 }
0x207f   : > { %4163 = vadd.xlane.f32.xlu2 %v4162_v42 }
0x208a   : > { %v4073_v46 = vpop.permute.xlu1 %4072 }
0x208b   : > { %4936 = vmatpush.msk.msra.mxu2 %vm1373_vm10, %v4073_v46  ;;  %4181 = vrot.lane.b32.xlu0 %v6685_v8, %s7042_s3 }
0x208d   : > { %4095 = vmatpush.msra.mxu2 %v4071_v41 }
0x2092   : > { %v4240_v39 = vpop.permute.xlu1 %4239 }
0x2093   : > { %4945 = vmatpush.xpose.msk.msra.mxu0 %vm1278_vm7, %v4240_v39  ;;  %4237 = vrot.lane.b32.xlu0 %v4007_v23, %s7044_s2  ;;  %s7067_s2 = sld [smem:[#allocation12_spill]] }
0x2097   : > { %4183 = vrot.lane.b32.xlu2 %v6689_v16, %s7042_s3  ;;  %s7066_s3 = sld [smem:[#allocation9_spill]] }
0x209a   : > { %v4349_v13 = vpop.permute.xlu1 %4348 }
0x209b   : > { %4346 = vrot.lane.b32.xlu0 %v4007_v23, %s7056_s11  ;;  %s4623_s11 = scalar_lea.hbm %s7068_s30, %s7067_s2 }
0x209c   : > { %s4627_s6 = sshll.u32 %s4623_s11, 4  ;;  %s4628_s6 = int_to_ptr.hbm [resolvable:$true] %s4627_s6 }
0x209f   : > { %4350 = vrot.lane.b32.xlu2 %v4008_v30, %s7045_s7 }
0x20a7   : > { %4235 = vrot.lane.b32.xlu2 %v4007_v23, %s7057_s0 }
0x20ea   : > { %v4053_v14 = vpop.xlane.xlu0 %4052 }
0x20eb   : > { %5198 = vrcp.f32 %v4053_v14  ;;  %v4065_v47 = vand.u32 2147483648, %v4053_v14  ;;  %v4063_v49 = vand.u32 2147483647, %v4053_v14  ;;  %vm4059_vm11 = vweird.f32 %v4053_v14 }
0x20ed   : > { %v4066_v34 = vor.u32 1.1754944e-38, %v4065_v47  ;;  %vm4064_vm9 = vcmp.eq.f32.partialorder %v4063_v49, 8.507059e+37 }
0x20f1   : > { %v5199_v51 = vpop.eup %5198 }
0x20f2   : > { %v4055_v45 = vmul.f32 %v5199_v51, %v4053_v14  ;;  %v4164_v33 = vpop.xlane.xlu2 %4163  ;;  %vm4060_vm5 = vweird.f32 %v5199_v51 }
0x20f3   : > { %5200 = vrcp.f32 %v4164_v33  ;;  %vm4061_vm3 = vmor %vm4059_vm11, %vm4060_vm5  ;;  %v4176_v63 = vand.u32 2147483648, %v4164_v33  ;;  %v4174_v2 = vand.u32 2147483647, %v4164_v33  ;;  %vm4170_vm0 = vweird.f32 %v4164_v33 }
0x20f4   : > { %v4056_v57 = vsub.f32 1.0, %v4055_v45 }
0x20f5   : > { %v4177_v7 = vor.u32 1.1754944e-38, %v4176_v63  ;;  %vm4175_vm14 = vcmp.eq.f32.partialorder %v4174_v2, 8.507059e+37 }
0x20f6   : > { %v4057_v48 = vmul.f32 %v5199_v51, %v4056_v57 }
0x20f8   : > { %v4058_v52 = vadd.f32 %v5199_v51, %v4057_v48  ;;  %v4921_v48 = vld [vmem:[%s6935_s15 + $0x70] sm:$0xff] }
0x20f9   : > { %v5201_v53 = vpop.eup %5200 }
0x20fa   : > { %v4062_v54 = vsel %vm4061_vm3, %v5199_v51, %v4058_v52  ;;  %v4166_v56 = vmul.f32 %v5201_v53, %v4164_v33  ;;  %v4184_v58 = vpop.permute.xlu2 %4183  ;;  %vm4171_vm12 = vweird.f32 %v5201_v53 }
0x20fb   : > { %v4067_v59 = vsel %vm4064_vm9, %v4066_v34, %v4062_v54  ;;  %4942 = vmatpush.msk.msrb.mxu2 %vm1373_vm10, %v4184_v58  ;;  %vm4172_vm13 = vmor %vm4170_vm0, %vm4171_vm12 }
0x20fc   : > { %v4069_v60 = vmul.f32 %v5195_v32, %v4067_v59  ;;  %v4167_v61 = vsub.f32 1.0, %v4166_v56 }
0x20fd   : > { %v4182_v0 = vpop.permute.xlu0 %4181 }
0x20fe   : > { %v4168_v1 = vmul.f32 %v5201_v53, %v4167_v61  ;;  %4937 = vmatmul.msk.f32.vlgmr.msra.gmra.mxu2 %vm1310_vm8, %v4069_v60 }
0x20ff   : > { %4206 = vmatpush.msrb.mxu2 %v4182_v0 }
0x2100   : > { %v4169_v4 = vadd.f32 %v5201_v53, %v4168_v1 }
0x2101   : > { %4340 = vmatpush.msra.mxu2 %v4921_v48  ;;  %v4965_v48 = vld [vmem:[%s6941_s21 + $0x180] sm:$0xff] }
0x2102   : > { %v4173_v12 = vsel %vm4172_vm13, %v5201_v53, %v4169_v4  ;;  %v4351_v5 = vpop.permute.xlu2 %4350  ;;  %v4922_v4 = vld [vmem:[%s6935_s15 + $0x78] sm:$0xff] }
0x2103   : > { %v4178_v9 = vsel %vm4175_vm14, %v4177_v7, %v4173_v12 }
0x2104   : > { %v4180_v18 = vmul.f32 %v5197_v40, %v4178_v9 }
0x2105   : > { %v4238_v20 = vpop.permute.xlu0 %4237 }
0x2106   : > { %4943 = vmatmul.msk.f32.vlgmr.msrb.gmra.mxu2 %vm1310_vm8, %v4180_v18  ;;  %4946 = vmatpush.xpose.msk.msra.mxu0 %vm1278_vm7, %v4238_v20 }
0x210a   : > { %v4236_v10 = vpop.permute.xlu2 %4235 }
0x210b   : > { %4947 = vmatmul.msk.f32.vlgmr.msra.gmra.mxu0 %vm1278_vm7, %v4236_v10 }
0x210d   : > { %v4347_v17 = vpop.permute.xlu0 %4346 }
0x2181   : > { %v4097_v23 = vpop.f32.mrf.mxu2 }
0x2182   : > { %4938 = vmatmul.msk.f32.vlgmr.msrb.gmra.mxu3 %vm1278_vm7, %v4097_v23 }
0x2183   : > { %4951 = vmatpush.xpose.msk.msrb.mxu3 %vm1278_vm7, %v4351_v5 }
0x2187   : > { %4952 = vmatpush.xpose.msk.msrb.mxu3 %vm1278_vm7, %v4349_v13 }
0x2188   : > { %v4264_v25 = vpop.f32.mrf.mxu0 }
0x2189   : > { %v4208_v26 = vpop.f32.mrf.mxu2  ;;  %v4267_v28 = vsel %vm4044_vm6, %v4264_v25, -inf }
0x218a   : > { %4944 = vmatmul.msk.f32.vlgmr.msra.gmra.mxu3 %vm1278_vm7, %v4208_v26  ;;  %4268 = vmax.xlane.f32.xlu1 %v4267_v28  ;;  %v4962_v28 = vld [vmem:[%s6939_s19 + $0x78] sm:$0xff] }
0x218b   : > { %4508 = vmatpush.msrb.mxu2 %v4962_v28 }
0x2192   : > { %4953 = vmatmul.msk.f32.vlgmr.msrb.gmra.mxu3 %vm1278_vm7, %v4347_v17  ;;  %v4960_v17 = vld [vmem:[%s6939_s19 + $0x68] sm:$0xff] }
0x21fd   : > { %v4269_v30 = vpop.xlane.xlu1 %4268 }
0x21fe   : > { %v4270_v31 = vsub.f32 %v4264_v25, %v4269_v30  ;;  %v4959_v30 = vld [vmem:[%s6939_s19 + $0x60] sm:$0xff] }
0x2200   : > { %v4271_v35 = vmul.f32 1.442695, %v4270_v31  ;;  %v4980_v31 = vld [vmem:[%s6941_s21 + $0x1f8] sm:$0xff] }
0x2201   : > { %4536 = vmatpush.msra.mxu3 %v4980_v31  ;;  %v4589_v31 = vld [vmem:[%s7071_s28] sm:$0x1] }
0x2202   : > { %5202 = vpow2.f32 %v4271_v35  ;;  %v4979_v35 = vld [vmem:[%s6941_s21 + $0x1f0] sm:$0xff] }
0x2203   : > { %4537 = vmatpush.msra.mxu3 %v4979_v35 }
0x2205   : > { %v4120_v22 = vpop.f32.mrf.mxu3 }
0x2206   : > { %v4123_v24 = vadd.f32 %v4932_v6, %v4120_v22  ;;  %v4978_v22 = vld [vmem:[%s6941_s21 + $0x1e8] sm:$0xff] }
0x2207   : > { %4538 = vmatpush.msra.mxu3 %v4978_v22 }
0x2208   : > { %v5203_v21 = vpop.eup %5202 }
0x2209   : > { %v4273_v50 = vsel %vm4044_vm6, %v5203_v21, 0.0 }
0x220a   : > { %4274 = vadd.xlane.f32.xlu0 %v4273_v50  ;;  %v4977_v50 = vld [vmem:[%s6941_s21 + $0x1e0] sm:$0xff] }
0x220b   : > { %4539 = vmatpush.msra.mxu3 %v4977_v50 }
0x220d   : > { %v4231_v44 = vpop.f32.mrf.mxu3 }
0x220e   : > { %v6759_v11 = vadd.f32 %v4231_v44, %v4123_v24  ;;  %v4976_v44 = vld [vmem:[%s6941_s21 + $0x1d8] sm:$0xff] }
0x220f   : > { %4540 = vmatpush.msra.mxu3 %v4976_v44 }
0x2215   : > { %v4375_v15 = vpop.f32.mrf.mxu3 }
0x2216   : > { %v4378_v19 = vsel %vm4044_vm6, %v4375_v15, -inf }
0x2217   : > { %4379 = vmax.xlane.f32.xlu2 %v4378_v19  ;;  %v4973_v19 = vld [vmem:[%s6941_s21 + $0x1c0] sm:$0xff] }
0x221e   : > { %4292 = vrot.lane.b32.xlu0 %v6685_v8, %s7059_s4 }
0x2226   : > { %4403 = vrot.lane.b32.xlu0 %v6685_v8, %s7060_s10 }
0x222f   : > { %4294 = vrot.lane.b32.xlu2 %v6689_v16, %s7059_s4  ;;  %s5256_s4 = sshra.s32 %s4628_s6, 4  ;;  %s5257_s4 = int_to_ptr.hbm [resolvable:$true] %s5256_s4 }
0x2230   : > { %p5263_p0 = scmp.lt.s32.totalorder %s5257_s4, %s7069_s1 }
0x227d   : > { %v4275_v36 = vpop.xlane.xlu0 %4274 }
0x227e   : > { %5204 = vrcp.f32 %v4275_v36  ;;  %v4287_v42 = vand.u32 2147483648, %v4275_v36  ;;  %vm4281_vm1 = vweird.f32 %v4275_v36  ;;  %v4285_v41 = vand.u32 2147483647, %v4275_v36 }
0x2280   : > { %v4288_v8 = vor.u32 1.1754944e-38, %v4287_v42  ;;  %vm4286_vm5 = vcmp.eq.f32.partialorder %v4285_v41, 8.507059e+37  ;;  %v4969_v42 = vld [vmem:[%s6941_s21 + $0x1a0] sm:$0xff]  ;;  %v4968_v41 = vld [vmem:[%s6941_s21 + $0x198] sm:$0xff] }
0x2284   : > { %v5205_v27 = vpop.eup %5204 }
0x2285   : > { %v4277_v55 = vmul.f32 %v5205_v27, %v4275_v36  ;;  %vm4282_vm15 = vweird.f32 %v5205_v27 }
0x2286   : > { %vm4283_vm2 = vmor %vm4281_vm1, %vm4282_vm15 }
0x2287   : > { %v4278_v32 = vsub.f32 1.0, %v4277_v55 }
0x2289   : > { %v4279_v37 = vmul.f32 %v5205_v27, %v4278_v32  ;;  %v4971_v32 = vld [vmem:[%s6941_s21 + $0x1b0] sm:$0xff] }
0x228a   : > { %v4380_v38 = vpop.xlane.xlu2 %4379 }
0x228b   : > { %v4280_v40 = vadd.f32 %v5205_v27, %v4279_v37  ;;  %v4381_v46 = vsub.f32 %v4375_v15, %v4380_v38  ;;  %v4974_v15 = vld [vmem:[%s6941_s21 + $0x1c8] sm:$0xff] }
0x228c   : > { %v4970_v38 = vld [vmem:[%s6941_s21 + $0x1a8] sm:$0xff] }
0x228d   : > { %v4382_v39 = vmul.f32 1.442695, %v4381_v46  ;;  %v4284_v14 = vsel %vm4283_vm2, %v5205_v27, %v4280_v40  ;;  %v4972_v27 = vld [vmem:[%s6941_s21 + $0x1b8] sm:$0xff] }
0x228e   : > { %v4289_v43 = vsel %vm4286_vm5, %v4288_v8, %v4284_v14  ;;  %v4957_v14 = vld [vmem:[%s6937_s17 + $0x3] sm:$0x1] }
0x228f   : > { %5206 = vpow2.f32 %v4382_v39  ;;  %v4291_v45 = vmul.f32 %v5203_v21, %v4289_v43 }
0x2290   : > { %v4293_v33 = vpop.permute.xlu0 %4292 }
0x2292   : > { %v4295_v51 = vpop.permute.xlu2 %4294 }
0x2293   : > { %4948 = vmatpush.msk.msra.mxu1 %vm1373_vm10, %v4295_v51  ;;  %v4958_v51 = vld [vmem:[%s6938_s18 + $0x3] sm:$0x1] }
0x2295   : > { %v5207_v57 = vpop.eup %5206  ;;  %4317 = vmatpush.msra.mxu1 %v4293_v33 }
0x2296   : > { %4949 = vmatmul.msk.f32.vlgmr.msra.gmra.mxu1 %vm1310_vm8, %v4291_v45  ;;  %v4384_v47 = vsel %vm4044_vm6, %v5207_v57, 0.0 }
0x2297   : > { %4385 = vadd.xlane.f32.xlu1 %v4384_v47  ;;  %4451 = vmatpush.msrb.mxu1 %v4922_v4  ;;  %v4966_v47 = vld [vmem:[%s6941_s21 + $0x188] sm:$0xff]  ;;  %v4587_v4 = vld [vmem:[%s7065_s27 + $0x10] sm:$0xff] }
0x2298   : > { %v4404_v1 = vpop.permute.xlu0 %4403 }
0x22b0   : > { %4405 = vrot.lane.b32.xlu1 %v6689_v16, %s7060_s10  ;;  %s809_s10 = sand.u32 1, %s7066_s3   ;;  %s5258_s3 = scalar_lea.hbm %s5257_s4, 1 }
0x22b1   : > { %s810_s7 = scalar_lea.vmem [#allocation5], %s809_s10  ;;  %s4615_s25 = scalar_lea.sflag [#allocation6], %s809_s10 }
0x22b2   : > { %s4625_s9 = sshll.u32 %s810_s7, 4  ;;  %p5259_p11 = scmp.ne.s32.totalorder %s5257_s4, %s5258_s3  ;;  %s4626_s9 = int_to_ptr.vmem [resolvable:$true] %s4625_s9 }
0x22b3   : > { %p5264_p1 = scmp.lt.s32.totalorder %s5262_s16, %s5258_s3 }
0x22b4   : > { %p5260_p12 = pnand %p5259_p11, %p5497_p5 }
0x22b5   : > { %p5265_p2 = por %p5264_p1, %p5263_p0 }
0x22b6   : > { %p5261_p13 = pneg %p5260_p12 }
0x22b8   : > { %p5266_p3 = pnand %p5265_p2, %p5261_p13 }
0x230a   : > { %v4386_v49 = vpop.xlane.xlu1 %4385 }
0x230b   : > { %5208 = vrcp.f32 %v4386_v49  ;;  %v4398_v59 = vand.u32 2147483648, %v4386_v49  ;;  %vm4392_vm11 = vweird.f32 %v4386_v49  ;;  %v4396_v60 = vand.u32 2147483647, %v4386_v49 }
0x230d   : > { %v4399_v61 = vor.u32 1.1754944e-38, %v4398_v59  ;;  %vm4397_vm9 = vcmp.eq.f32.partialorder %v4396_v60, 8.507059e+37 }
0x2311   : > { %v5209_v52 = vpop.eup %5208 }
0x2312   : > { %v4388_v53 = vmul.f32 %v5209_v52, %v4386_v49  ;;  %vm4393_vm6 = vweird.f32 %v5209_v52  ;;  %v4963_v49 = vld [vmem:[%s6940_s20 + $0x3] sm:$0x1] }
0x2313   : > { %v4319_v34 = vpop.f32.mrf.mxu1  ;;  %vm4394_vm3 = vmor %vm4392_vm11, %vm4393_vm6 }
0x2314   : > { %v4389_v54 = vsub.f32 1.0, %v4388_v53  ;;  %4950 = vmatmul.msk.f32.vlgmr.msra.gmra.mxu2 %vm1278_vm7, %v4319_v34 }
0x2316   : > { %v4390_v56 = vmul.f32 %v5209_v52, %v4389_v54  ;;  %v4981_v54 = vld [vmem:[%s6942_s22 + $0x3] sm:$0x1] }
0x2318   : > { %v4391_v58 = vadd.f32 %v5209_v52, %v4390_v56 }
0x231a   : > { %v4395_v16 = vsel %vm4394_vm3, %v5209_v52, %v4391_v58 }
0x231b   : > { %v4400_v63 = vsel %vm4397_vm9, %v4399_v61, %v4395_v16 }
0x231c   : > { %v4402_v2 = vmul.f32 %v5207_v57, %v4400_v63  ;;  %v4967_v57 = vld [vmem:[%s6941_s21 + $0x190] sm:$0xff] }
0x2322   : > { %v4406_v0 = vpop.permute.xlu1 %4405 }
0x2323   : > { %4954 = vmatpush.msk.msrb.mxu0 %vm1373_vm10, %v4406_v0  ;;  %vm7061_vm10 = vcmask 253952  }
0x2325   : > { %4428 = vmatpush.msrb.mxu0 %v4404_v1 }
0x2326   : > { %4955 = vmatmul.msk.f32.vlgmr.msrb.gmra.mxu0 %vm1310_vm8, %v4402_v2  ;;  %vm7062_vm8 = vmmov %vm7061_vm10  ;;  %v4588_v2 = vld [vmem:[%s7065_s27 + $0x18] sm:$0xff] }
0x2327   : > { %vm7063_vm13 = vmmov %vm7062_vm8  ;;  %4605 = vmatpush.msra.mxu0 %v4588_v2 }
0x2328   : > { %vm7064_vm14 = vmmov %vm7062_vm8 }
0x2329   : > { %4606 = vmatpush.msra.mxu0 %v4587_v4 }
0x2397   : > { %v4342_v12 = vpop.f32.mrf.mxu2 }
0x2398   : > { %v4345_v5 = vadd.f32 %v4342_v12, %v6759_v11  ;;  %v4975_v11 = vld [vmem:[%s6941_s21 + $0x1d0] sm:$0xff]  ;;  %v4585_v12 = vld [vmem:[%s7065_s27] sm:$0xff] }
0x2399   : > { %4541 = vmatpush.msra.mxu3 %v4975_v11 }
0x239b   : > { %4542 = vmatpush.msra.mxu3 %v4974_v15 }
0x239d   : > { %4543 = vmatpush.msra.mxu3 %v4973_v19 }
0x239f   : > { %4544 = vmatpush.msra.mxu3 %v4972_v27 }
0x23a1   : > { %4545 = vmatpush.msra.mxu3 %v4971_v32 }
0x23a3   : > { %v4430_v7 = vpop.f32.mrf.mxu0  ;;  %4546 = vmatpush.msra.mxu3 %v4970_v38 }
0x23a4   : > { %4956 = vmatmul.msk.f32.vlgmr.msrb.gmra.mxu1 %vm1278_vm7, %v4430_v7  ;;  %v4586_v7 = vld [vmem:[%s7065_s27 + $0x8] sm:$0xff] }
0x23a5   : > { %4547 = vmatpush.msra.mxu3 %v4969_v42  ;;  %4607 = vmatpush.msra.mxu0 %v4586_v7 }
0x23a7   : > { %4548 = vmatpush.msra.mxu3 %v4968_v41  ;;  %4608 = vmatpush.msra.mxu0 %v4585_v12 }
0x23a9   : > { %4549 = vmatpush.msra.mxu3 %v4967_v57 }
0x23ab   : > { %4550 = vmatpush.msra.mxu3 %v4966_v47 }
0x23ad   : > { %4551 = vmatpush.msra.mxu3 %v4965_v48 }
0x2421   : > { %v4453_v9 = vpop.f32.mrf.mxu1 }
0x2422   : > { %v4456_v18 = vadd.f32 %v4453_v9, %v4345_v5 }
0x2424   : > { %v4457_v20 = vadd.f32 %v4456_v18, %v6677_v62  ;;  %v4961_v62 = vld [vmem:[%s6939_s19 + $0x70] sm:$0xff] }
0x2425   : > { %4509 = vmatpush.msrb.mxu2 %v4961_v62 }
0x2426   : > { %v4462_v10 = vsel %vm7061_vm10, %v4457_v20, 0.0 }
0x2427   : > { %4463 = vadd.xlane.f32.xlu2 %v4462_v10  ;;  %4510 = vmatpush.msrb.mxu2 %v4960_v17 }
0x2429   : > { %4511 = vmatpush.msrb.mxu2 %v4959_v30 }
0x249a   : > { %v4464_v3 = vpop.xlane.xlu2 %4463 }
0x249b   : > { %v4465_v23 = vmul.f32 %v4464_v3, %v5881_v29 }
0x249d   : > { %v4466_v13 = vsub.f32 %v4457_v20, %v4465_v23 }
0x249f   : > { %v4467_v25 = vmul.f32 %v4466_v13, %v4466_v13 }
0x24a1   : > { %v4468_v26 = vsel %vm7062_vm8, %v4467_v25, 0.0 }
0x24a2   : > { %4469 = vadd.xlane.f32.xlu1 %v4468_v26  ;;  %v4982_v26 = vld [vmem:[%s6943_s23 + $0x3] sm:$0x1] }
0x2515   : > { %v4470_v21 = vpop.xlane.xlu1 %4469 }
0x2516   : > { %v4471_v6 = vmul.f32 %v4470_v21, %v5881_v29 }
0x2518   : > { %v4472_v24 = vadd.f32 1e-05, %v4471_v6 }
0x251a   : > { %5210 = vrsqrt.f32 %v4472_v24  ;;  %vm4479_vm12 = vweird.f32 %v4472_v24 }
0x2520   : > { %v5211_v36 = vpop.eup %5210 }
0x2521   : > { %v4474_v55 = vmul.f32 %v5211_v36, %v4472_v24  ;;  %vm4480_vm7 = vweird.f32 %v5211_v36 }
0x2522   : > { %vm4481_vm0 = vmor %vm4479_vm12, %vm4480_vm7 }
0x2523   : > { %v4475_v37 = vmul.f32 %v5211_v36, %v4474_v55 }
0x2525   : > { %v4476_v40 = vmul.f32 0.5, %v4475_v37 }
0x2527   : > { %v4477_v46 = vsub.f32 1.5, %v4476_v40 }
0x2529   : > { %v4478_v39 = vmul.f32 %v5211_v36, %v4477_v46 }
0x252b   : > { %v4482_v8 = vsel %vm4481_vm0, %v5211_v36, %v4478_v39 }
0x252c   : > { %v4483_v43 = vmul.f32 %v4482_v8, %v4466_v13 }
0x252e   : > { %v4484_v45 = vmul.f32 %v4957_v14, %v4483_v43 }
0x2530   : > { %v4485_v33 = vadd.f32 %v4958_v51, %v4484_v45 }
0x2532   : > { %4964 = vmatmul.msk.f32.vlgmr.msrb.gmra.mxu2 %vm1036_vm4, %v4485_v33 }
0x25b5   : > { %v4513_v52 = vpop.f32.mrf.mxu2 }
0x25b6   : > { %v4514_v53 = vadd.f32 %v4963_v49, %v4513_v52 }
0x25b8   : > { %v4516_v34 = vmax.f32 %v4514_v53, 0.0 }
0x25ba   : > { %4552 = vmatmul.f32.vlgmr.msra.gmra.mxu3 %v4516_v34 }
0x263d   : > { %v4553_v56 = vpop.f32.mrf.mxu3 }
0x263e   : > { %v4554_v58 = vadd.f32 %v4981_v54, %v4553_v56 }
0x2640   : > { %v4556_v59 = vadd.f32 %v4554_v58, %v4485_v33 }
0x2642   : > { %v4561_v60 = vsel %vm7063_vm13, %v4556_v59, 0.0 }
0x2643   : > { %4562 = vadd.xlane.f32.xlu0 %v4561_v60 }
0x26b6   : > { %v4563_v16 = vpop.xlane.xlu0 %4562 }
0x26b7   : > { %v4564_v61 = vmul.f32 %v4563_v16, %v5881_v29 }
0x26b9   : > { %v4565_v63 = vsub.f32 %v4556_v59, %v4564_v61 }
0x26bb   : > { %v4566_v0 = vmul.f32 %v4565_v63, %v4565_v63 }
0x26bd   : > { %v4567_v1 = vsel %vm7064_vm14, %v4566_v0, 0.0 }
0x26be   : > { %4568 = vadd.xlane.f32.xlu2 %v4567_v1 }
0x2731   : > { %v4569_v5 = vpop.xlane.xlu2 %4568 }
0x2732   : > { %v4570_v9 = vmul.f32 %v4569_v5, %v5881_v29  ;;  %v4983_v29 = vld [vmem:[%s6944_s24 + $0x3] sm:$0x1] }
0x2734   : > { %v4571_v18 = vadd.f32 1e-05, %v4570_v9 }
0x2736   : > { %5212 = vrsqrt.f32 %v4571_v18  ;;  %vm4578_vm1 = vweird.f32 %v4571_v18 }
0x273c   : > { %v5213_v20 = vpop.eup %5212 }
0x273d   : > { %v4573_v10 = vmul.f32 %v5213_v20, %v4571_v18  ;;  %vm4579_vm15 = vweird.f32 %v5213_v20 }
0x273e   : > { %vm4580_vm2 = vmor %vm4578_vm1, %vm4579_vm15 }
0x273f   : > { %v4574_v3 = vmul.f32 %v5213_v20, %v4573_v10 }
0x2741   : > { %v4575_v23 = vmul.f32 0.5, %v4574_v3 }
0x2743   : > { %v4576_v13 = vsub.f32 1.5, %v4575_v23 }
0x2745   : > { %v4577_v25 = vmul.f32 %v5213_v20, %v4576_v13 }
0x2747   : > { %v4581_v28 = vsel %vm4580_vm2, %v5213_v20, %v4577_v25 }
0x2748   : > { %v4582_v62 = vmul.f32 %v4581_v28, %v4565_v63 }
0x274a   : > { %v4583_v17 = vmul.f32 %v4982_v26, %v4582_v62 }
0x274c   : > { %v4584_v30 = vadd.f32 %v4983_v29, %v4583_v17 }
0x274e   : > { %4984 = vmatmul.msk.f32.vlgmr.msra.gmra.mxu0 %vm1036_vm4, %v4584_v30 }
0x27cb   : > { %v4610_v35 = vpop.f32.mrf.mxu0 }
0x27cc   : > { %v4611_v22 = vadd.f32 %v4610_v35, %v4589_v31 }
0x27ce   : > { %4613 = vst [vmem:[%s810_s7] sm:$0x1] %v4611_v22 }
0x27cf   : > { %5269 = shalt.err (!%p5266_p3)
}
0x27d0   : > { %4989 = dma.vmem_to_hbm [thread:$0]  (%p5497_p5), %s4626_s9, 16, %s4628_s6, %s4615_s25  }
0x27d1 PF: > { %s7072_s10 = sld [smem:[#allocation11_spill]] }
0x27d2   : > { %s7073_s11 = sld [smem:[#allocation8_spill]] }
0x27d7   : > { %p4995_p4 = scmp.ge.s32.totalorder %s7072_s10, 2 }
0x27d8   : > { %s4639_s28 = sand.u32 1, %s7073_s11  }
0x27d9   : > { %p4992_p7 = pnand %p4995_p4, %p5501_p6  ;;  %s4640_s7 = scalar_lea.sflag [#allocation6], %s4639_s28 }
0x27db   : > { %p4993_p8 = pneg %p4992_p7 }
0x27dd   : > { %5287 = dma.done.wait (%p4993_p8), %s4640_s7, 16  }
0x27de   : > { %5289 = vsyncadd (%p4993_p8), %s4640_s7, 4294967280  ;;  %s7075_s30 = sld [smem:[#allocation13_spill]] }
0x27df   : > { %s7076_s7 = sld [smem:[#allocation9_spill]] }
0x27e0   : > { %s7077_s4 = sld [smem:[#allocation10_spill]] }
0x27e1   : > { %s7078_s8 = sld [smem:[#allocation14_spill]] }
0x27e4   : > { %p37_p9 = scmp.ge.s32.totalorder %s7075_s30, 4  }
0x27e6   :  { %39 = sbr.rel (!%p37_p9) target bundleno = 20 (0x14), region = 205 }
0x27eb   :  { %4645 = vsyncpa [#allocation6], 1 }
0x27ec   :  { %4647 = vsyncpa [#allocation6 + $0x1], 1 }

</bundles_post_ra>
